<compile_context>
chip_gen: v6e
topology: v6e:2x2x1
jax: 0.10.0
libtpu: 0.0.40
codegen_flags: <defaults>
</compile_context>

<pallas_src>
import jax
import jax.numpy as jnp
from jax.experimental import pallas as pl
from jax.experimental.pallas import tpu as pltpu

LEAKY_SLOPE = 0.01   # nn.LeakyReLU default negative_slope
BN_EPS = 1e-5        # nn.BatchNorm2d default eps
LANE = 128

# TODO(synk): BatchNorm is implemented in inference mode (running stats + affine);
# PyTorch training-mode batch statistics are not reproduced.
# TODO(synk): on v6e/v7x the matmul operands could be cast to bf16 (f32 accumulate)
# to halve the VMEM tile footprint; kept f32 here to match the f32 reference tightly.


def _round_up(x, m):
    return (x + m - 1) // m * m


def _wshift(x, s):
    """Circular shift along W (axis=1 of a (rows, W, C) value): y[:, w] = x[:, (w+s) % W]."""
    if s == 0:
        return x
    return jnp.concatenate([x[:, s:, :], x[:, :s, :]], axis=1)


def _conv3x3_fold(slab, w_ref, rows, width):
    """3x3 conv; circular W handled in VMEM, the 3 dx taps folded into the K dim.

    slab(dy) -> (rows, width, C) f32 rows shifted down by dy (H zero-pad halo already
    present in the slab).  w_ref[dy] is the (3*C, Cout) dx-folded weight slice.
    Returns the (rows*width, Cout) f32 accumulator.
    """
    acc = None
    for dy in range(3):
        xs = slab(dy)
        # tap dx in {0,1,2}  <->  input column (w + dx - 1) mod W
        patch = jnp.concatenate([_wshift(xs, -1), xs, _wshift(xs, 1)], axis=-1)
        m = jnp.dot(patch.reshape(rows * width, patch.shape[-1]), w_ref[dy],
                    preferred_element_type=jnp.float32)
        acc = m if acc is None else acc + m          # init from first tap
    return acc


def _double_conv_kernel(x_ref, w1_ref, s1_ref, t1_ref, w2_ref, s2_ref, t2_ref,
                        o_ref, h_ref):
    """Fused (conv3x3 -> BN -> LeakyReLU) x2 on one (tile_h, W) slab.

    x_ref : (tile_h+4, W, Cin)   input rows with a 2-row halo (H zero pad included)
    w1_ref: (3, 3*Cin, C1p)      stage-1 weights, dx folded into K
    w2_ref: (3, 3*C1p, C2p)      stage-2 weights, dx folded into K
    s*/t* : (1, C*)              fused BN scale / shift (conv bias folded in)
    o_ref : (tile_h, W, C2p)     lane-dense output tile
    h_ref : (tile_h+2, W, C1p)   VMEM scratch: stage-1 output with a 1-row halo
    """
    _, width, _ = x_ref.shape
    th, _, c2p = o_ref.shape
    r1 = th + 2
    c1p = h_ref.shape[-1]
    t = pl.program_id(1)

    # ---- stage 1: conv1 + BN1 + LeakyReLU over tile_h+2 rows (1-row halo) ----
    acc1 = _conv3x3_fold(lambda dy: x_ref[dy:dy + r1, :, :].astype(jnp.float32),
                         w1_ref, r1, width)
    y1 = acc1 * s1_ref[...] + t1_ref[...]
    y1 = jnp.where(y1 >= 0, y1, LEAKY_SLOPE * y1)
    h_ref[...] = y1.reshape(r1, width, c1p)

    # conv2 zero-pads H: halo rows that fall outside the image must be exactly 0.
    @pl.when(t == 0)
    def _():
        h_ref[0:1, :, :] = jnp.zeros((1, width, c1p), jnp.float32)

    @pl.when(t == pl.num_programs(1) - 1)
    def _():
        h_ref[r1 - 1:r1, :, :] = jnp.zeros((1, width, c1p), jnp.float32)

    # ---- stage 2: conv2 + BN2 + LeakyReLU over the tile_h output rows ----
    acc2 = _conv3x3_fold(lambda dy: h_ref[dy:dy + th, :, :], w2_ref, th, width)
    y2 = acc2 * s2_ref[...] + t2_ref[...]
    y2 = jnp.where(y2 >= 0, y2, LEAKY_SLOPE * y2)
    o_ref[...] = y2.reshape(th, width, c2p).astype(o_ref.dtype)


def _fuse_bn(bias, gamma, beta, mean, var, c_pad):
    """Fold conv bias + inference BN into y = acc*s + t; zero-pad channels to c_pad."""
    s = gamma.reshape(-1) * jax.lax.rsqrt(var.reshape(-1) + BN_EPS)
    t = beta.reshape(-1) + (bias.reshape(-1) - mean.reshape(-1)) * s
    pad = c_pad - s.shape[0]
    return (jnp.pad(s, (0, pad)).reshape(1, c_pad),
            jnp.pad(t, (0, pad)).reshape(1, c_pad))


def _pick_tile_h(H, W, cin, c1p, c2p, budget_bytes=6 * 1024 * 1024):
    """Largest divisor of H whose per-tile f32 footprint (double-buffered in/out
    tiles + stage-1 scratch + folded patches) fits a conservative VMEM budget
    (safe for v7x's 64 MiB physical / 32 MiB scoped VMEM)."""
    cin_l = max(_round_up(cin, LANE), LANE)       # trailing dim is lane-padded in VMEM
    def footprint(th):
        x_t = 2 * (th + 4) * W * cin_l            # input tile, double-buffered
        o_t = 2 * th * W * c2p                    # output tile, double-buffered
        h_t = (th + 2) * W * c1p                  # stage-1 scratch
        work = (th + 2) * W * 3 * c1p + th * W * 3 * c1p
        return 4 * (x_t + o_t + h_t + work)
    best = 1
    for th in range(1, min(H, 512) + 1):
        if H % th == 0 and footprint(th) <= budget_bytes:
            best = th
    return best


def double_conv_circular(x_nchw, p1, p2, *, tile_h=None):
    """Fused DoubleConvCircular forward (inference BN).  x_nchw: (N, Cin, H, W)."""
    w1, b1, g1, be1, m1, v1 = p1
    w2, b2, g2, be2, m2, v2 = p2
    N, cin, H, W = x_nchw.shape
    c1, c2 = w1.shape[-1], w2.shape[-1]
    c1p = _round_up(c1, LANE)     # lane-dense intermediate (VMEM only)
    c2p = _round_up(c2, LANE)     # lane-dense output stores

    if tile_h is None:
        tile_h = _pick_tile_h(H, W, cin, c1p, c2p)
    assert H % tile_h == 0, (H, tile_h)
    n_tiles = H // tile_h

    # NCHW -> NHWC (channels on the 128-lane axis).
    x = jnp.transpose(x_nchw, (0, 2, 3, 1))
    # Zero-pad H by 2 (combined conv1+conv2 halo). Circular W is handled inside the
    # kernel, so no W-padded HBM copy is made.
    xp = jnp.pad(x, ((0, 0), (2, 2), (0, 0), (0, 0)))
    # Halo'd H tiles so a plain BlockSpec can double-buffer the overlapping windows.
    rows = jnp.arange(n_tiles)[:, None] * tile_h + jnp.arange(tile_h + 4)[None, :]
    x_tiles = xp[:, rows]                                  # (N, T, tile_h+4, W, Cin)

    # Fold the 3 dx taps into the contraction dim; pad out-channels to 128.
    w1r = jnp.pad(w1.reshape(3, 3 * cin, c1), ((0, 0), (0, 0), (0, c1p - c1)))
    w2p = jnp.pad(w2, ((0, 0), (0, 0), (0, c1p - c1), (0, c2p - c2)))
    w2r = w2p.reshape(3, 3 * c1p, c2p)
    s1, t1 = _fuse_bn(b1, g1, be1, m1, v1, c1p)
    s2, t2 = _fuse_bn(b2, g2, be2, m2, v2, c2p)

    out = pl.pallas_call(
        _double_conv_kernel,
        out_shape=jax.ShapeDtypeStruct((N, H, W, c2p), x.dtype),
        grid=(N, n_tiles),
        in_specs=[
            pl.BlockSpec((None, None, tile_h + 4, W, cin),
                         lambda n, t: (n, t, 0, 0, 0)),
            pl.BlockSpec((3, 3 * cin, c1p), lambda n, t: (0, 0, 0)),
            pl.BlockSpec((1, c1p), lambda n, t: (0, 0)),
            pl.BlockSpec((1, c1p), lambda n, t: (0, 0)),
            pl.BlockSpec((3, 3 * c1p, c2p), lambda n, t: (0, 0, 0)),
            pl.BlockSpec((1, c2p), lambda n, t: (0, 0)),
            pl.BlockSpec((1, c2p), lambda n, t: (0, 0)),
        ],
        out_specs=pl.BlockSpec((None, tile_h, W, c2p), lambda n, t: (n, t, 0, 0)),
        scratch_shapes=[pltpu.VMEM((tile_h + 2, W, c1p), jnp.float32)],
        compiler_params=pltpu.CompilerParams(
            dimension_semantics=("parallel", "parallel"),   # v7x: shard over 2 TCs
            vmem_limit_bytes=32 * 1024 * 1024),
    )(x_tiles, w1r, s1, t1, w2r, s2, t2)

    out = out[..., :c2]                             # drop channel padding
    return jnp.transpose(out, (0, 3, 1, 2))         # NHWC -> NCHW


def make_params(key, cin, cout):
    kw, kb, kg, kbe, km, kv = jax.random.split(key, 6)
    w = jax.random.normal(kw, (3, 3, cin, cout), jnp.float32) * 0.1   # HWIO
    b = jax.random.normal(kb, (1, cout), jnp.float32) * 0.1
    gamma = 1.0 + 0.1 * jax.random.normal(kg, (1, cout), jnp.float32)
    beta = 0.1 * jax.random.normal(kbe, (1, cout), jnp.float32)
    mean = 0.1 * jax.random.normal(km, (1, cout), jnp.float32)
    var = 0.5 + jnp.abs(jax.random.normal(kv, (1, cout), jnp.float32))
    return (w, b, gamma, beta, mean, var)


# ---- pure-JAX reference (for correctness check) ----
def _ref_block(x, w, b, g, be, m, v):
    xp = jnp.concatenate([x[:, :, -1:, :], x, x[:, :, :1, :]], axis=2)   # circular W
    y = jax.lax.conv_general_dilated(
        xp, w, window_strides=(1, 1), padding=((1, 1), (0, 0)),
        dimension_numbers=('NHWC', 'HWIO', 'NHWC'))
    y = y + b.reshape(-1)
    y = (y - m.reshape(-1)) * jax.lax.rsqrt(v.reshape(-1) + BN_EPS) * g.reshape(-1) + be.reshape(-1)
    return jnp.where(y >= 0, y, LEAKY_SLOPE * y)


def _ref_forward(x_nchw, p1, p2):
    x = jnp.transpose(x_nchw, (0, 2, 3, 1))
    x = _ref_block(x, *p1)
    x = _ref_block(x, *p2)
    return jnp.transpose(x, (0, 3, 1, 2))


if __name__ == "__main__":
    key = jax.random.PRNGKey(0)
    kx, k1, k2 = jax.random.split(key, 3)
    N, Cin, Cout, H, W = 2, 4, 8, 16, 16
    x = jax.random.normal(kx, (N, Cin, H, W), jnp.float32)   # NCHW, like the module
    p1 = make_params(k1, Cin, Cout)      # conv1: in_ch -> out_ch
    p2 = make_params(k2, Cout, Cout)     # conv2: out_ch -> out_ch

    # tile_h=8 -> grid (N=2, T=2): exercises the halo / boundary-zeroing path.
    out = jax.block_until_ready(double_conv_circular(x, p1, p2, tile_h=8))
    ref = jax.block_until_ready(_ref_forward(x, p1, p2))

    assert out.shape == (N, Cout, H, W), out.shape
    err = float(jnp.max(jnp.abs(out - ref)))
    assert jnp.allclose(out, ref, atol=2e-3, rtol=2e-3), err
    print("KERNEL_OK")
</pallas_src>

<mosaic_0001>
module attributes {stable_mosaic.version = 11 : i64} {
  func.func @_double_conv_kernel(%arg0: i32, %arg1: i32, %arg2: memref<1x1x12x16x4xf32, #tpu.memory_space<vmem>>, %arg3: memref<3x12x128xf32, #tpu.memory_space<vmem>>, %arg4: memref<1x128xf32, #tpu.memory_space<vmem>>, %arg5: memref<1x128xf32, #tpu.memory_space<vmem>>, %arg6: memref<3x384x128xf32, #tpu.memory_space<vmem>>, %arg7: memref<1x128xf32, #tpu.memory_space<vmem>>, %arg8: memref<1x128xf32, #tpu.memory_space<vmem>>, %arg9: memref<1x8x16x128xf32, #tpu.memory_space<vmem>>, %arg10: memref<10x16x128xf32, #tpu.memory_space<vmem>>) attributes {dimension_semantics = [#tpu.dimension_semantics<parallel>, #tpu.dimension_semantics<parallel>], iteration_bounds = array<i64: 2, 2>, scalar_prefetch = 0 : i64, scratch_operands = 1 : i64, tpu.core_type = #tpu.core_type<tc>, window_params = [{transform_indices = @transform_0, window_bounds = array<i64: 1, 1, 12, 16, 4>}, {pipeline_mode = #tpu.pipeline_mode<synchronous>, transform_indices = @transform_1, window_bounds = array<i64: 3, 12, 128>}, {pipeline_mode = #tpu.pipeline_mode<synchronous>, transform_indices = @transform_2, window_bounds = array<i64: 1, 128>}, {pipeline_mode = #tpu.pipeline_mode<synchronous>, transform_indices = @transform_3, window_bounds = array<i64: 1, 128>}, {pipeline_mode = #tpu.pipeline_mode<synchronous>, transform_indices = @transform_4, window_bounds = array<i64: 3, 384, 128>}, {pipeline_mode = #tpu.pipeline_mode<synchronous>, transform_indices = @transform_5, window_bounds = array<i64: 1, 128>}, {pipeline_mode = #tpu.pipeline_mode<synchronous>, transform_indices = @transform_6, window_bounds = array<i64: 1, 128>}, {transform_indices = @transform_7, window_bounds = array<i64: 1, 8, 16, 128>}]} {
    %c0 = arith.constant 0 : index
    %c0_0 = arith.constant 0 : index
    %c0_1 = arith.constant 0 : index
    %c0_2 = arith.constant 0 : index
    %c0_3 = arith.constant 0 : index
    %0 = vector.load %arg2[%c0, %c0_0, %c0_1, %c0_2, %c0_3] : memref<1x1x12x16x4xf32, #tpu.memory_space<vmem>>, vector<1x1x10x16x4xf32>
    %1 = vector.shape_cast %0 : vector<1x1x10x16x4xf32> to vector<10x16x4xf32>
    %2 = vector.extract_strided_slice %1 {offsets = [0, 15, 0], sizes = [10, 1, 4], strides = [1, 1, 1]} : vector<10x16x4xf32> to vector<10x1x4xf32>
    %3 = vector.extract_strided_slice %1 {offsets = [0, 0, 0], sizes = [10, 15, 4], strides = [1, 1, 1]} : vector<10x16x4xf32> to vector<10x15x4xf32>
    %4 = tpu.concatenate %2, %3 in 1 : vector<10x1x4xf32>, vector<10x15x4xf32> -> vector<10x16x4xf32>
    %5 = vector.extract_strided_slice %1 {offsets = [0, 1, 0], sizes = [10, 15, 4], strides = [1, 1, 1]} : vector<10x16x4xf32> to vector<10x15x4xf32>
    %6 = vector.extract_strided_slice %1 {offsets = [0, 0, 0], sizes = [10, 1, 4], strides = [1, 1, 1]} : vector<10x16x4xf32> to vector<10x1x4xf32>
    %7 = tpu.concatenate %5, %6 in 1 : vector<10x15x4xf32>, vector<10x1x4xf32> -> vector<10x16x4xf32>
    %8 = tpu.concatenate %4, %1, %7 in 2 : vector<10x16x4xf32>, vector<10x16x4xf32>, vector<10x16x4xf32> -> vector<10x16x12xf32>
    %9 = vector.shape_cast %8 : vector<10x16x12xf32> to vector<160x12xf32>
    %c0_4 = arith.constant 0 : index
    %c0_5 = arith.constant 0 : index
    %c0_6 = arith.constant 0 : index
    %10 = vector.load %arg3[%c0_4, %c0_5, %c0_6] : memref<3x12x128xf32, #tpu.memory_space<vmem>>, vector<1x12x128xf32>
    %11 = vector.shape_cast %10 : vector<1x12x128xf32> to vector<12x128xf32>
    %cst = arith.constant dense<0.000000e+00> : vector<160x128xf32>
    %12 = tpu.matmul %9, %11, %cst {dimension_numbers = #tpu.dot_dimension_numbers<[1], [0], [0], [1], [0, 0, 1, 1], [], []>} : vector<160x12xf32>, vector<12x128xf32>, vector<160x128xf32> -> vector<160x128xf32>
    %c0_7 = arith.constant 0 : index
    %c0_8 = arith.constant 0 : index
    %c1 = arith.constant 1 : index
    %c0_9 = arith.constant 0 : index
    %c0_10 = arith.constant 0 : index
    %13 = vector.load %arg2[%c0_7, %c0_8, %c1, %c0_9, %c0_10] : memref<1x1x12x16x4xf32, #tpu.memory_space<vmem>>, vector<1x1x10x16x4xf32>
    %14 = vector.shape_cast %13 : vector<1x1x10x16x4xf32> to vector<10x16x4xf32>
    %15 = vector.extract_strided_slice %14 {offsets = [0, 15, 0], sizes = [10, 1, 4], strides = [1, 1, 1]} : vector<10x16x4xf32> to vector<10x1x4xf32>
    %16 = vector.extract_strided_slice %14 {offsets = [0, 0, 0], sizes = [10, 15, 4], strides = [1, 1, 1]} : vector<10x16x4xf32> to vector<10x15x4xf32>
    %17 = tpu.concatenate %15, %16 in 1 : vector<10x1x4xf32>, vector<10x15x4xf32> -> vector<10x16x4xf32>
    %18 = vector.extract_strided_slice %14 {offsets = [0, 1, 0], sizes = [10, 15, 4], strides = [1, 1, 1]} : vector<10x16x4xf32> to vector<10x15x4xf32>
    %19 = vector.extract_strided_slice %14 {offsets = [0, 0, 0], sizes = [10, 1, 4], strides = [1, 1, 1]} : vector<10x16x4xf32> to vector<10x1x4xf32>
    %20 = tpu.concatenate %18, %19 in 1 : vector<10x15x4xf32>, vector<10x1x4xf32> -> vector<10x16x4xf32>
    %21 = tpu.concatenate %17, %14, %20 in 2 : vector<10x16x4xf32>, vector<10x16x4xf32>, vector<10x16x4xf32> -> vector<10x16x12xf32>
    %22 = vector.shape_cast %21 : vector<10x16x12xf32> to vector<160x12xf32>
    %c1_11 = arith.constant 1 : index
    %c0_12 = arith.constant 0 : index
    %c0_13 = arith.constant 0 : index
    %23 = vector.load %arg3[%c1_11, %c0_12, %c0_13] : memref<3x12x128xf32, #tpu.memory_space<vmem>>, vector<1x12x128xf32>
    %24 = vector.shape_cast %23 : vector<1x12x128xf32> to vector<12x128xf32>
    %cst_14 = arith.constant dense<0.000000e+00> : vector<160x128xf32>
    %25 = tpu.matmul %22, %24, %cst_14 {dimension_numbers = #tpu.dot_dimension_numbers<[1], [0], [0], [1], [0, 0, 1, 1], [], []>} : vector<160x12xf32>, vector<12x128xf32>, vector<160x128xf32> -> vector<160x128xf32>
    %26 = arith.addf %12, %25 : vector<160x128xf32>
    %c0_15 = arith.constant 0 : index
    %c0_16 = arith.constant 0 : index
    %c2 = arith.constant 2 : index
    %c0_17 = arith.constant 0 : index
    %c0_18 = arith.constant 0 : index
    %27 = vector.load %arg2[%c0_15, %c0_16, %c2, %c0_17, %c0_18] : memref<1x1x12x16x4xf32, #tpu.memory_space<vmem>>, vector<1x1x10x16x4xf32>
    %28 = vector.shape_cast %27 : vector<1x1x10x16x4xf32> to vector<10x16x4xf32>
    %29 = vector.extract_strided_slice %28 {offsets = [0, 15, 0], sizes = [10, 1, 4], strides = [1, 1, 1]} : vector<10x16x4xf32> to vector<10x1x4xf32>
    %30 = vector.extract_strided_slice %28 {offsets = [0, 0, 0], sizes = [10, 15, 4], strides = [1, 1, 1]} : vector<10x16x4xf32> to vector<10x15x4xf32>
    %31 = tpu.concatenate %29, %30 in 1 : vector<10x1x4xf32>, vector<10x15x4xf32> -> vector<10x16x4xf32>
    %32 = vector.extract_strided_slice %28 {offsets = [0, 1, 0], sizes = [10, 15, 4], strides = [1, 1, 1]} : vector<10x16x4xf32> to vector<10x15x4xf32>
    %33 = vector.extract_strided_slice %28 {offsets = [0, 0, 0], sizes = [10, 1, 4], strides = [1, 1, 1]} : vector<10x16x4xf32> to vector<10x1x4xf32>
    %34 = tpu.concatenate %32, %33 in 1 : vector<10x15x4xf32>, vector<10x1x4xf32> -> vector<10x16x4xf32>
    %35 = tpu.concatenate %31, %28, %34 in 2 : vector<10x16x4xf32>, vector<10x16x4xf32>, vector<10x16x4xf32> -> vector<10x16x12xf32>
    %36 = vector.shape_cast %35 : vector<10x16x12xf32> to vector<160x12xf32>
    %c2_19 = arith.constant 2 : index
    %c0_20 = arith.constant 0 : index
    %c0_21 = arith.constant 0 : index
    %37 = vector.load %arg3[%c2_19, %c0_20, %c0_21] : memref<3x12x128xf32, #tpu.memory_space<vmem>>, vector<1x12x128xf32>
    %38 = vector.shape_cast %37 : vector<1x12x128xf32> to vector<12x128xf32>
    %cst_22 = arith.constant dense<0.000000e+00> : vector<160x128xf32>
    %39 = tpu.matmul %36, %38, %cst_22 {dimension_numbers = #tpu.dot_dimension_numbers<[1], [0], [0], [1], [0, 0, 1, 1], [], []>} : vector<160x12xf32>, vector<12x128xf32>, vector<160x128xf32> -> vector<160x128xf32>
    %40 = arith.addf %26, %39 : vector<160x128xf32>
    %c0_23 = arith.constant 0 : index
    %c0_24 = arith.constant 0 : index
    %41 = vector.load %arg4[%c0_23, %c0_24] : memref<1x128xf32, #tpu.memory_space<vmem>>, vector<1x128xf32>
    %42 = vector.broadcast %41 : vector<1x128xf32> to vector<160x128xf32>
    %43 = arith.mulf %40, %42 : vector<160x128xf32>
    %c0_25 = arith.constant 0 : index
    %c0_26 = arith.constant 0 : index
    %44 = vector.load %arg5[%c0_25, %c0_26] : memref<1x128xf32, #tpu.memory_space<vmem>>, vector<1x128xf32>
    %45 = vector.broadcast %44 : vector<1x128xf32> to vector<160x128xf32>
    %46 = arith.addf %43, %45 : vector<160x128xf32>
    %cst_27 = arith.constant 0.000000e+00 : f32
    %47 = vector.broadcast %cst_27 : f32 to vector<160x128xf32>
    %48 = arith.cmpf oge, %46, %47 : vector<160x128xf32>
    %cst_28 = arith.constant 0.00999999977 : f32
    %49 = vector.broadcast %cst_28 : f32 to vector<160x128xf32>
    %50 = arith.mulf %49, %46 : vector<160x128xf32>
    %51 = arith.select %48, %46, %50 : vector<160x128xi1>, vector<160x128xf32>
    %52 = vector.shape_cast %51 : vector<160x128xf32> to vector<10x16x128xf32>
    %c0_29 = arith.constant 0 : index
    %c0_30 = arith.constant 0 : index
    %c0_31 = arith.constant 0 : index
    %53 = vector.load %arg10[%c0_29, %c0_30, %c0_31] : memref<10x16x128xf32, #tpu.memory_space<vmem>>, vector<10x16x128xf32>
    tpu.vector_store %arg10[%c0_29, %c0_30, %c0_31], %52 {strides = array<i32>} : memref<10x16x128xf32, #tpu.memory_space<vmem>>, vector<10x16x128xf32>,
    %c0_i32 = arith.constant 0 : i32
    %54 = arith.cmpi eq, %arg1, %c0_i32 : i32
    %55 = arith.extui %54 : i1 to i32
    %c0_i32_32 = arith.constant 0 : i32
    %56 = arith.cmpi ne, %55, %c0_i32_32 : i32
    scf.if %56 {
      %cst_65 = arith.constant 0.000000e+00 : f32
      %113 = vector.broadcast %cst_65 : f32 to vector<1x16x128xf32>
      %c0_66 = arith.constant 0 : index
      %c0_67 = arith.constant 0 : index
      %c0_68 = arith.constant 0 : index
      %114 = vector.load %arg10[%c0_66, %c0_67, %c0_68] : memref<10x16x128xf32, #tpu.memory_space<vmem>>, vector<1x16x128xf32>
      tpu.vector_store %arg10[%c0_66, %c0_67, %c0_68], %113 {strides = array<i32>} : memref<10x16x128xf32, #tpu.memory_space<vmem>>, vector<1x16x128xf32>,
    } else {
    }
    %c1_i32 = arith.constant 1 : i32
    %57 = arith.cmpi eq, %arg1, %c1_i32 : i32
    %58 = arith.extui %57 : i1 to i32
    %c0_i32_33 = arith.constant 0 : i32
    %59 = arith.cmpi ne, %58, %c0_i32_33 : i32
    scf.if %59 {
      %cst_65 = arith.constant 0.000000e+00 : f32
      %113 = vector.broadcast %cst_65 : f32 to vector<1x16x128xf32>
      %c9 = arith.constant 9 : index
      %c0_66 = arith.constant 0 : index
      %c0_67 = arith.constant 0 : index
      %114 = vector.load %arg10[%c9, %c0_66, %c0_67] : memref<10x16x128xf32, #tpu.memory_space<vmem>>, vector<1x16x128xf32>
      tpu.vector_store %arg10[%c9, %c0_66, %c0_67], %113 {strides = array<i32>} : memref<10x16x128xf32, #tpu.memory_space<vmem>>, vector<1x16x128xf32>,
    } else {
    }
    %c0_34 = arith.constant 0 : index
    %c0_35 = arith.constant 0 : index
    %c0_36 = arith.constant 0 : index
    %60 = vector.load %arg10[%c0_34, %c0_35, %c0_36] : memref<10x16x128xf32, #tpu.memory_space<vmem>>, vector<8x16x128xf32>
    %61 = vector.extract_strided_slice %60 {offsets = [0, 15, 0], sizes = [8, 1, 128], strides = [1, 1, 1]} : vector<8x16x128xf32> to vector<8x1x128xf32>
    %62 = vector.extract_strided_slice %60 {offsets = [0, 0, 0], sizes = [8, 15, 128], strides = [1, 1, 1]} : vector<8x16x128xf32> to vector<8x15x128xf32>
    %63 = tpu.concatenate %61, %62 in 1 : vector<8x1x128xf32>, vector<8x15x128xf32> -> vector<8x16x128xf32>
    %64 = vector.extract_strided_slice %60 {offsets = [0, 1, 0], sizes = [8, 15, 128], strides = [1, 1, 1]} : vector<8x16x128xf32> to vector<8x15x128xf32>
    %65 = vector.extract_strided_slice %60 {offsets = [0, 0, 0], sizes = [8, 1, 128], strides = [1, 1, 1]} : vector<8x16x128xf32> to vector<8x1x128xf32>
    %66 = tpu.concatenate %64, %65 in 1 : vector<8x15x128xf32>, vector<8x1x128xf32> -> vector<8x16x128xf32>
    %67 = tpu.concatenate %63, %60, %66 in 2 : vector<8x16x128xf32>, vector<8x16x128xf32>, vector<8x16x128xf32> -> vector<8x16x384xf32>
    %68 = vector.shape_cast %67 : vector<8x16x384xf32> to vector<128x384xf32>
    %c0_37 = arith.constant 0 : index
    %c0_38 = arith.constant 0 : index
    %c0_39 = arith.constant 0 : index
    %69 = vector.load %arg6[%c0_37, %c0_38, %c0_39] : memref<3x384x128xf32, #tpu.memory_space<vmem>>, vector<1x384x128xf32>
    %70 = vector.shape_cast %69 : vector<1x384x128xf32> to vector<384x128xf32>
    %cst_40 = arith.constant dense<0.000000e+00> : vector<128x128xf32>
    %71 = tpu.matmul %68, %70, %cst_40 {dimension_numbers = #tpu.dot_dimension_numbers<[1], [0], [0], [1], [0, 0, 1, 1], [], []>} : vector<128x384xf32>, vector<384x128xf32>, vector<128x128xf32> -> vector<128x128xf32>
    %c1_41 = arith.constant 1 : index
    %c0_42 = arith.constant 0 : index
    %c0_43 = arith.constant 0 : index
    %72 = vector.load %arg10[%c1_41, %c0_42, %c0_43] : memref<10x16x128xf32, #tpu.memory_space<vmem>>, vector<8x16x128xf32>
    %73 = vector.extract_strided_slice %72 {offsets = [0, 15, 0], sizes = [8, 1, 128], strides = [1, 1, 1]} : vector<8x16x128xf32> to vector<8x1x128xf32>
    %74 = vector.extract_strided_slice %72 {offsets = [0, 0, 0], sizes = [8, 15, 128], strides = [1, 1, 1]} : vector<8x16x128xf32> to vector<8x15x128xf32>
    %75 = tpu.concatenate %73, %74 in 1 : vector<8x1x128xf32>, vector<8x15x128xf32> -> vector<8x16x128xf32>
    %76 = vector.extract_strided_slice %72 {offsets = [0, 1, 0], sizes = [8, 15, 128], strides = [1, 1, 1]} : vector<8x16x128xf32> to vector<8x15x128xf32>
    %77 = vector.extract_strided_slice %72 {offsets = [0, 0, 0], sizes = [8, 1, 128], strides = [1, 1, 1]} : vector<8x16x128xf32> to vector<8x1x128xf32>
    %78 = tpu.concatenate %76, %77 in 1 : vector<8x15x128xf32>, vector<8x1x128xf32> -> vector<8x16x128xf32>
    %79 = tpu.concatenate %75, %72, %78 in 2 : vector<8x16x128xf32>, vector<8x16x128xf32>, vector<8x16x128xf32> -> vector<8x16x384xf32>
    %80 = vector.shape_cast %79 : vector<8x16x384xf32> to vector<128x384xf32>
    %c1_44 = arith.constant 1 : index
    %c0_45 = arith.constant 0 : index
    %c0_46 = arith.constant 0 : index
    %81 = vector.load %arg6[%c1_44, %c0_45, %c0_46] : memref<3x384x128xf32, #tpu.memory_space<vmem>>, vector<1x384x128xf32>
    %82 = vector.shape_cast %81 : vector<1x384x128xf32> to vector<384x128xf32>
    %cst_47 = arith.constant dense<0.000000e+00> : vector<128x128xf32>
    %83 = tpu.matmul %80, %82, %cst_47 {dimension_numbers = #tpu.dot_dimension_numbers<[1], [0], [0], [1], [0, 0, 1, 1], [], []>} : vector<128x384xf32>, vector<384x128xf32>, vector<128x128xf32> -> vector<128x128xf32>
    %84 = arith.addf %71, %83 : vector<128x128xf32>
    %c2_48 = arith.constant 2 : index
    %c0_49 = arith.constant 0 : index
    %c0_50 = arith.constant 0 : index
    %85 = vector.load %arg10[%c2_48, %c0_49, %c0_50] : memref<10x16x128xf32, #tpu.memory_space<vmem>>, vector<8x16x128xf32>
    %86 = vector.extract_strided_slice %85 {offsets = [0, 15, 0], sizes = [8, 1, 128], strides = [1, 1, 1]} : vector<8x16x128xf32> to vector<8x1x128xf32>
    %87 = vector.extract_strided_slice %85 {offsets = [0, 0, 0], sizes = [8, 15, 128], strides = [1, 1, 1]} : vector<8x16x128xf32> to vector<8x15x128xf32>
    %88 = tpu.concatenate %86, %87 in 1 : vector<8x1x128xf32>, vector<8x15x128xf32> -> vector<8x16x128xf32>
    %89 = vector.extract_strided_slice %85 {offsets = [0, 1, 0], sizes = [8, 15, 128], strides = [1, 1, 1]} : vector<8x16x128xf32> to vector<8x15x128xf32>
    %90 = vector.extract_strided_slice %85 {offsets = [0, 0, 0], sizes = [8, 1, 128], strides = [1, 1, 1]} : vector<8x16x128xf32> to vector<8x1x128xf32>
    %91 = tpu.concatenate %89, %90 in 1 : vector<8x15x128xf32>, vector<8x1x128xf32> -> vector<8x16x128xf32>
    %92 = tpu.concatenate %88, %85, %91 in 2 : vector<8x16x128xf32>, vector<8x16x128xf32>, vector<8x16x128xf32> -> vector<8x16x384xf32>
    %93 = vector.shape_cast %92 : vector<8x16x384xf32> to vector<128x384xf32>
    %c2_51 = arith.constant 2 : index
    %c0_52 = arith.constant 0 : index
    %c0_53 = arith.constant 0 : index
    %94 = vector.load %arg6[%c2_51, %c0_52, %c0_53] : memref<3x384x128xf32, #tpu.memory_space<vmem>>, vector<1x384x128xf32>
    %95 = vector.shape_cast %94 : vector<1x384x128xf32> to vector<384x128xf32>
    %cst_54 = arith.constant dense<0.000000e+00> : vector<128x128xf32>
    %96 = tpu.matmul %93, %95, %cst_54 {dimension_numbers = #tpu.dot_dimension_numbers<[1], [0], [0], [1], [0, 0, 1, 1], [], []>} : vector<128x384xf32>, vector<384x128xf32>, vector<128x128xf32> -> vector<128x128xf32>
    %97 = arith.addf %84, %96 : vector<128x128xf32>
    %c0_55 = arith.constant 0 : index
    %c0_56 = arith.constant 0 : index
    %98 = vector.load %arg7[%c0_55, %c0_56] : memref<1x128xf32, #tpu.memory_space<vmem>>, vector<1x128xf32>
    %99 = vector.broadcast %98 : vector<1x128xf32> to vector<128x128xf32>
    %100 = arith.mulf %97, %99 : vector<128x128xf32>
    %c0_57 = arith.constant 0 : index
    %c0_58 = arith.constant 0 : index
    %101 = vector.load %arg8[%c0_57, %c0_58] : memref<1x128xf32, #tpu.memory_space<vmem>>, vector<1x128xf32>
    %102 = vector.broadcast %101 : vector<1x128xf32> to vector<128x128xf32>
    %103 = arith.addf %100, %102 : vector<128x128xf32>
    %cst_59 = arith.constant 0.000000e+00 : f32
    %104 = vector.broadcast %cst_59 : f32 to vector<128x128xf32>
    %105 = arith.cmpf oge, %103, %104 : vector<128x128xf32>
    %cst_60 = arith.constant 0.00999999977 : f32
    %106 = vector.broadcast %cst_60 : f32 to vector<128x128xf32>
    %107 = arith.mulf %106, %103 : vector<128x128xf32>
    %108 = arith.select %105, %103, %107 : vector<128x128xi1>, vector<128x128xf32>
    %109 = vector.shape_cast %108 : vector<128x128xf32> to vector<8x16x128xf32>
    %c0_61 = arith.constant 0 : index
    %c0_62 = arith.constant 0 : index
    %c0_63 = arith.constant 0 : index
    %c0_64 = arith.constant 0 : index
    %110 = vector.load %arg9[%c0_61, %c0_62, %c0_63, %c0_64] : memref<1x8x16x128xf32, #tpu.memory_space<vmem>>, vector<1x8x16x128xf32>
    %111 = vector.shape_cast %110 : vector<1x8x16x128xf32> to vector<8x16x128xf32>
    %112 = vector.shape_cast %109 : vector<8x16x128xf32> to vector<1x8x16x128xf32>
    tpu.vector_store %arg9[%c0_61, %c0_62, %c0_63, %c0_64], %112 {strides = array<i32>} : memref<1x8x16x128xf32, #tpu.memory_space<vmem>>, vector<1x8x16x128xf32>,
    return
  }
  func.func @transform_0(%arg0: i32, %arg1: i32) -> (i32, i32, i32, i32, i32) {
    %c0_i32 = arith.constant 0 : i32
    %c0_i32_0 = arith.constant 0 : i32
    %c0_i32_1 = arith.constant 0 : i32
    %c0_i32_2 = arith.constant 0 : i32
    return %arg0, %arg1, %c0_i32, %c0_i32_0, %c0_i32_1 : i32, i32, i32, i32, i32
  }
  func.func @transform_1(%arg0: i32, %arg1: i32) -> (i32, i32, i32) {
    %c0_i32 = arith.constant 0 : i32
    %c0_i32_0 = arith.constant 0 : i32
    %c0_i32_1 = arith.constant 0 : i32
    %c0_i32_2 = arith.constant 0 : i32
    return %c0_i32, %c0_i32_0, %c0_i32_1 : i32, i32, i32
  }
  func.func @transform_2(%arg0: i32, %arg1: i32) -> (i32, i32) {
    %c0_i32 = arith.constant 0 : i32
    %c0_i32_0 = arith.constant 0 : i32
    %c0_i32_1 = arith.constant 0 : i32
    return %c0_i32, %c0_i32_0 : i32, i32
  }
  func.func @transform_3(%arg0: i32, %arg1: i32) -> (i32, i32) {
    %c0_i32 = arith.constant 0 : i32
    %c0_i32_0 = arith.constant 0 : i32
    %c0_i32_1 = arith.constant 0 : i32
    return %c0_i32, %c0_i32_0 : i32, i32
  }
  func.func @transform_4(%arg0: i32, %arg1: i32) -> (i32, i32, i32) {
    %c0_i32 = arith.constant 0 : i32
    %c0_i32_0 = arith.constant 0 : i32
    %c0_i32_1 = arith.constant 0 : i32
    %c0_i32_2 = arith.constant 0 : i32
    return %c0_i32, %c0_i32_0, %c0_i32_1 : i32, i32, i32
  }
  func.func @transform_5(%arg0: i32, %arg1: i32) -> (i32, i32) {
    %c0_i32 = arith.constant 0 : i32
    %c0_i32_0 = arith.constant 0 : i32
    %c0_i32_1 = arith.constant 0 : i32
    return %c0_i32, %c0_i32_0 : i32, i32
  }
  func.func @transform_6(%arg0: i32, %arg1: i32) -> (i32, i32) {
    %c0_i32 = arith.constant 0 : i32
    %c0_i32_0 = arith.constant 0 : i32
    %c0_i32_1 = arith.constant 0 : i32
    return %c0_i32, %c0_i32_0 : i32, i32
  }
  func.func @transform_7(%arg0: i32, %arg1: i32) -> (i32, i32, i32, i32) {
    %c0_i32 = arith.constant 0 : i32
    %c0_i32_0 = arith.constant 0 : i32
    %c0_i32_1 = arith.constant 0 : i32
    return %arg0, %arg1, %c0_i32, %c0_i32_0 : i32, i32, i32, i32
  }
}

</mosaic_0001>

<bundles_post_ra>
// kernel: tpu_custom_call.1
= control target key start
LH: loop header
LB: loop body
LE: loop exit
PB: predicated region body
PF: predicated region fallthrough
CT: control target
= control target key end

     0   :  { %s6484_s0 = inlined_call_operand.vmem [shape: f32[2,2,12,16,4], index: 0, kind: input, shape index: {}]   ;;  %s6485_s1 = inlined_call_operand.vmem [shape: f32[3,12,128], index: 1, kind: input, shape index: {}]   ;;  %s6486_s2 = inlined_call_operand.vmem [shape: f32[1,128], index: 2, kind: input, shape index: {}]   ;;  %s6487_s3 = inlined_call_operand.vmem [shape: f32[1,128], index: 3, kind: input, shape index: {}]   ;;  %s6488_s4 = inlined_call_operand.hbm [shape: f32[3,384,128], index: 4, kind: input, shape index: {}]   ;;  %s6489_s5 = inlined_call_operand.vmem [shape: f32[1,128], index: 5, kind: input, shape index: {}]   ;;  %s6490_s6 = inlined_call_operand.vmem [shape: f32[1,128], index: 6, kind: input, shape index: {}]   ;;  %s6491_s7 = inlined_call_operand.hbm [shape: f32[2,16,16,128], index: 7, kind: output, shape index: {}]  }
   0x1   :  { %6494 = sst [smem:[#allocation10_spill]] %s6488_s4 }
   0x2   :  { %12 = vsyncpa [#allocation4], 0 }
   0x3   :  { %13 = vsyncpa [#allocation5], 0 }
   0x4   :  { %15 = vsyncpa [#allocation5 + $0x1], 0  ;;  %s4968_s24 = smov 0   ;;  %s4970_s25 = smov 0  }
   0x5   :  { %s4972_s26 = smov 0   ;;  %s4974_s27 = smov 0  }
   0x6   :  { %s4976_s28 = smov 0   ;;  %s4978_s29 = smov 0  }
   0x7   :  { %s4980_s30 = smov 0   ;;  %s4982_s8 = smov 0  }
   0x8 LB: > { %s3898_s9 = sadd.s32 4294967295, %s4917_s8   ;;  %s3899_s10 = sadd.s32 4294967294, %s4917_s8   ;;  %s4917_s8 = sphi %s4982_s8, %s21_s8   ;;  %s4913_s30 = sphi %s4980_s30, %s6510_s30   ;;  %s4909_s29 = sphi %s4978_s29, %s6509_s29   ;;  %s4905_s28 = sphi %s4976_s28, %s6508_s28   ;;  %s4901_s27 = sphi %s4974_s27, %s6507_s27   ;;  %s4897_s26 = sphi %s4972_s26, %s6506_s26   ;;  %s4893_s25 = sphi %s4970_s25, %s6505_s25   ;;  %s4889_s24 = sphi %s4968_s24, %s6504_s24  }
   0x9   : > { %s30_s11 = sadd.s32 1, %s4909_s29  ;;  %s33_s12 = sadd.s32 1, %s4913_s30 }
   0xa   : > { %p31_p0 = scmp.ge.s32.totalorder %s30_s11, 2  ;;  %s196_s13 = sadd.s32 1, %s4897_s26 }
   0xb   : > { %p206_p1 = scmp.ne.s32.totalorder %s4897_s26, %s4893_s25  ;;  %p207_p2 = scmp.eq.s32.totalorder %s3898_s9, 3 }
   0xc   : > { %s6512_s11 = smov (%p31_p0, %s30_s11), 0  ;;  %s6514_s12 = smov (!%p31_p0, %s33_s12), %s4913_s30 }
   0xd   : > { %s192_s14 = ssub.s32 %s4909_s29, %s6512_s11  ;;  %p5020_p3 = por %p207_p2, %p206_p1 }
   0xe   : > { %p35_p4 = scmp.ge.s32.totalorder %s6514_s12, 2  ;;  %p212_p5 = scmp.ne.s32.totalorder %s4893_s25, %s4889_s24 }
   0xf   : > { %p213_p6 = scmp.eq.s32.totalorder %s3899_s10, 3  ;;  %p3900_p7 = scmp.ge.s32.totalorder %s4917_s8, 1 }
  0x10   : > { %s6516_s12 = smov (%p35_p4, %s6514_s12), 0  ;;  %p220_p9 = scmp.lt.s32.totalorder %s4917_s8, 5 }
  0x11   : > { %6496 = sst [smem:[#allocation9_spill]] %s6516_s12  ;;  %p5029_p8 = por %p213_p6, %p212_p5 }
  0x12   : > { %s191_s17 = ssub.s32 %s4913_s30, %s6516_s12  ;;  %p5036_p10 = pnand %p3900_p7, %p220_p9 }
  0x13   : > { %s193_s18 = sor.u32 %s192_s14, %s191_s17  ;;  %p5040_p12 = scmp.eq.s32.totalorder %s3898_s9, 0 }
  0x14   : > { %p194_p11 = scmp.eq.s32.totalorder %s193_s18, 0  ;;  %p4712_p13 = pneg %p5036_p10 }
  0x15   : > { %s4919_s22 = smov [#allocation3]  }
  0x16   : > { %s5047_s21 = scalar_select %p194_p11, %s4897_s26, %s196_s13  }
  0x17   : > { %s241_s23 = sshll.u32 %s4919_s22, 4  ;;  %p5051_p0 = pnand %p5040_p12, %p4712_p13  ;;  %s242_s23 = int_to_ptr.vmem [resolvable:$true] %s241_s23 }
  0x18   : > { %s4806_s9 = scalar_lea.vmem %s242_s23, 18432  ;;  %p4814_p6 = scmp.lt.s32.totalorder %s242_s23, %s242_s23 }
  0x19   : > { %p4797_p1 = pneg %p5051_p0  ;;  %p4807_p2 = scmp.ne.s32.totalorder %s242_s23, %s4806_s9 }
  0x1a   : > { %p4815_p7 = scmp.lt.s32.totalorder %s4806_s9, %s4806_s9 }
  0x1b   : > { %p4809_p4 = pnand %p4807_p2, %p4797_p1 }
  0x1c   : > { %p4816_p9 = por %p4815_p7, %p4814_p6 }
  0x1d   : > { %p4810_p5 = pneg %p4809_p4 }
  0x1f   : > { %p4817_p11 = pnand %p4816_p9, %p4810_p5 }
  0x21   : > { %4820 = shalt.err (!%p4817_p11)
}
  0x22   : > { %s4920_s13 = smov 128   ;;  %s4921_s14 = smov 8  }
  0x23   : > { %s6501_s4 = sld [smem:[#allocation10_spill]] }
  0x25   : > { %275 = sbr.rel (%p5036_p10) target bundleno = 1039 (0x40f), region = 48 }
  0x29   : > { %4715 = dma.hbm_to_vmem [thread:$0]  (!%p5051_p0), %s6501_s4, 18432, %s242_s23, [#allocation4], %s4920_s13, %s4920_s13, %s4921_s14  }
  0x2a   : > { %4880 = dma.done.wait (%p5040_p12), [#allocation4], 18432  }
  0x2b   : > { %4882 = vsyncadd (%p5040_p12), [#allocation4], 4294948864  ;;  %p311_p13 = scmp.lt.s32.totalorder %s4905_s28, 1  ;;  %p313_p1 = scmp.lt.s32.totalorder %s4901_s27, 1  ;;  %vm1072_vm0 = vcmask 1043456   ;;  %v3927_v1 = vld [vmem:[%s6485_s1 + $0x10] sm:$0xff] }
  0x2c   : > { %s6493_s9 = sand.u32 1, %s4893_s25   ;;  %v3928_v0 = vld [vmem:[%s6485_s1 + $0x18] sm:$0xf]  ;;  %s4922_s4 = smov 4   ;;  %vm432_vm1 = vcmask 1046528   ;;  %vm381_vm2 = vcmask 1040384  }
  0x2d   : > { %s312_s22 = scalar_select %p311_p13, %s4905_s28, 1  ;;  %4430 = vmatprep.subr.msk.mxu0 %vm1072_vm0, %v3928_v0  ;;  %4700 = vmatprep.subr.msk.mxu1 %vm1072_vm0, %v3928_v0  ;;  %v5301_v60 = vld [vmem:[%s6485_s1 + $0x8] sm:$0xf]  ;;  %vm623_vm3 = vcmask 31744   ;;  %vm644_vm4 = vcmask 64512   ;;  %vm1011_vm5 = vcmask 97280  }
  0x2e   : > { %s314_s10 = scalar_select %p313_p1, %s4901_s27, 1  ;;  %4431 = vmatpush3.msk.msra.mxu0 %vm1072_vm0, %v3928_v0  ;;  %4702 = vmatpush3.msk.msra.mxu1 %vm1072_vm0, %v3928_v0 }
  0x2f   : > { %s4705_s23 = smul.u32 48, %s312_s22  ;;  %s5075_s13 = sshll.u32 %s6493_s9, 7  ;;  %4432 = vmatprep.subr.mxu0 %v3927_v1  ;;  %4701 = vmatprep.subr.mxu1 %v3927_v1 }
  0x30   : > { %s4704_s19 = smul.u32 24, %s314_s10  ;;  %4433 = vmatpush3.msra.mxu0 %v3927_v1  ;;  %4703 = vmatpush3.msra.mxu1 %v3927_v1  ;;  %p4016_p10 = scmp.ne.s32.totalorder %s4901_s27, 0 }
  0x31   : > { %4464 = vmatprep.subr.msk.mxu1 %vm1072_vm0, %v5301_v60 }
  0x32   : > { %s317_s14 = sadd.s32 %s4705_s23, %s4704_s19 }
  0x33   : > { %s3906_s12 = sshll.u32 %s317_s14, 3  ;;  %s5925_s14 = scalar_lea.vmem [#allocation6], %s5075_s13 }
  0x34   : > { %s5088_s9 = scalar_lea.vmem %s6484_s0, %s3906_s12  ;;  %s4923_s12 = smov 8  }
  0x35   : > { %v5093_v2 = vld [vmem:[%s5088_s9 + $0x28] sm:$0xff]  ;;  %v5096_v3 = vld [vmem:[%s5088_s9 + $0x10] sm:$0xff]  ;;  %v5099_v4 = vld [vmem:[%s5088_s9 + $0x18] sm:$0xff] }
  0x36   : > { %844 = vrot.lane.b32.xlu1 %v5093_v2, %s4922_s4  ;;  %838 = vrot.lane.b32.xlu0 %v5096_v3, %s4922_s4  ;;  %v778_v5 = vrot.slane %v5096_v3, 1  ;;  %v779_v6 = vrot.slane %v5099_v4, 1  ;;  %v5108_v7 = vld [vmem:[%s5088_s9 + $0x20] sm:$0xff]  ;;  %v782_v9 = vrot.slane %v5093_v2, 1  ;;  %v5133_v14 = vld [vmem:[%s5088_s9 + $0x30] sm:$0xff] }
  0x37   : > { %v781_v10 = vrot.slane %v5108_v7, 1  ;;  %v5136_v15 = vld [vmem:[%s5088_s9 + $0x38] sm:$0xff]  ;;  %v784_v16 = vrot.slane %v5133_v14, 1  ;;  %v5155_v20 = vld [vmem:[%s5088_s9 + $0x40] sm:$0xff]  ;;  %v5158_v21 = vld [vmem:[%s5088_s9 + $0x48] sm:$0xff] }
  0x38   : > { %v5111_v8 = vsel %vm432_vm1, %v778_v5, %v779_v6  ;;  %v5120_v11 = vsel %vm432_vm1, %v779_v6, %v778_v5  ;;  %v785_v17 = vrot.slane %v5136_v15, 1  ;;  %v787_v22 = vrot.slane %v5155_v20, 1  ;;  %v5177_v26 = vld [vmem:[%s5088_s9 + $0x50] sm:$0xff]  ;;  %v5180_v27 = vld [vmem:[%s5088_s9 + $0x58] sm:$0xff]  ;;  %v5199_v32 = vld [vmem:[%s5088_s9 + $0x60] sm:$0xff] }
  0x39   : > { %v5127_v12 = vsel %vm432_vm1, %v781_v10, %v782_v9  ;;  %v5130_v13 = vsel %vm432_vm1, %v782_v9, %v781_v10  ;;  %v788_v23 = vrot.slane %v5158_v21, 1  ;;  %v790_v28 = vrot.slane %v5177_v26, 1  ;;  %v5202_v33 = vld [vmem:[%s5088_s9 + $0x68] sm:$0xff]  ;;  %v5221_v38 = vld [vmem:[%s5088_s9 + $0x70] sm:$0xff]  ;;  %v5224_v39 = vld [vmem:[%s5088_s9 + $0x78] sm:$0xff] }
  0x3a   : > { %840 = vrot.lane.b32.xlu0 %v5099_v4, %s4922_s4  ;;  %908 = vrot.lane.b32.xlu1 %v5111_v8, %s4923_s12  ;;  %v5149_v18 = vsel %vm432_vm1, %v784_v16, %v785_v17  ;;  %v5152_v19 = vsel %vm432_vm1, %v785_v17, %v784_v16  ;;  %v791_v29 = vrot.slane %v5180_v27, 1  ;;  %v793_v34 = vrot.slane %v5199_v32, 1  ;;  %v5243_v44 = vld [vmem:[%s5088_s9 + $0x80] sm:$0xff]  ;;  %v5246_v45 = vld [vmem:[%s5088_s9 + $0x88] sm:$0xff] }
  0x3b   : > { %v5171_v24 = vsel %vm432_vm1, %v787_v22, %v788_v23  ;;  %v5174_v25 = vsel %vm432_vm1, %v788_v23, %v787_v22  ;;  %v794_v35 = vrot.slane %v5202_v33, 1  ;;  %v796_v40 = vrot.slane %v5221_v38, 1  ;;  %v5262_v49 = vld [vmem:[%s5088_s9 + $0xa0] sm:$0xff]  ;;  %v5265_v50 = vld [vmem:[%s5088_s9 + $0xa8] sm:$0xff]  ;;  %v5284_v55 = vld [vmem:[%s5088_s9 + $0x90] sm:$0xff] }
  0x3c   : > { %v5193_v30 = vsel %vm432_vm1, %v790_v28, %v791_v29  ;;  %v5196_v31 = vsel %vm432_vm1, %v791_v29, %v790_v28  ;;  %v797_v41 = vrot.slane %v5224_v39, 1  ;;  %v799_v46 = vrot.slane %v5243_v44, 1  ;;  %v5287_v56 = vld [vmem:[%s5088_s9 + $0x98] sm:$0xff]  ;;  %v5313_v62 = vld [vmem:[%s5088_s9] sm:$0xff]  ;;  %v5316_v63 = vld [vmem:[%s5088_s9 + $0x8] sm:$0xff] }
  0x3d   : > { %v5215_v36 = vsel %vm432_vm1, %v793_v34, %v794_v35  ;;  %v5218_v37 = vsel %vm432_vm1, %v794_v35, %v793_v34  ;;  %v800_v47 = vrot.slane %v5246_v45, 1  ;;  %v805_v51 = vrot.slane %v5262_v49, 1  ;;  %v3992_v6 = vld [vmem:[%s6485_s1 + $0x28] sm:$0xf] }
  0x3e   : > { %842 = vrot.lane.b32.xlu0 %v5108_v7, %s4922_s4  ;;  %910 = vrot.lane.b32.xlu1 %v5120_v11, %s4923_s12  ;;  %v5237_v42 = vsel %vm432_vm1, %v796_v40, %v797_v41  ;;  %v5240_v43 = vsel %vm432_vm1, %v797_v41, %v796_v40  ;;  %v806_v53 = vrot.slane %v5265_v50, 1  ;;  %v802_v57 = vrot.slane %v5284_v55, 1 }
  0x3f   : > { %v5259_v48 = vsel %vm432_vm1, %v799_v46, %v800_v47  ;;  %v5273_v52 = vsel %vm432_vm1, %v800_v47, %v799_v46  ;;  %v803_v59 = vrot.slane %v5287_v56, 1  ;;  %v433_v0 = vrot.slane %v5313_v62, 1  ;;  %4498 = vmatprep.subr.msk.mxu0 %vm1072_vm0, %v3992_v6  ;;  %v3991_v46 = vld [vmem:[%s6485_s1 + $0x20] sm:$0xff] }
  0x40   : > { %v5281_v54 = vsel %vm432_vm1, %v805_v51, %v806_v53  ;;  %v5295_v58 = vsel %vm432_vm1, %v806_v53, %v805_v51  ;;  %v434_v5 = vrot.slane %v5316_v63, 1  ;;  %v728_v16 = vrot.slane %v5096_v3, 7 }
  0x41   : > { %v5310_v61 = vsel %vm432_vm1, %v802_v57, %v803_v59  ;;  %v5324_v1 = vsel %vm432_vm1, %v803_v59, %v802_v57  ;;  %v698_v17 = vrot.slane %v5099_v4, 7  ;;  %v699_v28 = vrot.slane %v5093_v2, 7 }
  0x42   : > { %912 = vrot.lane.b32.xlu0 %v5127_v12, %s4923_s12  ;;  %914 = vrot.lane.b32.xlu1 %v5130_v13, %s4923_s12  ;;  %v483_v9 = vsel %vm432_vm1, %v434_v5, %v433_v0  ;;  %v435_v10 = vsel %vm432_vm1, %v433_v0, %v434_v5  ;;  %v730_v29 = vrot.slane %v5108_v7, 7  ;;  %v732_v59 = vrot.slane %v5133_v14, 7 }
  0x43   : > { %v5370_v22 = vsel %vm381_vm2, %v698_v17, %v728_v16  ;;  %v5381_v34 = vsel %vm381_vm2, %v728_v16, %v698_v17  ;;  %v700_v0 = vrot.slane %v5136_v15, 7 }
  0x44   : > { %v5395_v40 = vsel %vm381_vm2, %v699_v28, %v730_v29 }
  0x45   : > { %v5425_v16 = vsel %vm381_vm2, %v732_v59, %v700_v0 }
  0x46   : > { %846 = vrot.lane.b32.xlu0 %v5133_v14, %s4922_s4  ;;  %848 = vrot.lane.b32.xlu1 %v5136_v15, %s4922_s4 }
  0x4a   : > { %916 = vrot.lane.b32.xlu0 %v5149_v18, %s4923_s12  ;;  %918 = vrot.lane.b32.xlu1 %v5152_v19, %s4923_s12 }
  0x4e   : > { %850 = vrot.lane.b32.xlu0 %v5155_v20, %s4922_s4  ;;  %852 = vrot.lane.b32.xlu1 %v5158_v21, %s4922_s4 }
  0x52   : > { %920 = vrot.lane.b32.xlu0 %v5171_v24, %s4923_s12  ;;  %922 = vrot.lane.b32.xlu1 %v5174_v25, %s4923_s12 }
  0x56   : > { %854 = vrot.lane.b32.xlu0 %v5177_v26, %s4922_s4  ;;  %856 = vrot.lane.b32.xlu1 %v5180_v27, %s4922_s4 }
  0x5a   : > { %924 = vrot.lane.b32.xlu0 %v5193_v30, %s4923_s12  ;;  %926 = vrot.lane.b32.xlu1 %v5196_v31, %s4923_s12 }
  0x5e   : > { %858 = vrot.lane.b32.xlu0 %v5199_v32, %s4922_s4  ;;  %860 = vrot.lane.b32.xlu1 %v5202_v33, %s4922_s4 }
  0x62   : > { %928 = vrot.lane.b32.xlu0 %v5215_v36, %s4923_s12  ;;  %930 = vrot.lane.b32.xlu1 %v5218_v37, %s4923_s12 }
  0x66   : > { %862 = vrot.lane.b32.xlu0 %v5221_v38, %s4922_s4  ;;  %864 = vrot.lane.b32.xlu1 %v5224_v39, %s4922_s4 }
  0x6a   : > { %932 = vrot.lane.b32.xlu0 %v5237_v42, %s4923_s12  ;;  %934 = vrot.lane.b32.xlu1 %v5240_v43, %s4923_s12 }
  0x6e   : > { %866 = vrot.lane.b32.xlu0 %v5243_v44, %s4922_s4  ;;  %868 = vrot.lane.b32.xlu1 %v5246_v45, %s4922_s4 }
  0x72   : > { %936 = vrot.lane.b32.xlu0 %v5259_v48, %s4923_s12  ;;  %874 = vrot.lane.b32.xlu1 %v5262_v49, %s4922_s4 }
  0x76   : > { %938 = vrot.lane.b32.xlu0 %v5273_v52, %s4923_s12  ;;  %876 = vrot.lane.b32.xlu1 %v5265_v50, %s4922_s4 }
  0x7a   : > { %944 = vrot.lane.b32.xlu0 %v5281_v54, %s4923_s12  ;;  %870 = vrot.lane.b32.xlu1 %v5284_v55, %s4922_s4 }
  0x7e   : > { %946 = vrot.lane.b32.xlu0 %v5295_v58, %s4923_s12  ;;  %872 = vrot.lane.b32.xlu1 %v5287_v56, %s4922_s4 }
  0x82   : > { %940 = vrot.lane.b32.xlu0 %v5310_v61, %s4923_s12  ;;  %493 = vrot.lane.b32.xlu1 %v5313_v62, %s4922_s4 }
  0x86   : > { %942 = vrot.lane.b32.xlu0 %v5324_v1, %s4923_s12  ;;  %495 = vrot.lane.b32.xlu1 %v5316_v63, %s4922_s4 }
  0x8a   : > { %565 = vrot.lane.b32.xlu1 %v483_v9, %s4923_s12  ;;  %563 = vrot.lane.b32.xlu0 %v435_v10, %s4923_s12 }
  0x8e   : > { %1642 = vrot.lane.b32.xlu1 %v5093_v2, %s4922_s4  ;;  %1640 = vrot.lane.b32.xlu0 %v5108_v7, %s4922_s4 }
  0x92   : > { %497 = vrot.lane.b32.xlu1 %v5096_v3, %s4922_s4  ;;  %1710 = vrot.lane.b32.xlu0 %v5127_v12, %s4923_s12 }
  0x96   : > { %499 = vrot.lane.b32.xlu1 %v5099_v4, %s4922_s4  ;;  %1712 = vrot.lane.b32.xlu0 %v5130_v13, %s4923_s12 }
  0x9a   : > { %569 = vrot.lane.b32.xlu1 %v5120_v11, %s4923_s12  ;;  %567 = vrot.lane.b32.xlu0 %v5111_v8, %s4923_s12 }
  0x9e   : > { %1646 = vrot.lane.b32.xlu1 %v5136_v15, %s4922_s4  ;;  %1644 = vrot.lane.b32.xlu0 %v5133_v14, %s4922_s4 }
  0xa2   : > { %501 = vrot.lane.b32.xlu1 %v5108_v7, %s4922_s4  ;;  %1714 = vrot.lane.b32.xlu0 %v5149_v18, %s4923_s12  ;;  %v5392_v7 = vsel %vm381_vm2, %v730_v29, %v699_v28 }
  0xa6   : > { %503 = vrot.lane.b32.xlu1 %v5093_v2, %s4922_s4  ;;  %1716 = vrot.lane.b32.xlu0 %v5152_v19, %s4923_s12 }
  0xa8   : > { %v845_v8 = vpop.permute.xlu1 %844  ;;  %v839_v11 = vpop.permute.xlu0 %838 }
  0xa9   : > { %v968_v3 = vsel %vm623_vm3, %v5370_v22, %v839_v11  ;;  %v971_v47 = vsel %vm623_vm3, %v5392_v7, %v845_v8 }
  0xaa   : > { %573 = vrot.lane.b32.xlu1 %v5130_v13, %s4923_s12  ;;  %571 = vrot.lane.b32.xlu0 %v5127_v12, %s4923_s12 }
  0xac   : > { %v841_v4 = vpop.permute.xlu0 %840  ;;  %v909_v23 = vpop.permute.xlu1 %908 }
  0xad   : > { %v988_v35 = vsel %vm644_vm4, %v968_v3, %v909_v23  ;;  %v969_v12 = vsel %vm623_vm3, %v5381_v34, %v841_v4  ;;  %v734_v3 = vrot.slane %v5155_v20, 7  ;;  %v701_v4 = vrot.slane %v5158_v21, 7 }
  0xae   : > { %4434 = vmatprep.mubr.msk.f32.mxu0 %vm1011_vm5, %v988_v35  ;;  %1650 = vrot.lane.b32.xlu1 %v5158_v21, %s4922_s4 }
  0xaf   : > { %1648 = vrot.lane.b32.xlu0 %v5155_v20, %s4922_s4  ;;  %v5446_v29 = vsel %vm381_vm2, %v701_v4, %v734_v3  ;;  %v5449_v35 = vsel %vm381_vm2, %v734_v3, %v701_v4 }
  0xb0   : > { %v843_v13 = vpop.permute.xlu0 %842  ;;  %v911_v2 = vpop.permute.xlu1 %910 }
  0xb1   : > { %v989_v41 = vsel %vm644_vm4, %v969_v12, %v911_v2  ;;  %v970_v51 = vsel %vm623_vm3, %v5395_v40, %v843_v13 }
  0xb2   : > { %4435 = vmatmul.mubr.msk.f32.vlgmr.msra.gmra.mxu0 %vm1011_vm5, %v989_v41  ;;  %505 = vrot.lane.b32.xlu1 %v5133_v14, %s4922_s4  ;;  %v5422_v14 = vsel %vm381_vm2, %v700_v0, %v732_v59 }
  0xb3   : > { %1718 = vrot.lane.b32.xlu0 %v5171_v24, %s4923_s12  ;;  %4499 = vmatpush3.msk.msra.mxu0 %vm1072_vm0, %v3992_v6 }
  0xb4   : > { %v913_v53 = vpop.permute.xlu0 %912  ;;  %v915_v57 = vpop.permute.xlu1 %914  ;;  %4500 = vmatprep.subr.mxu0 %v3991_v46 }
  0xb5   : > { %v990_v5 = vsel %vm644_vm4, %v970_v51, %v913_v53  ;;  %v991_v9 = vsel %vm644_vm4, %v971_v47, %v915_v57  ;;  %4501 = vmatpush3.msra.mxu0 %v3991_v46  ;;  %v736_v46 = vrot.slane %v5177_v26, 7  ;;  %v702_v47 = vrot.slane %v5180_v27, 7 }
  0xb6   : > { %4437 = vmatprep.mubr.msk.f32.mxu0 %vm1011_vm5, %v990_v5  ;;  %507 = vrot.lane.b32.xlu1 %v5136_v15, %s4922_s4 }
  0xb7   : > { %1720 = vrot.lane.b32.xlu0 %v5174_v25, %s4923_s12  ;;  %4438 = vmatmul.mubr.msk.f32.gmra.mxu0 %vm1011_vm5, %v991_v9  ;;  %v5470_v59 = vsel %vm381_vm2, %v702_v47, %v736_v46  ;;  %v5473_v0 = vsel %vm381_vm2, %v736_v46, %v702_v47 }
  0xb8   : > { %v847_v6 = vpop.permute.xlu0 %846  ;;  %v849_v10 = vpop.permute.xlu1 %848 }
  0xb9   : > { %v972_v15 = vsel %vm623_vm3, %v5422_v14, %v847_v6  ;;  %v973_v17 = vsel %vm623_vm3, %v5425_v16, %v849_v10  ;;  %v738_v10 = vrot.slane %v5199_v32, 7 }
  0xba   : > { %577 = vrot.lane.b32.xlu1 %v5152_v19, %s4923_s12 }
  0xbb   : > { %575 = vrot.lane.b32.xlu0 %v5149_v18, %s4923_s12 }
  0xbc   : > { %v917_v8 = vpop.permute.xlu0 %916  ;;  %v919_v11 = vpop.permute.xlu1 %918 }
  0xbd   : > { %v992_v23 = vsel %vm644_vm4, %v972_v15, %v917_v8  ;;  %v993_v28 = vsel %vm644_vm4, %v973_v17, %v919_v11  ;;  %v703_v15 = vrot.slane %v5202_v33, 7 }
  0xbe   : > { %4440 = vmatprep.mubr.msk.f32.mxu0 %vm1011_vm5, %v992_v23  ;;  %1654 = vrot.lane.b32.xlu1 %v5180_v27, %s4922_s4 }
  0xbf   : > { %1652 = vrot.lane.b32.xlu0 %v5177_v26, %s4922_s4  ;;  %4441 = vmatmul.mubr.msk.f32.gmra.mxu0 %vm1011_vm5, %v993_v28  ;;  %v5494_v11 = vsel %vm381_vm2, %v703_v15, %v738_v10  ;;  %v5497_v3 = vsel %vm381_vm2, %v738_v10, %v703_v15 }
  0xc0   : > { %v851_v18 = vpop.permute.xlu0 %850  ;;  %v853_v19 = vpop.permute.xlu1 %852 }
  0xc1   : > { %v974_v12 = vsel %vm623_vm3, %v5446_v29, %v851_v18  ;;  %v975_v13 = vsel %vm623_vm3, %v5449_v35, %v853_v19  ;;  %v740_v19 = vrot.slane %v5221_v38, 7 }
  0xc2   : > { %509 = vrot.lane.b32.xlu1 %v5155_v20, %s4922_s4 }
  0xc3   : > { %1722 = vrot.lane.b32.xlu0 %v5193_v30, %s4923_s12 }
  0xc4   : > { %v921_v2 = vpop.permute.xlu0 %920  ;;  %v923_v41 = vpop.permute.xlu1 %922 }
  0xc5   : > { %v994_v51 = vsel %vm644_vm4, %v974_v12, %v921_v2  ;;  %v995_v53 = vsel %vm644_vm4, %v975_v13, %v923_v41  ;;  %v704_v12 = vrot.slane %v5224_v39, 7 }
  0xc6   : > { %4443 = vmatprep.mubr.msk.f32.mxu0 %vm1011_vm5, %v994_v51  ;;  %511 = vrot.lane.b32.xlu1 %v5158_v21, %s4922_s4 }
  0xc7   : > { %1724 = vrot.lane.b32.xlu0 %v5196_v31, %s4923_s12  ;;  %4444 = vmatmul.mubr.msk.f32.gmra.mxu0 %vm1011_vm5, %v995_v53  ;;  %v5518_v46 = vsel %vm381_vm2, %v704_v12, %v740_v19  ;;  %v5521_v47 = vsel %vm381_vm2, %v740_v19, %v704_v12 }
  0xc8   : > { %v855_v20 = vpop.permute.xlu0 %854  ;;  %v857_v57 = vpop.permute.xlu1 %856 }
  0xc9   : > { %v976_v21 = vsel %vm623_vm3, %v5470_v59, %v855_v20  ;;  %v977_v5 = vsel %vm623_vm3, %v5473_v0, %v857_v57  ;;  %v742_v57 = vrot.slane %v5243_v44, 7 }
  0xca   : > { %581 = vrot.lane.b32.xlu1 %v5174_v25, %s4923_s12 }
  0xcb   : > { %579 = vrot.lane.b32.xlu0 %v5171_v24, %s4923_s12 }
  0xcc   : > { %v925_v9 = vpop.permute.xlu0 %924  ;;  %v927_v6 = vpop.permute.xlu1 %926 }
  0xcd   : > { %v996_v17 = vsel %vm644_vm4, %v976_v21, %v925_v9  ;;  %v997_v8 = vsel %vm644_vm4, %v977_v5, %v927_v6  ;;  %v705_v21 = vrot.slane %v5246_v45, 7 }
  0xce   : > { %4446 = vmatprep.mubr.msk.f32.mxu0 %vm1011_vm5, %v996_v17  ;;  %1658 = vrot.lane.b32.xlu1 %v5202_v33, %s4922_s4 }
  0xcf   : > { %1656 = vrot.lane.b32.xlu0 %v5199_v32, %s4922_s4  ;;  %4447 = vmatmul.mubr.msk.f32.gmra.mxu0 %vm1011_vm5, %v997_v8  ;;  %v5542_v6 = vsel %vm381_vm2, %v705_v21, %v742_v57  ;;  %v746_v8 = vrot.slane %v5262_v49, 7 }
  0xd0   : > { %v859_v24 = vpop.permute.xlu0 %858  ;;  %v861_v25 = vpop.permute.xlu1 %860 }
  0xd1   : > { %v978_v4 = vsel %vm623_vm3, %v5494_v11, %v859_v24  ;;  %v979_v23 = vsel %vm623_vm3, %v5497_v3, %v861_v25  ;;  %v707_v24 = vrot.slane %v5265_v50, 7  ;;  %v5553_v25 = vsel %vm381_vm2, %v742_v57, %v705_v21  ;;  %v665_v57 = vld [vmem:[%s6485_s1] sm:$0xff] }
  0xd2   : > { %513 = vrot.lane.b32.xlu1 %v5177_v26, %s4922_s4 }
  0xd3   : > { %1726 = vrot.lane.b32.xlu0 %v5215_v36, %s4923_s12 }
  0xd4   : > { %v929_v28 = vpop.permute.xlu0 %928  ;;  %v931_v18 = vpop.permute.xlu1 %930 }
  0xd5   : > { %v998_v13 = vsel %vm644_vm4, %v978_v4, %v929_v28  ;;  %v999_v2 = vsel %vm644_vm4, %v979_v23, %v931_v18  ;;  %v5564_v18 = vsel %vm381_vm2, %v707_v24, %v746_v8 }
  0xd6   : > { %4449 = vmatprep.mubr.msk.f32.mxu0 %vm1011_vm5, %v998_v13  ;;  %515 = vrot.lane.b32.xlu1 %v5180_v27, %s4922_s4 }
  0xd7   : > { %1728 = vrot.lane.b32.xlu0 %v5218_v37, %s4923_s12  ;;  %4450 = vmatmul.mubr.msk.f32.gmra.mxu0 %vm1011_vm5, %v999_v2  ;;  %v744_v2 = vrot.slane %v5284_v55, 7 }
  0xd8   : > { %v863_v26 = vpop.permute.xlu0 %862  ;;  %v865_v41 = vpop.permute.xlu1 %864 }
  0xd9   : > { %v980_v27 = vsel %vm623_vm3, %v5518_v46, %v863_v26  ;;  %v981_v51 = vsel %vm623_vm3, %v5521_v47, %v865_v41  ;;  %v706_v26 = vrot.slane %v5287_v56, 7  ;;  %v5577_v41 = vsel %vm381_vm2, %v746_v8, %v707_v24 }
  0xda   : > { %585 = vrot.lane.b32.xlu1 %v5196_v31, %s4923_s12 }
  0xdb   : > { %583 = vrot.lane.b32.xlu0 %v5193_v30, %s4923_s12 }
  0xdc   : > { %v933_v53 = vpop.permute.xlu0 %932  ;;  %v935_v20 = vpop.permute.xlu1 %934 }
  0xdd   : > { %v1000_v5 = vsel %vm644_vm4, %v980_v27, %v933_v53  ;;  %v1001_v9 = vsel %vm644_vm4, %v981_v51, %v935_v20  ;;  %v5588_v53 = vsel %vm381_vm2, %v706_v26, %v744_v2 }
  0xde   : > { %4452 = vmatprep.mubr.msk.f32.mxu0 %vm1011_vm5, %v1000_v5  ;;  %1662 = vrot.lane.b32.xlu1 %v5224_v39, %s4922_s4 }
  0xdf   : > { %1660 = vrot.lane.b32.xlu0 %v5221_v38, %s4922_s4  ;;  %4453 = vmatmul.mubr.msk.f32.gmra.mxu0 %vm1011_vm5, %v1001_v9 }
  0xe0   : > { %v867_v30 = vpop.permute.xlu0 %866  ;;  %v869_v31 = vpop.permute.xlu1 %868 }
  0xe1   : > { %v982_v10 = vsel %vm623_vm3, %v5542_v6, %v867_v30  ;;  %v382_v30 = vrot.slane %v5313_v62, 7 }
  0xe2   : > { %517 = vrot.lane.b32.xlu1 %v5199_v32, %s4922_s4  ;;  %v983_v32 = vsel %vm623_vm3, %v5553_v25, %v869_v31  ;;  %v351_v31 = vrot.slane %v5316_v63, 7 }
  0xe3   : > { %1730 = vrot.lane.b32.xlu0 %v5237_v42, %s4923_s12 }
  0xe4   : > { %v937_v15 = vpop.permute.xlu0 %936  ;;  %v875_v17 = vpop.permute.xlu1 %874  ;;  %v422_v63 = vsel %vm381_vm2, %v351_v31, %v382_v30  ;;  %v383_v8 = vsel %vm381_vm2, %v382_v30, %v351_v31 }
  0xe5   : > { %v1002_v4 = vsel %vm644_vm4, %v982_v10, %v937_v15  ;;  %v5606_v10 = vsel %vm381_vm2, %v744_v2, %v706_v26 }
  0xe6   : > { %4455 = vmatprep.mubr.msk.f32.mxu0 %vm1011_vm5, %v1002_v4  ;;  %519 = vrot.lane.b32.xlu1 %v5202_v33, %s4922_s4  ;;  %v986_v33 = vsel %vm623_vm3, %v5564_v18, %v875_v17 }
  0xe7   : > { %1732 = vrot.lane.b32.xlu0 %v5240_v43, %s4923_s12 }
  0xe8   : > { %v939_v23 = vpop.permute.xlu0 %938  ;;  %v877_v28 = vpop.permute.xlu1 %876 }
  0xe9   : > { %v1003_v19 = vsel %vm644_vm4, %v983_v32, %v939_v23 }
  0xea   : > { %4456 = vmatmul.mubr.msk.f32.gmra.mxu0 %vm1011_vm5, %v1003_v19  ;;  %589 = vrot.lane.b32.xlu1 %v5218_v37, %s4923_s12 }
  0xeb   : > { %587 = vrot.lane.b32.xlu0 %v5215_v36, %s4923_s12  ;;  %v987_v36 = vsel %vm623_vm3, %v5577_v41, %v877_v28 }
  0xec   : > { %v945_v12 = vpop.permute.xlu0 %944  ;;  %v871_v13 = vpop.permute.xlu1 %870 }
  0xed   : > { %v1006_v27 = vsel %vm644_vm4, %v986_v33, %v945_v12  ;;  %v984_v21 = vsel %vm623_vm3, %v5588_v53, %v871_v13 }
  0xee   : > { %4461 = vmatprep.mubr.msk.f32.mxu1 %vm1011_vm5, %v1006_v27  ;;  %1666 = vrot.lane.b32.xlu1 %v5246_v45, %s4922_s4 }
  0xef   : > { %1664 = vrot.lane.b32.xlu0 %v5243_v44, %s4922_s4 }
  0xf0   : > { %v947_v37 = vpop.permute.xlu0 %946  ;;  %v873_v51 = vpop.permute.xlu1 %872 }
  0xf1   : > { %v1007_v20 = vsel %vm644_vm4, %v987_v36, %v947_v37 }
  0xf2   : > { %4462 = vmatmul.mubr.msk.f32.vlgmr.msra.gmra.mxu1 %vm1011_vm5, %v1007_v20  ;;  %521 = vrot.lane.b32.xlu1 %v5221_v38, %s4922_s4 }
  0xf3   : > { %1734 = vrot.lane.b32.xlu0 %v5259_v48, %s4923_s12  ;;  %4465 = vmatpush3.msk.msra.mxu1 %vm1072_vm0, %v5301_v60  ;;  %v985_v60 = vsel %vm623_vm3, %v5606_v10, %v873_v51 }
  0xf4   : > { %v941_v5 = vpop.permute.xlu0 %940  ;;  %v494_v9 = vpop.permute.xlu1 %493  ;;  %4466 = vmatprep.subr.mxu1 %v665_v57 }
  0xf5   : > { %v1004_v38 = vsel %vm644_vm4, %v984_v21, %v941_v5  ;;  %4467 = vmatpush3.msra.mxu1 %v665_v57  ;;  %v5681_v5 = vld [vmem:[%s5088_s9 + $0xb8] sm:$0xff] }
  0xf6   : > { %4458 = vmatprep.mubr.msk.f32.mxu0 %vm1011_vm5, %v1004_v38  ;;  %523 = vrot.lane.b32.xlu1 %v5224_v39, %s4922_s4  ;;  %v624_v39 = vsel %vm623_vm3, %v422_v63, %v494_v9  ;;  %v5684_v9 = vld [vmem:[%s5088_s9 + $0xb0] sm:$0xff] }
  0xf7   : > { %1736 = vrot.lane.b32.xlu0 %v5273_v52, %s4923_s12 }
  0xf8   : > { %v943_v62 = vpop.permute.xlu0 %942  ;;  %v496_v15 = vpop.permute.xlu1 %495 }
  0xf9   : > { %v1005_v17 = vsel %vm644_vm4, %v985_v60, %v943_v62  ;;  %v625_v24 = vsel %vm623_vm3, %v383_v8, %v496_v15 }
  0xfa   : > { %4459 = vmatmul.mubr.msk.f32.gmra.mxu0 %vm1011_vm5, %v1005_v17  ;;  %593 = vrot.lane.b32.xlu1 %v5240_v43, %s4923_s12 }
  0xfb   : > { %591 = vrot.lane.b32.xlu0 %v5237_v42, %s4923_s12 }
  0xfc   : > { %v566_v4 = vpop.permute.xlu1 %565  ;;  %v564_v32 = vpop.permute.xlu0 %563 }
  0xfd   : > { %v646_v23 = vsel %vm644_vm4, %v625_v24, %v566_v4  ;;  %v645_v28 = vsel %vm644_vm4, %v624_v39, %v564_v32 }
  0xfe   : > { %1670 = vrot.lane.b32.xlu1 %v5287_v56, %s4922_s4  ;;  %4468 = vmatprep.mubr.msk.f32.mxu1 %vm1011_vm5, %v645_v28 }
  0xff   : > { %1668 = vrot.lane.b32.xlu0 %v5284_v55, %s4922_s4  ;;  %4469 = vmatmul.mubr.msk.f32.vlgmr.msra.gmra.mxu1 %vm1011_vm5, %v646_v23 }
 0x100   : > { %v1643_v42 = vpop.permute.xlu1 %1642  ;;  %v1641_v43 = vpop.permute.xlu0 %1640 }
 0x101   : > { %v1770_v19 = vsel %vm623_vm3, %v5395_v40, %v1641_v43 }
 0x102   : > { %525 = vrot.lane.b32.xlu1 %v5243_v44, %s4922_s4  ;;  %v1771_v44 = vsel %vm623_vm3, %v5392_v7, %v1643_v42 }
 0x103   : > { %1738 = vrot.lane.b32.xlu0 %v5310_v61, %s4923_s12 }
 0x104   : > { %v498_v33 = vpop.permute.xlu1 %497  ;;  %v1711_v12 = vpop.permute.xlu0 %1710 }
 0x105   : > { %v1790_v13 = vsel %vm644_vm4, %v1770_v19, %v1711_v12 }
 0x106   : > { %527 = vrot.lane.b32.xlu1 %v5246_v45, %s4922_s4  ;;  %4502 = vmatprep.mubr.msk.f32.mxu0 %vm1011_vm5, %v1790_v13  ;;  %v626_v45 = vsel %vm623_vm3, %v5370_v22, %v498_v33 }
 0x107   : > { %1740 = vrot.lane.b32.xlu0 %v5324_v1, %s4923_s12 }
 0x108   : > { %v500_v2 = vpop.permute.xlu1 %499  ;;  %v1713_v26 = vpop.permute.xlu0 %1712 }
 0x109   : > { %v1791_v27 = vsel %vm644_vm4, %v1771_v44, %v1713_v26  ;;  %v627_v36 = vsel %vm623_vm3, %v5381_v34, %v500_v2 }
 0x10a   : > { %597 = vrot.lane.b32.xlu1 %v5273_v52, %s4923_s12  ;;  %4503 = vmatmul.mubr.msk.f32.vlgmr.msra.gmra.mxu0 %vm1011_vm5, %v1791_v27 }
 0x10b   : > { %595 = vrot.lane.b32.xlu0 %v5259_v48, %s4923_s12 }
 0x10c   : > { %v570_v37 = vpop.permute.xlu1 %569  ;;  %v568_v51 = vpop.permute.xlu0 %567 }
 0x10d   : > { %v648_v20 = vsel %vm644_vm4, %v627_v36, %v570_v37  ;;  %v647_v57 = vsel %vm644_vm4, %v626_v45, %v568_v51 }
 0x10e   : > { %1674 = vrot.lane.b32.xlu1 %v5265_v50, %s4922_s4  ;;  %4471 = vmatprep.mubr.msk.f32.mxu1 %vm1011_vm5, %v647_v57 }
 0x10f   : > { %1672 = vrot.lane.b32.xlu0 %v5262_v49, %s4922_s4  ;;  %4472 = vmatmul.mubr.msk.f32.gmra.mxu1 %vm1011_vm5, %v648_v20 }
 0x110   : > { %v1647_v48 = vpop.permute.xlu1 %1646  ;;  %v1645_v52 = vpop.permute.xlu0 %1644 }
 0x111   : > { %v1772_v50 = vsel %vm623_vm3, %v5422_v14, %v1645_v52  ;;  %v1773_v49 = vsel %vm623_vm3, %v5425_v16, %v1647_v48 }
 0x112   : > { %529 = vrot.lane.b32.xlu1 %v5284_v55, %s4922_s4 }
 0x113   : > { %1742 = vrot.lane.b32.xlu0 %v5281_v54, %s4923_s12 }
 0x114   : > { %v502_v22 = vpop.permute.xlu1 %501  ;;  %v1715_v34 = vpop.permute.xlu0 %1714 }
 0x115   : > { %v1792_v21 = vsel %vm644_vm4, %v1772_v50, %v1715_v34  ;;  %v628_v31 = vsel %vm623_vm3, %v5395_v40, %v502_v22 }
 0x116   : > { %531 = vrot.lane.b32.xlu1 %v5287_v56, %s4922_s4  ;;  %4505 = vmatprep.mubr.msk.f32.mxu0 %vm1011_vm5, %v1792_v21  ;;  %v1608_v56 = vrot.slane %v5681_v5, 1 }
 0x117   : > { %1744 = vrot.lane.b32.xlu0 %v5295_v58, %s4923_s12  ;;  %v1607_v58 = vrot.slane %v5684_v9, 1 }
 0x118   : > { %v504_v55 = vpop.permute.xlu1 %503  ;;  %v1717_v54 = vpop.permute.xlu0 %1716 }
 0x119   : > { %v1793_v30 = vsel %vm644_vm4, %v1773_v49, %v1717_v54  ;;  %v629_v38 = vsel %vm623_vm3, %v5392_v7, %v504_v55  ;;  %v1609_v7 = vsel %vm432_vm1, %v1607_v58, %v1608_v56 }
 0x11a   : > { %601 = vrot.lane.b32.xlu1 %v5324_v1, %s4923_s12  ;;  %4506 = vmatmul.mubr.msk.f32.gmra.mxu0 %vm1011_vm5, %v1793_v30 }
 0x11b   : > { %599 = vrot.lane.b32.xlu0 %v5310_v61, %s4923_s12  ;;  %v1639_v61 = vsel %vm432_vm1, %v1608_v56, %v1607_v58 }
 0x11c   : > { %v574_v60 = vpop.permute.xlu1 %573  ;;  %v572_v62 = vpop.permute.xlu0 %571 }
 0x11d   : > { %v650_v15 = vsel %vm644_vm4, %v629_v38, %v574_v60  ;;  %v649_v1 = vsel %vm644_vm4, %v628_v31, %v572_v62 }
 0x11e   : > { %1678 = vrot.lane.b32.xlu1 %v5681_v5, %s4922_s4  ;;  %4474 = vmatprep.mubr.msk.f32.mxu1 %vm1011_vm5, %v649_v1 }
 0x11f   : > { %1676 = vrot.lane.b32.xlu0 %v5684_v9, %s4922_s4  ;;  %4475 = vmatmul.mubr.msk.f32.gmra.mxu1 %vm1011_vm5, %v650_v15 }
 0x120   : > { %v1651_v40 = vpop.permute.xlu1 %1650 }
 0x121   : > { %v1649_v63 = vpop.permute.xlu0 %1648  ;;  %v1775_v32 = vsel %vm623_vm3, %v5449_v35, %v1651_v40 }
 0x122   : > { %1748 = vrot.lane.b32.xlu1 %v1639_v61, %s4923_s12  ;;  %v1774_v8 = vsel %vm623_vm3, %v5446_v29, %v1649_v63 }
 0x123   : > { %1746 = vrot.lane.b32.xlu0 %v1609_v7, %s4923_s12 }
 0x124   : > { %v506_v17 = vpop.permute.xlu1 %505 }
 0x125   : > { %v1719_v39 = vpop.permute.xlu0 %1718  ;;  %v630_v19 = vsel %vm623_vm3, %v5422_v14, %v506_v17 }
 0x126   : > { %v1794_v24 = vsel %vm644_vm4, %v1774_v8, %v1719_v39 }
 0x127   : > { %4508 = vmatprep.mubr.msk.f32.mxu0 %vm1011_vm5, %v1794_v24 }
 0x128   : > { %v508_v4 = vpop.permute.xlu1 %507 }
 0x129   : > { %v1721_v23 = vpop.permute.xlu0 %1720  ;;  %v631_v42 = vsel %vm623_vm3, %v5425_v16, %v508_v4 }
 0x12a   : > { %v1795_v28 = vsel %vm644_vm4, %v1775_v32, %v1721_v23 }
 0x12b   : > { %4509 = vmatmul.mubr.msk.f32.gmra.mxu0 %vm1011_vm5, %v1795_v28 }
 0x12c   : > { %v578_v43 = vpop.permute.xlu1 %577 }
 0x12d   : > { %v652_v33 = vsel %vm644_vm4, %v631_v42, %v578_v43  ;;  %v576_v12 = vpop.permute.xlu0 %575 }
 0x12e   : > { %v651_v13 = vsel %vm644_vm4, %v630_v19, %v576_v12 }
 0x12f   : > { %4477 = vmatprep.mubr.msk.f32.mxu1 %vm1011_vm5, %v651_v13 }
 0x130   : > { %4478 = vmatmul.mubr.msk.f32.gmra.mxu1 %vm1011_vm5, %v652_v33  ;;  %v1655_v44 = vpop.permute.xlu1 %1654 }
 0x131   : > { %v1653_v2 = vpop.permute.xlu0 %1652  ;;  %v1777_v36 = vsel %vm623_vm3, %v5473_v0, %v1655_v44 }
 0x132   : > { %v1776_v27 = vsel %vm623_vm3, %v5470_v59, %v1653_v2 }
 0x134   : > { %v510_v26 = vpop.permute.xlu1 %509 }
 0x135   : > { %v1723_v16 = vpop.permute.xlu0 %1722  ;;  %v632_v48 = vsel %vm623_vm3, %v5446_v29, %v510_v26 }
 0x136   : > { %v1796_v45 = vsel %vm644_vm4, %v1776_v27, %v1723_v16 }
 0x137   : > { %4511 = vmatprep.mubr.msk.f32.mxu0 %vm1011_vm5, %v1796_v45 }
 0x138   : > { %v512_v14 = vpop.permute.xlu1 %511 }
 0x139   : > { %v1725_v37 = vpop.permute.xlu0 %1724  ;;  %v633_v20 = vsel %vm623_vm3, %v5449_v35, %v512_v14 }
 0x13a   : > { %v1797_v51 = vsel %vm644_vm4, %v1777_v36, %v1725_v37 }
 0x13b   : > { %4512 = vmatmul.mubr.msk.f32.gmra.mxu0 %vm1011_vm5, %v1797_v51 }
 0x13c   : > { %v582_v57 = vpop.permute.xlu1 %581 }
 0x13d   : > { %v654_v52 = vsel %vm644_vm4, %v633_v20, %v582_v57  ;;  %v580_v50 = vpop.permute.xlu0 %579 }
 0x13e   : > { %v653_v22 = vsel %vm644_vm4, %v632_v48, %v580_v50 }
 0x13f   : > { %4480 = vmatprep.mubr.msk.f32.mxu1 %vm1011_vm5, %v653_v22 }
 0x140   : > { %4481 = vmatmul.mubr.msk.f32.gmra.mxu1 %vm1011_vm5, %v654_v52  ;;  %v1659_v34 = vpop.permute.xlu1 %1658 }
 0x141   : > { %v1657_v21 = vpop.permute.xlu0 %1656  ;;  %v1779_v30 = vsel %vm623_vm3, %v5497_v3, %v1659_v34 }
 0x142   : > { %v1778_v55 = vsel %vm623_vm3, %v5494_v11, %v1657_v21 }
 0x144   : > { %v514_v49 = vpop.permute.xlu1 %513 }
 0x145   : > { %v1727_v35 = vpop.permute.xlu0 %1726  ;;  %v634_v60 = vsel %vm623_vm3, %v5470_v59, %v514_v49 }
 0x146   : > { %v1798_v54 = vsel %vm644_vm4, %v1778_v55, %v1727_v35 }
 0x147   : > { %4514 = vmatprep.mubr.msk.f32.mxu0 %vm1011_vm5, %v1798_v54 }
 0x148   : > { %v516_v29 = vpop.permute.xlu1 %515 }
 0x149   : > { %v1729_v56 = vpop.permute.xlu0 %1728  ;;  %v635_v31 = vsel %vm623_vm3, %v5473_v0, %v516_v29 }
 0x14a   : > { %v1799_v58 = vsel %vm644_vm4, %v1779_v30, %v1729_v56 }
 0x14b   : > { %4515 = vmatmul.mubr.msk.f32.gmra.mxu0 %vm1011_vm5, %v1799_v58 }
 0x14c   : > { %v586_v38 = vpop.permute.xlu1 %585 }
 0x14d   : > { %v656_v62 = vsel %vm644_vm4, %v635_v31, %v586_v38  ;;  %v584_v15 = vpop.permute.xlu0 %583 }
 0x14e   : > { %v655_v1 = vsel %vm644_vm4, %v634_v60, %v584_v15 }
 0x14f   : > { %4483 = vmatprep.mubr.msk.f32.mxu1 %vm1011_vm5, %v655_v1 }
 0x150   : > { %4484 = vmatmul.mubr.msk.f32.gmra.mxu1 %vm1011_vm5, %v656_v62  ;;  %v1663_v61 = vpop.permute.xlu1 %1662 }
 0x151   : > { %v1661_v40 = vpop.permute.xlu0 %1660  ;;  %v1781_v8 = vsel %vm623_vm3, %v5521_v47, %v1663_v61 }
 0x152   : > { %v1780_v63 = vsel %vm623_vm3, %v5518_v46, %v1661_v40 }
 0x154   : > { %v518_v7 = vpop.permute.xlu1 %517 }
 0x155   : > { %v1731_v0 = vpop.permute.xlu0 %1730  ;;  %v636_v23 = vsel %vm623_vm3, %v5494_v11, %v518_v7  ;;  %v1548_v7 = vrot.slane %v5684_v9, 7 }
 0x156   : > { %v1800_v17 = vsel %vm644_vm4, %v1780_v63, %v1731_v0 }
 0x157   : > { %4517 = vmatprep.mubr.msk.f32.mxu0 %vm1011_vm5, %v1800_v17 }
 0x158   : > { %v520_v59 = vpop.permute.xlu1 %519 }
 0x159   : > { %v1733_v39 = vpop.permute.xlu0 %1732  ;;  %v637_v4 = vsel %vm623_vm3, %v5497_v3, %v520_v59 }
 0x15a   : > { %v1801_v24 = vsel %vm644_vm4, %v1781_v8, %v1733_v39 }
 0x15b   : > { %4518 = vmatmul.mubr.msk.f32.gmra.mxu0 %vm1011_vm5, %v1801_v24 }
 0x15c   : > { %v590_v32 = vpop.permute.xlu1 %589 }
 0x15d   : > { %v658_v28 = vsel %vm644_vm4, %v637_v4, %v590_v32  ;;  %v588_v42 = vpop.permute.xlu0 %587 }
 0x15e   : > { %v657_v43 = vsel %vm644_vm4, %v636_v23, %v588_v42 }
 0x15f   : > { %4486 = vmatprep.mubr.msk.f32.mxu1 %vm1011_vm5, %v657_v43 }
 0x160   : > { %4487 = vmatmul.mubr.msk.f32.gmra.mxu1 %vm1011_vm5, %v658_v28  ;;  %v1667_v19 = vpop.permute.xlu1 %1666 }
 0x161   : > { %v1665_v33 = vpop.permute.xlu0 %1664  ;;  %v1783_v2 = vsel %vm623_vm3, %v5553_v25, %v1667_v19 }
 0x162   : > { %v1782_v13 = vsel %vm623_vm3, %v5542_v6, %v1665_v33 }
 0x164   : > { %v522_v12 = vpop.permute.xlu1 %521 }
 0x165   : > { %v1735_v3 = vpop.permute.xlu0 %1734  ;;  %v638_v14 = vsel %vm623_vm3, %v5518_v46, %v522_v12 }
 0x166   : > { %v1802_v44 = vsel %vm644_vm4, %v1782_v13, %v1735_v3 }
 0x167   : > { %4520 = vmatprep.mubr.msk.f32.mxu0 %vm1011_vm5, %v1802_v44 }
 0x168   : > { %v524_v11 = vpop.permute.xlu1 %523 }
 0x169   : > { %v1737_v26 = vpop.permute.xlu0 %1736  ;;  %v639_v16 = vsel %vm623_vm3, %v5521_v47, %v524_v11 }
 0x16a   : > { %v1803_v27 = vsel %vm644_vm4, %v1783_v2, %v1737_v26 }
 0x16b   : > { %4521 = vmatmul.mubr.msk.f32.gmra.mxu0 %vm1011_vm5, %v1803_v27 }
 0x16c   : > { %v594_v45 = vpop.permute.xlu1 %593 }
 0x16d   : > { %v660_v36 = vsel %vm644_vm4, %v639_v16, %v594_v45  ;;  %v592_v37 = vpop.permute.xlu0 %591 }
 0x16e   : > { %v659_v51 = vsel %vm644_vm4, %v638_v14, %v592_v37 }
 0x16f   : > { %4489 = vmatprep.mubr.msk.f32.mxu1 %vm1011_vm5, %v659_v51 }
 0x170   : > { %4490 = vmatmul.mubr.msk.f32.gmra.mxu1 %vm1011_vm5, %v660_v36  ;;  %v1671_v20 = vpop.permute.xlu1 %1670 }
 0x171   : > { %v1669_v57 = vpop.permute.xlu0 %1668  ;;  %v1785_v22 = vsel %vm623_vm3, %v5606_v10, %v1671_v20 }
 0x172   : > { %v1784_v52 = vsel %vm623_vm3, %v5588_v53, %v1669_v57  ;;  %v4436_v39 = vpop.f32.mrf.mxu0 }
 0x174   : > { %v526_v48 = vpop.permute.xlu1 %525  ;;  %v1142_v23 = vpop.f32.mrf.mxu0 }
 0x175   : > { %v1739_v47 = vpop.permute.xlu0 %1738  ;;  %v640_v35 = vsel %vm623_vm3, %v5542_v6, %v526_v48 }
 0x176   : > { %v1804_v50 = vsel %vm644_vm4, %v1784_v52, %v1739_v47  ;;  %v5863_v47 = vld [vmem:[%s6486_s2] ss:$0 sm:$0xff] }
 0x177   : > { %4523 = vmatprep.mubr.msk.f32.mxu0 %vm1011_vm5, %v1804_v50  ;;  %v4439_v42 = vpop.f32.mrf.mxu0 }
 0x178   : > { %v528_v46 = vpop.permute.xlu1 %527 }
 0x179   : > { %v1741_v34 = vpop.permute.xlu0 %1740  ;;  %v641_v49 = vsel %vm623_vm3, %v5553_v25, %v528_v46  ;;  %v1152_v43 = vpop.f32.mrf.mxu0 }
 0x17a   : > { %v1805_v21 = vsel %vm644_vm4, %v1785_v22, %v1741_v34  ;;  %v5868_v22 = vld [vmem:[%s6487_s3] ss:$0 sm:$0xff] }
 0x17b   : > { %4524 = vmatmul.mubr.msk.f32.gmra.mxu0 %vm1011_vm5, %v1805_v21 }
 0x17c   : > { %v598_v55 = vpop.permute.xlu1 %597 }
 0x17d   : > { %v662_v54 = vsel %vm644_vm4, %v641_v49, %v598_v55  ;;  %v596_v29 = vpop.permute.xlu0 %595 }
 0x17e   : > { %v661_v30 = vsel %vm644_vm4, %v640_v35, %v596_v29 }
 0x17f   : > { %4492 = vmatprep.mubr.msk.f32.mxu1 %vm1011_vm5, %v661_v30  ;;  %v4442_v19 = vpop.f32.mrf.mxu0 }
 0x180   : > { %4493 = vmatmul.mubr.msk.f32.gmra.mxu1 %vm1011_vm5, %v662_v54  ;;  %v1675_v56 = vpop.permute.xlu1 %1674 }
 0x181   : > { %v1673_v58 = vpop.permute.xlu0 %1672  ;;  %v1787_v62 = vsel %vm623_vm3, %v5577_v41, %v1675_v56  ;;  %v1162_v33 = vpop.f32.mrf.mxu0 }
 0x182   : > { %v1786_v38 = vsel %vm623_vm3, %v5564_v18, %v1673_v58  ;;  %v1509_v18 = vrot.slane %v5681_v5, 7 }
 0x184   : > { %v530_v31 = vpop.permute.xlu1 %529  ;;  %v1579_v5 = vsel %vm381_vm2, %v1509_v18, %v1548_v7 }
 0x185   : > { %v1743_v25 = vpop.permute.xlu0 %1742  ;;  %v642_v63 = vsel %vm623_vm3, %v5588_v53, %v530_v31 }
 0x186   : > { %v1806_v60 = vsel %vm644_vm4, %v1786_v38, %v1743_v25 }
 0x187   : > { %4526 = vmatprep.mubr.msk.f32.mxu0 %vm1011_vm5, %v1806_v60  ;;  %v5832_v12 = vpop.f32.mrf.mxu0 }
 0x188   : > { %v532_v6 = vpop.permute.xlu1 %531 }
 0x189   : > { %v1745_v15 = vpop.permute.xlu0 %1744  ;;  %v643_v61 = vsel %vm623_vm3, %v5606_v10, %v532_v6  ;;  %v1549_v10 = vsel %vm381_vm2, %v1548_v7, %v1509_v18  ;;  %v5834_v13 = vpop.f32.mrf.mxu0 }
 0x18a   : > { %v1807_v1 = vsel %vm644_vm4, %v1787_v62, %v1745_v15 }
 0x18b   : > { %4527 = vmatmul.mubr.msk.f32.gmra.mxu0 %vm1011_vm5, %v1807_v1 }
 0x18c   : > { %v602_v40 = vpop.permute.xlu1 %601 }
 0x18d   : > { %v664_v0 = vsel %vm644_vm4, %v643_v61, %v602_v40  ;;  %v600_v17 = vpop.permute.xlu0 %599 }
 0x18e   : > { %v663_v41 = vsel %vm644_vm4, %v642_v63, %v600_v17 }
 0x18f   : > { %4495 = vmatprep.mubr.msk.f32.mxu1 %vm1011_vm5, %v663_v41  ;;  %v5836_v3 = vpop.f32.mrf.mxu0 }
 0x190   : > { %4496 = vmatmul.mubr.msk.f32.gmra.mxu1 %vm1011_vm5, %v664_v0  ;;  %v1679_v59 = vpop.permute.xlu1 %1678 }
 0x191   : > { %v1677_v8 = vpop.permute.xlu0 %1676  ;;  %v1789_v9 = vsel %vm623_vm3, %v1549_v10, %v1679_v59  ;;  %v5838_v44 = vpop.f32.mrf.mxu0 }
 0x192   : > { %v1788_v53 = vsel %vm623_vm3, %v1579_v5, %v1677_v8 }
 0x194   : > { %v1749_v24 = vpop.permute.xlu1 %1748 }
 0x195   : > { %v1809_v4 = vsel %vm644_vm4, %v1789_v9, %v1749_v24  ;;  %v1747_v32 = vpop.permute.xlu0 %1746 }
 0x196   : > { %v1808_v28 = vsel %vm644_vm4, %v1788_v53, %v1747_v32 }
 0x197   : > { %4529 = vmatprep.mubr.msk.f32.mxu0 %vm1011_vm5, %v1808_v28  ;;  %v5840_v11 = vpop.f32.mrf.mxu0 }
 0x198   : > { %4530 = vmatmul.mubr.msk.f32.gmra.mxu0 %vm1011_vm5, %v1809_v4 }
 0x199   : > { %v5842_v2 = vpop.f32.mrf.mxu0 }
 0x19f   : > { %v5844_v26 = vpop.f32.mrf.mxu0 }
 0x1a1   : > { %v5846_v27 = vpop.f32.mrf.mxu0 }
 0x1aa   : > { %v5848_v16 = vpop.f32.mrf.mxu0 }
 0x1ac   : > { %v5852_v14 = vpop.f32.mrf.mxu0 }
 0x1b2   : > { %v5850_v45 = vpop.f32.mrf.mxu1 }
 0x1b4   : > { %v5854_v36 = vpop.f32.mrf.mxu1 }
 0x1ba   : > { %v5856_v37 = vpop.f32.mrf.mxu0 }
 0x1bc   : > { %v5858_v20 = vpop.f32.mrf.mxu0 }
 0x1bf   : > { %v4470_v51 = vpop.f32.mrf.mxu1 }
 0x1c0   : > { %v1376_v48 = vadd.f32 %v4470_v51, %v4436_v39 }
 0x1c1   : > { %v1370_v57 = vpop.f32.mrf.mxu1 }
 0x1c2   : > { %v1371_v50 = vadd.f32 %v1370_v57, %v1142_v23 }
 0x1ca   : > { %v4504_v52 = vpop.f32.mrf.mxu0 }
 0x1cb   : > { %v2042_v46 = vadd.f32 %v4504_v52, %v1376_v48 }
 0x1cc   : > { %v1942_v34 = vpop.f32.mrf.mxu0 }
 0x1cd   : > { %v2069_v21 = vmul.f32 %v5863_v47, %v2042_v46  ;;  %v2041_v49 = vadd.f32 %v1942_v34, %v1371_v50 }
 0x1cf   : > { %v2096_v55 = vadd.f32 %v5868_v22, %v2069_v21  ;;  %v2068_v35 = vmul.f32 %v5863_v47, %v2041_v49  ;;  %v4473_v58 = vpop.f32.mrf.mxu1 }
 0x1d0   : > { %v1386_v25 = vadd.f32 %v4473_v58, %v4439_v42 }
 0x1d1   : > { %vm2116_vm6 = vcmp.ge.f32.partialorder %v2096_v55, 0.0  ;;  %v2136_v54 = vmul.f32 0.01, %v2096_v55  ;;  %v2095_v29 = vadd.f32 %v5868_v22, %v2068_v35  ;;  %v1380_v38 = vpop.f32.mrf.mxu1 }
 0x1d2   : > { %v1381_v6 = vadd.f32 %v1380_v38, %v1152_v43 }
 0x1d3   : > { %v2156_v30 = vsel %vm2116_vm6, %v2096_v55, %v2136_v54  ;;  %vm2115_vm7 = vcmp.ge.f32.partialorder %v2095_v29, 0.0  ;;  %v2135_v56 = vmul.f32 0.01, %v2095_v29 }
 0x1d4   : > { %2176 = vst [vmem:[#allocation2 + $0x38] sm:$0xff] %v2156_v30 }
 0x1d5   : > { %v2155_v31 = vsel %vm2115_vm7, %v2095_v29, %v2135_v56 }
 0x1d6   : > { %2175 = vst [vmem:[#allocation2] sm:$0xff] %v2155_v31 }
 0x1da   : > { %v4507_v60 = vpop.f32.mrf.mxu0 }
 0x1db   : > { %v2044_v62 = vadd.f32 %v4507_v60, %v1386_v25 }
 0x1dc   : > { %v1952_v15 = vpop.f32.mrf.mxu0 }
 0x1dd   : > { %v2071_v1 = vmul.f32 %v5863_v47, %v2044_v62  ;;  %v2043_v61 = vadd.f32 %v1952_v15, %v1381_v6 }
 0x1df   : > { %v2098_v40 = vadd.f32 %v5868_v22, %v2071_v1  ;;  %v2070_v18 = vmul.f32 %v5863_v47, %v2043_v61  ;;  %v4476_v59 = vpop.f32.mrf.mxu1 }
 0x1e0   : > { %v1396_v8 = vadd.f32 %v4476_v59, %v4442_v19 }
 0x1e1   : > { %vm2118_vm8 = vcmp.ge.f32.partialorder %v2098_v40, 0.0  ;;  %v2138_v7 = vmul.f32 0.01, %v2098_v40  ;;  %v2097_v63 = vadd.f32 %v5868_v22, %v2070_v18  ;;  %v1390_v10 = vpop.f32.mrf.mxu1 }
 0x1e2   : > { %v1391_v5 = vadd.f32 %v1390_v10, %v1162_v33 }
 0x1e3   : > { %v2158_v0 = vsel %vm2118_vm8, %v2098_v40, %v2138_v7  ;;  %vm2117_vm9 = vcmp.ge.f32.partialorder %v2097_v63, 0.0  ;;  %v2137_v17 = vmul.f32 0.01, %v2097_v63 }
 0x1e4   : > { %2178 = vst [vmem:[#allocation2 + $0x18] sm:$0xff] %v2158_v0 }
 0x1e5   : > { %v2157_v41 = vsel %vm2117_vm9, %v2097_v63, %v2137_v17 }
 0x1e6   : > { %2177 = vst [vmem:[#allocation2 + $0x50] sm:$0xff] %v2157_v41 }
 0x1eb   : > { %v4510_v39 = vpop.f32.mrf.mxu0 }
 0x1ec   : > { %v2046_v9 = vadd.f32 %v4510_v39, %v1396_v8 }
 0x1ed   : > { %v1962_v24 = vpop.f32.mrf.mxu0 }
 0x1ee   : > { %v2073_v53 = vmul.f32 %v5863_v47, %v2046_v9  ;;  %v2045_v4 = vadd.f32 %v1962_v24, %v1391_v5 }
 0x1f0   : > { %v2100_v32 = vadd.f32 %v5868_v22, %v2073_v53  ;;  %v2072_v23 = vmul.f32 %v5863_v47, %v2045_v4  ;;  %v4479_v19 = vpop.f32.mrf.mxu1 }
 0x1f1   : > { %v1406_v48 = vadd.f32 %v4479_v19, %v5832_v12 }
 0x1f2   : > { %vm2120_vm10 = vcmp.ge.f32.partialorder %v2100_v32, 0.0  ;;  %v2140_v28 = vmul.f32 0.01, %v2100_v32  ;;  %v2099_v42 = vadd.f32 %v5868_v22, %v2072_v23  ;;  %v1400_v33 = vpop.f32.mrf.mxu1 }
 0x1f3   : > { %v1401_v50 = vadd.f32 %v1400_v33, %v5834_v13 }
 0x1f4   : > { %v2160_v43 = vsel %vm2120_vm10, %v2100_v32, %v2140_v28  ;;  %vm2119_vm11 = vcmp.ge.f32.partialorder %v2099_v42, 0.0  ;;  %v2139_v51 = vmul.f32 0.01, %v2099_v42 }
 0x1f5   : > { %2180 = vst [vmem:[#allocation2 + $0x68] sm:$0xff] %v2160_v43 }
 0x1f6   : > { %v2159_v57 = vsel %vm2119_vm11, %v2099_v42, %v2139_v51 }
 0x1f7   : > { %2179 = vst [vmem:[#allocation2 + $0x30] sm:$0xff] %v2159_v57 }
 0x1fb   : > { %v4513_v52 = vpop.f32.mrf.mxu0 }
 0x1fc   : > { %v2048_v46 = vadd.f32 %v4513_v52, %v1406_v48 }
 0x1fd   : > { %v1972_v34 = vpop.f32.mrf.mxu0 }
 0x1fe   : > { %v2075_v21 = vmul.f32 %v5863_v47, %v2048_v46  ;;  %v2047_v49 = vadd.f32 %v1972_v34, %v1401_v50 }
 0x200   : > { %v2102_v55 = vadd.f32 %v5868_v22, %v2075_v21  ;;  %v2074_v35 = vmul.f32 %v5863_v47, %v2047_v49  ;;  %v4482_v12 = vpop.f32.mrf.mxu1 }
 0x201   : > { %v1416_v31 = vadd.f32 %v4482_v12, %v5836_v3 }
 0x202   : > { %vm2122_vm12 = vcmp.ge.f32.partialorder %v2102_v55, 0.0  ;;  %v2142_v54 = vmul.f32 0.01, %v2102_v55  ;;  %v2101_v29 = vadd.f32 %v5868_v22, %v2074_v35  ;;  %v1410_v13 = vpop.f32.mrf.mxu1 }
 0x203   : > { %v1411_v25 = vadd.f32 %v1410_v13, %v5838_v44 }
 0x204   : > { %v2162_v30 = vsel %vm2122_vm12, %v2102_v55, %v2142_v54  ;;  %vm2121_vm13 = vcmp.ge.f32.partialorder %v2101_v29, 0.0  ;;  %v2141_v56 = vmul.f32 0.01, %v2101_v29 }
 0x205   : > { %2182 = vst [vmem:[#allocation2 + $0x80] sm:$0xff] %v2162_v30 }
 0x206   : > { %v2161_v58 = vsel %vm2121_vm13, %v2101_v29, %v2141_v56 }
 0x207   : > { %2181 = vst [vmem:[#allocation2 + $0x78] sm:$0xff] %v2161_v58 }
 0x20b   : > { %v4516_v38 = vpop.f32.mrf.mxu0 }
 0x20c   : > { %v2050_v60 = vadd.f32 %v4516_v38, %v1416_v31 }
 0x20d   : > { %v1982_v6 = vpop.f32.mrf.mxu0 }
 0x20e   : > { %v2077_v62 = vmul.f32 %v5863_v47, %v2050_v60  ;;  %v2049_v15 = vadd.f32 %v1982_v6, %v1411_v25 }
 0x210   : > { %v2104_v1 = vadd.f32 %v5868_v22, %v2077_v62  ;;  %v2076_v61 = vmul.f32 %v5863_v47, %v2049_v15  ;;  %v4485_v3 = vpop.f32.mrf.mxu1 }
 0x211   : > { %v1426_v17 = vadd.f32 %v4485_v3, %v5840_v11 }
 0x212   : > { %vm2124_vm14 = vcmp.ge.f32.partialorder %v2104_v1, 0.0  ;;  %v2144_v40 = vmul.f32 0.01, %v2104_v1  ;;  %v2103_v18 = vadd.f32 %v5868_v22, %v2076_v61  ;;  %v1420_v44 = vpop.f32.mrf.mxu1 }
 0x213   : > { %v1421_v59 = vadd.f32 %v1420_v44, %v5842_v2 }
 0x214   : > { %v2164_v7 = vsel %vm2124_vm14, %v2104_v1, %v2144_v40  ;;  %vm2123_vm15 = vcmp.ge.f32.partialorder %v2103_v18, 0.0  ;;  %v2143_v63 = vmul.f32 0.01, %v2103_v18 }
 0x215   : > { %2184 = vst [vmem:[#allocation2 + $0x88] sm:$0xff] %v2164_v7 }
 0x216   : > { %v2163_v0 = vsel %vm2123_vm15, %v2103_v18, %v2143_v63 }
 0x217   : > { %2183 = vst [vmem:[#allocation2 + $0x8] sm:$0xff] %v2163_v0 }
 0x21b   : > { %v4519_v41 = vpop.f32.mrf.mxu0 }
 0x21c   : > { %v2052_v10 = vadd.f32 %v4519_v41, %v1426_v17 }
 0x21d   : > { %v1992_v8 = vpop.f32.mrf.mxu0 }
 0x21e   : > { %v2079_v39 = vmul.f32 %v5863_v47, %v2052_v10  ;;  %v2051_v5 = vadd.f32 %v1992_v8, %v1421_v59 }
 0x220   : > { %v2106_v9 = vadd.f32 %v5868_v22, %v2079_v39  ;;  %v2078_v24 = vmul.f32 %v5863_v47, %v2051_v5  ;;  %v4488_v11 = vpop.f32.mrf.mxu1 }
 0x221   : > { %v1436_v42 = vadd.f32 %v4488_v11, %v5844_v26 }
 0x222   : > { %vm2126_vm0 = vcmp.ge.f32.partialorder %v2106_v9, 0.0  ;;  %v2146_v53 = vmul.f32 0.01, %v2106_v9  ;;  %v2105_v4 = vadd.f32 %v5868_v22, %v2078_v24  ;;  %v1430_v2 = vpop.f32.mrf.mxu1 }
 0x223   : > { %v1431_v51 = vadd.f32 %v1430_v2, %v5846_v27 }
 0x224   : > { %v2166_v32 = vsel %vm2126_vm0, %v2106_v9, %v2146_v53  ;;  %vm2125_vm3 = vcmp.ge.f32.partialorder %v2105_v4, 0.0  ;;  %v2145_v23 = vmul.f32 0.01, %v2105_v4 }
 0x225   : > { %2186 = vst [vmem:[#allocation2 + $0x40] sm:$0xff] %v2166_v32 }
 0x226   : > { %v2165_v28 = vsel %vm2125_vm3, %v2105_v4, %v2145_v23 }
 0x227   : > { %2185 = vst [vmem:[#allocation2 + $0x28] sm:$0xff] %v2165_v28 }
 0x22b   : > { %v4522_v43 = vpop.f32.mrf.mxu0 }
 0x22c   : > { %v2054_v19 = vadd.f32 %v4522_v43, %v1436_v42 }
 0x22d   : > { %v2002_v57 = vpop.f32.mrf.mxu0 }
 0x22e   : > { %v2081_v33 = vmul.f32 %v5863_v47, %v2054_v19  ;;  %v2053_v48 = vadd.f32 %v2002_v57, %v1431_v51 }
 0x230   : > { %v2108_v52 = vadd.f32 %v5868_v22, %v2081_v33  ;;  %v2080_v50 = vmul.f32 %v5863_v47, %v2053_v48  ;;  %v4491_v26 = vpop.f32.mrf.mxu1 }
 0x231   : > { %v1446_v35 = vadd.f32 %v4491_v26, %v5848_v16 }
 0x232   : > { %vm2128_vm4 = vcmp.ge.f32.partialorder %v2108_v52, 0.0  ;;  %v2148_v46 = vmul.f32 0.01, %v2108_v52  ;;  %v2107_v34 = vadd.f32 %v5868_v22, %v2080_v50  ;;  %v1440_v27 = vpop.f32.mrf.mxu1 }
 0x233   : > { %v1441_v29 = vadd.f32 %v1440_v27, %v5852_v14 }
 0x234   : > { %v2168_v21 = vsel %vm2128_vm4, %v2108_v52, %v2148_v46  ;;  %vm2127_vm5 = vcmp.ge.f32.partialorder %v2107_v34, 0.0  ;;  %v2147_v49 = vmul.f32 0.01, %v2107_v34 }
 0x235   : > { %2188 = vst [vmem:[#allocation2 + $0x10] sm:$0xff] %v2168_v21 }
 0x236   : > { %v2167_v55 = vsel %vm2127_vm5, %v2107_v34, %v2147_v49 }
 0x237   : > { %2187 = vst [vmem:[#allocation2 + $0x58] sm:$0xff] %v2167_v55 }
 0x23b   : > { %v4525_v54 = vpop.f32.mrf.mxu0 }
 0x23c   : > { %v2056_v30 = vadd.f32 %v4525_v54, %v1446_v35 }
 0x23d   : > { %v2012_v56 = vpop.f32.mrf.mxu0 }
 0x23e   : > { %v2083_v12 = vmul.f32 %v5863_v47, %v2056_v30  ;;  %v2055_v58 = vadd.f32 %v2012_v56, %v1441_v29 }
 0x240   : > { %v2110_v13 = vadd.f32 %v5868_v22, %v2083_v12  ;;  %v2082_v31 = vmul.f32 %v5863_v47, %v2055_v58  ;;  %v4494_v16 = vpop.f32.mrf.mxu1 }
 0x241   : > { %v1456_v15 = vadd.f32 %v4494_v16, %v5856_v37 }
 0x242   : > { %vm2130_vm6 = vcmp.ge.f32.partialorder %v2110_v13, 0.0  ;;  %v2150_v38 = vmul.f32 0.01, %v2110_v13  ;;  %v2109_v25 = vadd.f32 %v5868_v22, %v2082_v31  ;;  %v1450_v14 = vpop.f32.mrf.mxu1 }
 0x243   : > { %v1451_v61 = vadd.f32 %v1450_v14, %v5858_v20 }
 0x244   : > { %v2170_v60 = vsel %vm2130_vm6, %v2110_v13, %v2150_v38  ;;  %vm2129_vm7 = vcmp.ge.f32.partialorder %v2109_v25, 0.0  ;;  %v2149_v6 = vmul.f32 0.01, %v2109_v25 }
 0x245   : > { %2190 = vst [vmem:[#allocation2 + $0x60] sm:$0xff] %v2170_v60 }
 0x246   : > { %v2169_v62 = vsel %vm2129_vm7, %v2109_v25, %v2149_v6 }
 0x247   : > { %2189 = vst [vmem:[#allocation2 + $0x98] sm:$0xff] %v2169_v62 }
 0x24b   : > { %v4528_v1 = vpop.f32.mrf.mxu0 }
 0x24c   : > { %v2058_v40 = vadd.f32 %v4528_v1, %v1456_v15 }
 0x24d   : > { %v2022_v18 = vpop.f32.mrf.mxu0 }
 0x24e   : > { %v2085_v7 = vmul.f32 %v5863_v47, %v2058_v40  ;;  %v2057_v63 = vadd.f32 %v2022_v18, %v1451_v61 }
 0x250   : > { %v2112_v3 = vadd.f32 %v5868_v22, %v2085_v7  ;;  %v2084_v0 = vmul.f32 %v5863_v47, %v2057_v63  ;;  %v4497_v41 = vpop.f32.mrf.mxu1 }
 0x251   : > { %v1466_v8 = vadd.f32 %v4497_v41, %v5850_v45 }
 0x252   : > { %vm2132_vm8 = vcmp.ge.f32.partialorder %v2112_v3, 0.0  ;;  %v2152_v44 = vmul.f32 0.01, %v2112_v3  ;;  %v2111_v17 = vadd.f32 %v5868_v22, %v2084_v0  ;;  %v1460_v20 = vpop.f32.mrf.mxu1 }
 0x253   : > { %v1461_v5 = vadd.f32 %v1460_v20, %v5854_v36 }
 0x254   : > { %v2172_v59 = vsel %vm2132_vm8, %v2112_v3, %v2152_v44  ;;  %vm2131_vm9 = vcmp.ge.f32.partialorder %v2111_v17, 0.0  ;;  %v2151_v37 = vmul.f32 0.01, %v2111_v17 }
 0x255   : > { %2192 = vst [vmem:[#allocation2 + $0x48] sm:$0xff] %v2172_v59 }
 0x256   : > { %v2171_v10 = vsel %vm2131_vm9, %v2111_v17, %v2151_v37 }
 0x257   : > { %2191 = vst [vmem:[#allocation2 + $0x20] sm:$0xff] %v2171_v10 }
 0x258   : > { %v4531_v39 = vpop.f32.mrf.mxu0 }
 0x259   : > { %v2060_v9 = vadd.f32 %v4531_v39, %v1466_v8 }
 0x25a   : > { %v2032_v24 = vpop.f32.mrf.mxu0 }
 0x25b   : > { %v2087_v53 = vmul.f32 %v5863_v47, %v2060_v9  ;;  %v2059_v4 = vadd.f32 %v2032_v24, %v1461_v5 }
 0x25d   : > { %v2114_v32 = vadd.f32 %v5868_v22, %v2087_v53  ;;  %v2086_v23 = vmul.f32 %v5863_v47, %v2059_v4 }
 0x25f   : > { %vm2134_vm10 = vcmp.ge.f32.partialorder %v2114_v32, 0.0  ;;  %v2154_v11 = vmul.f32 0.01, %v2114_v32  ;;  %v2113_v28 = vadd.f32 %v5868_v22, %v2086_v23 }
 0x260   : > { %2198 = sbr.rel (%p4016_p10) target bundleno = 615 (0x267), region = 56 }
 0x261   : > { %v2174_v2 = vsel %vm2134_vm10, %v2114_v32, %v2154_v11  ;;  %vm2133_vm11 = vcmp.ge.f32.partialorder %v2113_v28, 0.0  ;;  %v2153_v45 = vmul.f32 0.01, %v2113_v28 }
 0x262   : > { %2194 = vst [vmem:[#allocation2 + $0x90] sm:$0xff] %v2174_v2 }
 0x263   : > { %v2173_v42 = vsel %vm2133_vm11, %v2113_v28, %v2153_v45 }
 0x264   : > { %2193 = vst [vmem:[#allocation2 + $0x70] sm:$0xff] %v2173_v42 }
 0x265   : > { %v4924_v36 = vmov 0.0  }
 0x266   : > { %2199 = vst [vmem:[#allocation2] sm:$0xff] %v4924_v36  ;;  %2200 = vst [vmem:[#allocation2 + $0x38] sm:$0xff] %v4924_v36 }
 0x267 PF: > { %p4017_p12 = scmp.ne.s32.totalorder %s4901_s27, 1 }
 0x269   : > { %2204 = sbr.rel (%p4017_p12) target bundleno = 624 (0x270), region = 60 }
 0x26e   : > { %v4925_v47 = vmov 0.0  }
 0x26f   : > { %2206 = vst [vmem:[#allocation2 + $0x70] sm:$0xff] %v4925_v47  ;;  %2207 = vst [vmem:[#allocation2 + $0x90] sm:$0xff] %v4925_v47 }
 0x270 PF: > { %v2577_v22 = vld [vmem:[#allocation3 + $0x278] sm:$0xff]  ;;  %v2576_v51 = vld [vmem:[#allocation3 + $0x270] sm:$0xff]  ;;  %v2575_v33 = vld [vmem:[#allocation3 + $0x268] sm:$0xff]  ;;  %s4027_s22 = sshll.u32 %s4901_s27, 4  ;;  %s4023_s10 = sshll.u32 %s4905_s28, 5 }
 0x271   : > { %v2561_v43 = vld [vmem:[#allocation3 + $0x1f8] sm:$0xff]  ;;  %4094 = vmatprep.subr.mxu1 %v2577_v22  ;;  %v2560_v57 = vld [vmem:[#allocation3 + $0x1f0] sm:$0xff]  ;;  %v2559_v52 = vld [vmem:[#allocation3 + $0x1e8] sm:$0xff]  ;;  %s3798_s9 = sadd.s32 %s4027_s22, %s4023_s10  ;;  %s3801_s28 = sshll.u32 %s5925_s14, 4  ;;  %s6427_s28 = int_to_ptr.vmem [resolvable:$true] %s3801_s28 }
 0x272   : > { %v2593_v19 = vld [vmem:[#allocation3 + $0x2f8] sm:$0xff]  ;;  %4095 = vmatpush3.msra.mxu1 %v2561_v43  ;;  %v2592_v48 = vld [vmem:[#allocation3 + $0x2f0] sm:$0xff]  ;;  %v2591_v50 = vld [vmem:[#allocation3 + $0x2e8] sm:$0xff]  ;;  %s4024_s27 = sshll.u32 %s3798_s9, 7  ;;  %s6502_s13 = sand.u32 1, %s4893_s25  }
 0x273   : > { %4532 = vmatprep.subr.mxu0 %v2593_v19  ;;  %4096 = vmatprep.subr.mxu1 %v2576_v51  ;;  %v2574_v46 = vld [vmem:[#allocation3 + $0x260] sm:$0xff]  ;;  %v2573_v49 = vld [vmem:[#allocation3 + $0x258] sm:$0xff]  ;;  %v2572_v27 = vld [vmem:[#allocation3 + $0x250] sm:$0xff]  ;;  %s6425_s19 = scalar_lea.hbm %s6491_s7, %s4024_s27  ;;  %s6432_s20 = scalar_lea.sflag [#allocation5], %s6502_s13 }
 0x274   : > { %4533 = vmatpush3.msra.mxu0 %v2593_v19  ;;  %4097 = vmatpush3.msra.mxu1 %v2560_v57  ;;  %v2558_v34 = vld [vmem:[#allocation3 + $0x1e0] sm:$0xff]  ;;  %v2557_v26 = vld [vmem:[#allocation3 + $0x1d8] sm:$0xff]  ;;  %v2556_v35 = vld [vmem:[#allocation3 + $0x1d0] sm:$0xff]  ;;  %s4821_s17 = scalar_lea.vmem %s6427_s28, 2048  ;;  %s4926_s18 = smov [#allocation6]  }
 0x275   : > { %4534 = vmatprep.subr.mxu0 %v2592_v48  ;;  %4098 = vmatprep.subr.mxu1 %v2575_v33  ;;  %v2590_v21 = vld [vmem:[#allocation3 + $0x2e0] sm:$0xff]  ;;  %v2589_v55 = vld [vmem:[#allocation3 + $0x2d8] sm:$0xff]  ;;  %v2588_v54 = vld [vmem:[#allocation3 + $0x2d0] sm:$0xff]  ;;  %p4822_p0 = scmp.ne.s32.totalorder %s6427_s28, %s4821_s17  ;;  %s4825_s22 = sshll.u32 %s4926_s18, 4  ;;  %s4826_s22 = int_to_ptr.vmem [resolvable:$false] %s4825_s22 }
 0x276   : > { %4535 = vmatpush3.msra.mxu0 %v2592_v48  ;;  %4099 = vmatpush3.msra.mxu1 %v2559_v52  ;;  %v2571_v29 = vld [vmem:[#allocation3 + $0x248] sm:$0xff]  ;;  %v2570_v12 = vld [vmem:[#allocation3 + $0x240] sm:$0xff]  ;;  %v2569_v31 = vld [vmem:[#allocation3 + $0x238] sm:$0xff]  ;;  %s4827_s10 = scalar_lea.vmem %s4826_s22, 4096  ;;  %p4828_p5 = scmp.lt.s32.totalorder %s6427_s28, %s4826_s22 }
 0x277   : > { %4536 = vmatprep.subr.mxu0 %v2591_v50  ;;  %4100 = vmatprep.subr.mxu1 %v2574_v46  ;;  %v2555_v30 = vld [vmem:[#allocation3 + $0x1c8] sm:$0xff]  ;;  %v2554_v58 = vld [vmem:[#allocation3 + $0x1c0] sm:$0xff]  ;;  %v2553_v38 = vld [vmem:[#allocation3 + $0x1b8] sm:$0xff]  ;;  %p4823_p2 = pnand %p4822_p0, %p5020_p3  ;;  %p4829_p6 = scmp.lt.s32.totalorder %s4827_s10, %s4821_s17 }
 0x278   : > { %4537 = vmatpush3.msra.mxu0 %v2591_v50  ;;  %4101 = vmatpush3.msra.mxu1 %v2558_v34  ;;  %v2587_v56 = vld [vmem:[#allocation3 + $0x2c8] sm:$0xff]  ;;  %v2586_v13 = vld [vmem:[#allocation3 + $0x2c0] sm:$0xff]  ;;  %v2585_v25 = vld [vmem:[#allocation3 + $0x2b8] sm:$0xff] }
 0x279   : > { %4538 = vmatprep.subr.mxu0 %v2590_v21  ;;  %4102 = vmatprep.subr.mxu1 %v2573_v49  ;;  %v2568_v60 = vld [vmem:[#allocation3 + $0x230] sm:$0xff]  ;;  %v2567_v62 = vld [vmem:[#allocation3 + $0x228] sm:$0xff]  ;;  %v2566_v1 = vld [vmem:[#allocation3 + $0x220] sm:$0xff]  ;;  %p4824_p4 = pneg %p4823_p2  ;;  %p4830_p7 = por %p4829_p6, %p4828_p5 }
 0x27a   : > { %4539 = vmatpush3.msra.mxu0 %v2590_v21  ;;  %4103 = vmatpush3.msra.mxu1 %v2557_v26  ;;  %v2552_v6 = vld [vmem:[#allocation3 + $0x1b0] sm:$0xff]  ;;  %v2551_v14 = vld [vmem:[#allocation3 + $0x1a8] sm:$0xff]  ;;  %v2550_v61 = vld [vmem:[#allocation3 + $0x1a0] sm:$0xff] }
 0x27b   : > { %4540 = vmatprep.subr.mxu0 %v2589_v55  ;;  %4104 = vmatprep.subr.mxu1 %v2572_v27  ;;  %v2584_v16 = vld [vmem:[#allocation3 + $0x2b0] sm:$0xff]  ;;  %v2583_v15 = vld [vmem:[#allocation3 + $0x2a8] sm:$0xff]  ;;  %v2582_v40 = vld [vmem:[#allocation3 + $0x2a0] sm:$0xff]  ;;  %p4831_p9 = pnand %p4830_p7, %p4824_p4 }
 0x27c   : > { %4541 = vmatpush3.msra.mxu0 %v2589_v55  ;;  %4105 = vmatpush3.msra.mxu1 %v2556_v35  ;;  %v2565_v18 = vld [vmem:[#allocation3 + $0x218] sm:$0xff]  ;;  %v5929_v3 = vld [vmem:[#allocation2 + $0x50] sm:$0xff]  ;;  %v2563_v59 = vld [vmem:[#allocation3 + $0x208] sm:$0xff] }
 0x27d   : > { %4542 = vmatprep.subr.mxu0 %v2588_v54  ;;  %4106 = vmatprep.subr.mxu1 %v2571_v29  ;;  %v2549_v7 = vld [vmem:[#allocation3 + $0x198] sm:$0xff]  ;;  %v2564_v44 = vld [vmem:[#allocation3 + $0x210] sm:$0xff]  ;;  %v2449_v10 = vrot.slane %v5929_v3, 7  ;;  %v2547_v20 = vld [vmem:[#allocation3 + $0x188] sm:$0xff]  ;;  %v2489_v5 = vrot.slane %v5929_v3, 1 }
 0x27e   : > { %4543 = vmatpush3.msra.mxu0 %v2588_v54  ;;  %4107 = vmatpush3.msra.mxu1 %v2555_v30  ;;  %v2581_v63 = vld [vmem:[#allocation3 + $0x298] sm:$0xff]  ;;  %v2548_v17 = vld [vmem:[#allocation3 + $0x190] sm:$0xff]  ;;  %v2579_v8 = vld [vmem:[#allocation3 + $0x288] sm:$0xff] }
 0x27f   : > { %4544 = vmatprep.subr.mxu0 %v2587_v56  ;;  %4108 = vmatprep.subr.mxu1 %v2570_v12  ;;  %v5931_v0 = vld [vmem:[#allocation2 + $0x18] sm:$0xff]  ;;  %v2580_v41 = vld [vmem:[#allocation3 + $0x290] sm:$0xff]  ;;  %v2562_v39 = vld [vmem:[#allocation3 + $0x200] sm:$0xff] }
 0x280   : > { %4545 = vmatpush3.msra.mxu0 %v2587_v56  ;;  %4109 = vmatpush3.msra.mxu1 %v2554_v58  ;;  %v2425_v37 = vrot.slane %v5931_v0, 7  ;;  %v2490_v9 = vrot.slane %v5931_v0, 1  ;;  %v2546_v24 = vld [vmem:[#allocation3 + $0x180] sm:$0xff]  ;;  %v5937_v53 = vld [vmem:[#allocation2 + $0x30] sm:$0xff]  ;;  %v5939_v4 = vld [vmem:[#allocation2 + $0x68] sm:$0xff] }
 0x281   : > { %4546 = vmatprep.subr.mxu0 %v2586_v13  ;;  %4110 = vmatprep.subr.mxu1 %v2569_v31  ;;  %v2578_v23 = vld [vmem:[#allocation3 + $0x280] sm:$0xff]  ;;  %v2383_v11 = vld [vmem:[#allocation3 + $0xf8] sm:$0xff]  ;;  %v2492_v45 = vrot.slane %v5937_v53, 1  ;;  %v2493_v42 = vrot.slane %v5939_v4, 1  ;;  %v2382_v51 = vld [vmem:[#allocation3 + $0xf0] sm:$0xff]  ;;  %v2426_v19 = vrot.slane %v5939_v4, 7 }
 0x282   : > { %4547 = vmatpush3.msra.mxu0 %v2586_v13  ;;  %4111 = vmatpush3.msra.mxu1 %v2553_v38  ;;  %v5942_v32 = vsel %vm381_vm2, %v2425_v37, %v2449_v10  ;;  %v5946_v28 = vsel %vm432_vm1, %v2489_v5, %v2490_v9  ;;  %v2367_v2 = vld [vmem:[#allocation3 + $0x78] sm:$0xff]  ;;  %v5952_v36 = vsel %vm432_vm1, %v2490_v9, %v2489_v5  ;;  %v5956_v22 = vld [vmem:[#allocation2 + $0x80] sm:$0xff]  ;;  %v2451_v57 = vrot.slane %v5937_v53, 7  ;;  %v2366_v33 = vld [vmem:[#allocation3 + $0x70] sm:$0xff] }
 0x283   : > { %4548 = vmatprep.subr.mxu0 %v2585_v25  ;;  %4112 = vmatprep.subr.mxu1 %v2568_v60  ;;  %v5954_v47 = vld [vmem:[#allocation2 + $0x78] sm:$0xff]  ;;  %v5959_v43 = vsel %vm381_vm2, %v2449_v10, %v2425_v37  ;;  %v2381_v48 = vld [vmem:[#allocation3 + $0xe8] sm:$0xff]  ;;  %v5967_v52 = vsel %vm432_vm1, %v2492_v45, %v2493_v42  ;;  %v2496_v46 = vrot.slane %v5956_v22, 1  ;;  %v5973_v21 = vsel %vm432_vm1, %v2493_v42, %v2492_v45  ;;  %v2380_v27 = vld [vmem:[#allocation3 + $0xe0] sm:$0xff] }
 0x284   : > { %4549 = vmatpush3.msra.mxu0 %v2585_v25  ;;  %4113 = vmatpush3.msra.mxu1 %v2552_v6  ;;  %v2495_v50 = vrot.slane %v5954_v47, 1  ;;  %v2365_v34 = vld [vmem:[#allocation3 + $0x68] sm:$0xff]  ;;  %v5981_v55 = vsel %vm381_vm2, %v2426_v19, %v2451_v57  ;;  %v2364_v35 = vld [vmem:[#allocation3 + $0x60] sm:$0xff]  ;;  %v2379_v54 = vld [vmem:[#allocation3 + $0xd8] sm:$0xff]  ;;  %v5996_v13 = vsel %vm381_vm2, %v2451_v57, %v2426_v19  ;;  %v2427_v31 = vrot.slane %v5956_v22, 7 }
 0x285   : > { %4550 = vmatprep.subr.mxu0 %v2584_v16  ;;  %4114 = vmatprep.subr.mxu1 %v2567_v62  ;;  %v5975_v49 = vld [vmem:[#allocation2 + $0x8] sm:$0xff]  ;;  %v2363_v12 = vld [vmem:[#allocation3 + $0x58] sm:$0xff]  ;;  %v2453_v38 = vrot.slane %v5954_v47, 7  ;;  %v2378_v25 = vld [vmem:[#allocation3 + $0xd0] sm:$0xff] }
 0x286   : > { %4551 = vmatpush3.msra.mxu0 %v2584_v16  ;;  %4115 = vmatpush3.msra.mxu1 %v2551_v14  ;;  %v5977_v26 = vld [vmem:[#allocation2 + $0x88] sm:$0xff]  ;;  %v5986_v29 = vsel %vm432_vm1, %v2495_v50, %v2496_v46  ;;  %v2498_v30 = vrot.slane %v5975_v49, 1  ;;  %v5992_v58 = vsel %vm432_vm1, %v2496_v46, %v2495_v50  ;;  %v2362_v60 = vld [vmem:[#allocation3 + $0x50] sm:$0xff]  ;;  %v2455_v10 = vrot.slane %v5975_v49, 7  ;;  %v6032_v9 = vld [vmem:[#allocation2 + $0x58] sm:$0xff] }
 0x287   : > { %4552 = vmatprep.subr.mxu0 %v2583_v15  ;;  %4116 = vmatprep.subr.mxu1 %v2566_v1  ;;  %v2499_v56 = vrot.slane %v5977_v26, 1  ;;  %v2377_v6 = vld [vmem:[#allocation3 + $0xc8] sm:$0xff]  ;;  %v6011_v1 = vld [vmem:[#allocation2 + $0x40] sm:$0xff]  ;;  %v2428_v37 = vrot.slane %v5977_v26, 7  ;;  %v2374_v5 = vld [vmem:[#allocation3 + $0xb0] sm:$0xff]  ;;  %v2504_v42 = vrot.slane %v6032_v9, 1 }
 0x288   : > { %4553 = vmatpush3.msra.mxu0 %v2583_v15  ;;  %4117 = vmatpush3.msra.mxu1 %v2550_v61  ;;  %v2361_v62 = vld [vmem:[#allocation3 + $0x48] sm:$0xff]  ;;  %v6015_v61 = vsel %vm381_vm2, %v2427_v31, %v2453_v38  ;;  %v2358_v45 = vld [vmem:[#allocation3 + $0x30] sm:$0xff]  ;;  %v2395_v19 = vld [vmem:[#allocation3 + $0x158] sm:$0xff] }
 0x289   : > { %4554 = vmatprep.subr.mxu0 %v2582_v40  ;;  %4118 = vmatprep.subr.mxu1 %v2565_v18  ;;  %v6003_v16 = vsel %vm432_vm1, %v2498_v30, %v2499_v56  ;;  %v6007_v14 = vsel %vm432_vm1, %v2499_v56, %v2498_v30  ;;  %v6009_v15 = vld [vmem:[#allocation2 + $0x28] sm:$0xff]  ;;  %v2399_v18 = vld [vmem:[#allocation3 + $0x178] sm:$0xff]  ;;  %v2394_v46 = vld [vmem:[#allocation3 + $0x150] sm:$0xff] }
 0x28a   : > { %4555 = vmatpush3.msra.mxu0 %v2582_v40  ;;  %4119 = vmatpush3.msra.mxu1 %v2549_v7  ;;  %v2376_v40 = vld [vmem:[#allocation3 + $0xc0] sm:$0xff]  ;;  %v2373_v57 = vld [vmem:[#allocation3 + $0xa8] sm:$0xff]  ;;  %v2457_v50 = vrot.slane %v6009_v15, 7  ;;  %v6062_v30 = vld [vmem:[#allocation2 + $0x98] sm:$0xff] }
 0x28b   : > { %4556 = vmatprep.subr.mxu0 %v2581_v63  ;;  %4120 = vmatprep.subr.mxu1 %v2564_v44  ;;  %v2360_v7 = vld [vmem:[#allocation3 + $0x40] sm:$0xff]  ;;  %v2502_v44 = vrot.slane %v6011_v1, 1 }
 0x28c   : > { %4557 = vmatpush3.msra.mxu0 %v2581_v63  ;;  %4121 = vmatpush3.msra.mxu1 %v2548_v17  ;;  %v2501_v63 = vrot.slane %v6009_v15, 1  ;;  %v2398_v17 = vld [vmem:[#allocation3 + $0x170] sm:$0xff]  ;;  %v6064_v56 = vld [vmem:[#allocation2 + $0x60] sm:$0xff] }
 0x28d   : > { %4558 = vmatprep.subr.mxu0 %v2580_v41  ;;  %4122 = vmatprep.subr.mxu1 %v2563_v59  ;;  %v6024_v59 = vsel %vm381_vm2, %v2453_v38, %v2427_v31  ;;  %v2392_v31 = vld [vmem:[#allocation3 + $0x140] sm:$0xff] }
 0x28e   : > { %4559 = vmatpush3.msra.mxu0 %v2580_v41  ;;  %4123 = vmatpush3.msra.mxu1 %v2547_v20  ;;  %v2375_v41 = vld [vmem:[#allocation3 + $0xb8] sm:$0xff]  ;;  %v2397_v20 = vld [vmem:[#allocation3 + $0x168] sm:$0xff]  ;;  %v2372_v38 = vld [vmem:[#allocation3 + $0xa0] sm:$0xff] }
 0x28f   : > { %4560 = vmatprep.subr.mxu0 %v2579_v8  ;;  %4124 = vmatprep.subr.mxu1 %v2562_v39  ;;  %v2359_v39 = vld [vmem:[#allocation3 + $0x38] sm:$0xff] }
 0x290   : > { %2658 = vmatprep.mubr.f32.mxu1 %v5929_v3  ;;  %4125 = vmatpush3.msra.mxu1 %v2546_v24  ;;  %v6034_v24 = vld [vmem:[#allocation2 + $0x10] sm:$0xff] }
 0x291   : > { %4561 = vmatpush3.msra.mxu0 %v2579_v8  ;;  %2659 = vmatmul.mubr.f32.vlgmr.msra.gmra.mxu1 %v5942_v32  ;;  %v6029_v8 = vsel %vm432_vm1, %v2501_v63, %v2502_v44 }
 0x292   : > { %4562 = vmatprep.subr.mxu0 %v2578_v23  ;;  %4206 = vmatprep.subr.mxu1 %v2383_v11  ;;  %v6041_v11 = vsel %vm432_vm1, %v2502_v44, %v2501_v63  ;;  %v2390_v63 = vld [vmem:[#allocation3 + $0x130] sm:$0xff]  ;;  %v2371_v44 = vld [vmem:[#allocation3 + $0x98] sm:$0xff] }
 0x293   : > { %4563 = vmatpush3.msra.mxu0 %v2578_v23  ;;  %4564 = vmatprep.mubr.f32.mxu0 %v5946_v28  ;;  %v6038_v23 = vsel %vm381_vm2, %v2428_v37, %v2455_v10 }
 0x294   : > { %4207 = vmatpush3.msra.mxu1 %v2367_v2  ;;  %4565 = vmatmul.mubr.f32.vlgmr.msra.gmra.mxu0 %v5952_v36  ;;  %v2396_v2 = vld [vmem:[#allocation3 + $0x160] sm:$0xff] }
 0x295   : > { %2663 = vmatprep.mubr.f32.mxu1 %v5931_v0  ;;  %4208 = vmatprep.subr.mxu1 %v2382_v51  ;;  %v2505_v51 = vrot.slane %v6034_v24, 1 }
 0x296   : > { %2664 = vmatmul.mubr.f32.gmra.mxu1 %v5959_v43  ;;  %4567 = vmatprep.mubr.f32.mxu0 %v5967_v52 }
 0x297   : > { %4209 = vmatpush3.msra.mxu1 %v2366_v33  ;;  %2668 = vmatprep.mubr.f32.mxu1 %v5937_v53  ;;  %v6050_v33 = vsel %vm381_vm2, %v2455_v10, %v2428_v37  ;;  %v2389_v37 = vld [vmem:[#allocation3 + $0x128] sm:$0xff]  ;;  %v6088_v10 = vld [vmem:[#allocation2 + $0x20] sm:$0xff] }
 0x298   : > { %4210 = vmatprep.subr.mxu1 %v2381_v48  ;;  %4568 = vmatmul.mubr.f32.gmra.mxu0 %v5973_v21  ;;  %v2429_v48 = vrot.slane %v6011_v1, 7 }
 0x299   : > { %4211 = vmatpush3.msra.mxu1 %v2365_v34  ;;  %4570 = vmatprep.mubr.f32.mxu0 %v5986_v29  ;;  %v6055_v34 = vsel %vm432_vm1, %v2504_v42, %v2505_v51 }
 0x29a   : > { %2669 = vmatmul.mubr.f32.gmra.mxu1 %v5981_v55  ;;  %4212 = vmatprep.subr.mxu1 %v2380_v27  ;;  %v2393_v27 = vld [vmem:[#allocation3 + $0x148] sm:$0xff] }
 0x29b   : > { %2673 = vmatprep.mubr.f32.mxu1 %v5939_v4  ;;  %4213 = vmatpush3.msra.mxu1 %v2364_v35  ;;  %v2357_v35 = vld [vmem:[#allocation3 + $0x28] sm:$0xff] }
 0x29c   : > { %4214 = vmatprep.subr.mxu1 %v2379_v54  ;;  %4571 = vmatmul.mubr.f32.gmra.mxu0 %v5992_v58  ;;  %v6060_v54 = vsel %vm381_vm2, %v2429_v48, %v2457_v50 }
 0x29d   : > { %4215 = vmatpush3.msra.mxu1 %v2363_v12  ;;  %4573 = vmatprep.mubr.f32.mxu0 %v6003_v16  ;;  %v6068_v12 = vsel %vm432_vm1, %v2505_v51, %v2504_v42  ;;  %v2510_v42 = vrot.slane %v6088_v10, 1 }
 0x29e   : > { %2674 = vmatmul.mubr.f32.gmra.mxu1 %v5996_v13  ;;  %4216 = vmatprep.subr.mxu1 %v2378_v25  ;;  %v2356_v25 = vld [vmem:[#allocation3 + $0x20] sm:$0xff] }
 0x29f   : > { %2678 = vmatprep.mubr.f32.mxu1 %v5954_v47  ;;  %4217 = vmatpush3.msra.mxu1 %v2362_v60  ;;  %v2507_v60 = vrot.slane %v6062_v30, 1 }
 0x2a0   : > { %4218 = vmatprep.subr.mxu1 %v2377_v6  ;;  %4574 = vmatmul.mubr.f32.gmra.mxu0 %v6007_v14  ;;  %v2508_v6 = vrot.slane %v6064_v56, 1 }
 0x2a1   : > { %4219 = vmatpush3.msra.mxu1 %v2361_v62  ;;  %4588 = vmatprep.subr.mxu0 %v2399_v18  ;;  %v6075_v62 = vsel %vm381_vm2, %v2457_v50, %v2429_v48  ;;  %v2461_v48 = vrot.slane %v6062_v30, 7  ;;  %v2387_v50 = vld [vmem:[#allocation3 + $0x118] sm:$0xff] }
 0x2a2   : > { %2679 = vmatmul.mubr.f32.gmra.mxu1 %v6015_v61  ;;  %4220 = vmatprep.subr.mxu1 %v2376_v40  ;;  %v2430_v40 = vrot.slane %v6034_v24, 7 }
 0x2a3   : > { %2683 = vmatprep.mubr.f32.mxu1 %v5956_v22  ;;  %4221 = vmatpush3.msra.mxu1 %v2360_v7  ;;  %v2391_v7 = vld [vmem:[#allocation3 + $0x138] sm:$0xff] }
 0x2a4   : > { %4589 = vmatpush3.msra.mxu0 %v2399_v18  ;;  %4222 = vmatprep.subr.mxu1 %v2375_v41  ;;  %v2459_v18 = vrot.slane %v6032_v9, 7 }
 0x2a5   : > { %4590 = vmatprep.subr.mxu0 %v2398_v17  ;;  %4576 = vmatprep.mubr.f32.mxu0 %v6029_v8 }
 0x2a6   : > { %2684 = vmatmul.mubr.f32.gmra.mxu1 %v6024_v59  ;;  %4591 = vmatpush3.msra.mxu0 %v2398_v17  ;;  %v6082_v17 = vsel %vm432_vm1, %v2507_v60, %v2508_v6  ;;  %v6086_v41 = vsel %vm381_vm2, %v2430_v40, %v2459_v18 }
 0x2a7   : > { %2688 = vmatprep.mubr.f32.mxu1 %v5975_v49  ;;  %4592 = vmatprep.subr.mxu0 %v2397_v20 }
 0x2a8   : > { %4223 = vmatpush3.msra.mxu1 %v2359_v39  ;;  %4593 = vmatpush3.msra.mxu0 %v2397_v20  ;;  %v6090_v20 = vld [vmem:[#allocation2 + $0x48] sm:$0xff]  ;;  %v2355_v39 = vld [vmem:[#allocation3 + $0x18] sm:$0xff] }
 0x2a9   : > { %4224 = vmatprep.subr.mxu1 %v2374_v5  ;;  %4577 = vmatmul.mubr.f32.gmra.mxu0 %v6041_v11  ;;  %v2370_v5 = vld [vmem:[#allocation3 + $0x90] sm:$0xff]  ;;  %v2511_v51 = vrot.slane %v6090_v20, 1 }
 0x2aa   : > { %2689 = vmatmul.mubr.f32.gmra.mxu1 %v6038_v23  ;;  %4594 = vmatprep.subr.mxu0 %v2396_v2 }
 0x2ab   : > { %2693 = vmatprep.mubr.f32.mxu1 %v5977_v26  ;;  %4595 = vmatpush3.msra.mxu0 %v2396_v2  ;;  %v6095_v2 = vsel %vm432_vm1, %v2508_v6, %v2507_v60  ;;  %v6119_v60 = vsel %vm432_vm1, %v2511_v51, %v2510_v42  ;;  %v2369_v6 = vld [vmem:[#allocation3 + $0x88] sm:$0xff] }
 0x2ac   : > { %4225 = vmatpush3.msra.mxu1 %v2358_v45  ;;  %4596 = vmatprep.subr.mxu0 %v2395_v19  ;;  %v2388_v45 = vld [vmem:[#allocation3 + $0x120] sm:$0xff] }
 0x2ad   : > { %4226 = vmatprep.subr.mxu1 %v2373_v57  ;;  %4597 = vmatpush3.msra.mxu0 %v2395_v19  ;;  %v6101_v19 = vsel %vm381_vm2, %v2459_v18, %v2430_v40  ;;  %v2431_v57 = vrot.slane %v6064_v56, 7  ;;  %v2385_v40 = vld [vmem:[#allocation3 + $0x108] sm:$0xff] }
 0x2ae   : > { %2694 = vmatmul.mubr.f32.gmra.mxu1 %v6050_v33  ;;  %4598 = vmatprep.subr.mxu0 %v2394_v46 }
 0x2af   : > { %2698 = vmatprep.mubr.f32.mxu1 %v6009_v15  ;;  %4599 = vmatpush3.msra.mxu0 %v2394_v46  ;;  %v2354_v46 = vld [vmem:[#allocation3 + $0x10] sm:$0xff] }
 0x2b0   : > { %4579 = vmatprep.mubr.f32.mxu0 %v6055_v34  ;;  %4600 = vmatprep.subr.mxu0 %v2393_v27 }
 0x2b1   : > { %4227 = vmatpush3.msra.mxu1 %v2357_v35  ;;  %4601 = vmatpush3.msra.mxu0 %v2393_v27  ;;  %v2386_v27 = vld [vmem:[#allocation3 + $0x110] sm:$0xff]  ;;  %v6108_v35 = vsel %vm432_vm1, %v2510_v42, %v2511_v51  ;;  %v2368_v42 = vld [vmem:[#allocation3 + $0x80] sm:$0xff] }
 0x2b2   : > { %2699 = vmatmul.mubr.f32.gmra.mxu1 %v6060_v54  ;;  %4580 = vmatmul.mubr.f32.gmra.mxu0 %v6068_v12 }
 0x2b3   : > { %2703 = vmatprep.mubr.f32.mxu1 %v6011_v1  ;;  %4602 = vmatprep.subr.mxu0 %v2392_v31 }
 0x2b4   : > { %4228 = vmatprep.subr.mxu1 %v2372_v38  ;;  %4603 = vmatpush3.msra.mxu0 %v2392_v31  ;;  %v6110_v31 = vld [vmem:[#allocation2] sm:$0xff]  ;;  %v6112_v38 = vld [vmem:[#allocation2 + $0x38] sm:$0xff] }
 0x2b5   : > { %4229 = vmatpush3.msra.mxu1 %v2356_v25  ;;  %4604 = vmatprep.subr.mxu0 %v2391_v7  ;;  %v6116_v25 = vsel %vm381_vm2, %v2431_v57, %v2461_v48  ;;  %v2296_v18 = vrot.slane %v6110_v31, 1 }
 0x2b6   : > { %2704 = vmatmul.mubr.f32.gmra.mxu1 %v6075_v62  ;;  %4605 = vmatpush3.msra.mxu0 %v2391_v7  ;;  %v2297_v7 = vrot.slane %v6112_v38, 1 }
 0x2b7   : > { %2708 = vmatprep.mubr.f32.mxu1 %v6032_v9  ;;  %4606 = vmatprep.subr.mxu0 %v2390_v63 }
 0x2b8   : > { %4230 = vmatprep.subr.mxu1 %v2371_v44  ;;  %4607 = vmatpush3.msra.mxu0 %v2390_v63  ;;  %v2353_v63 = vld [vmem:[#allocation3 + $0x8] sm:$0xff]  ;;  %v6127_v44 = vsel %vm381_vm2, %v2461_v48, %v2431_v57  ;;  %v2344_v51 = vsel %vm432_vm1, %v2297_v7, %v2296_v18  ;;  %v3351_v57 = vld [vmem:[#allocation3 + $0x3f8] sm:$0xff] }
 0x2b9   : > { %4582 = vmatprep.mubr.f32.mxu0 %v6082_v17  ;;  %4608 = vmatprep.subr.mxu0 %v2389_v37 }
 0x2ba   : > { %2709 = vmatmul.mubr.f32.gmra.mxu1 %v6086_v41  ;;  %4609 = vmatpush3.msra.mxu0 %v2389_v37  ;;  %v2432_v37 = vrot.slane %v6090_v20, 7 }
 0x2bb   : > { %2713 = vmatprep.mubr.f32.mxu1 %v6034_v24  ;;  %4231 = vmatpush3.msra.mxu1 %v2355_v39  ;;  %v2463_v39 = vrot.slane %v6088_v10, 7 }
 0x2bc   : > { %4232 = vmatprep.subr.mxu1 %v2370_v5  ;;  %4583 = vmatmul.mubr.f32.gmra.mxu0 %v6095_v2  ;;  %v2384_v5 = vld [vmem:[#allocation3 + $0x100] sm:$0xff] }
 0x2bd   : > { %4610 = vmatprep.subr.mxu0 %v2388_v45  ;;  %4233 = vmatpush3.msra.mxu1 %v2354_v46  ;;  %v6137_v48 = vsel %vm381_vm2, %v2432_v37, %v2463_v39  ;;  %v2352_v46 = vld [vmem:[#allocation3] sm:$0xff] }
 0x2be   : > { %2714 = vmatmul.mubr.f32.gmra.mxu1 %v6101_v19  ;;  %4611 = vmatpush3.msra.mxu0 %v2388_v45  ;;  %v2298_v45 = vsel %vm432_vm1, %v2296_v18, %v2297_v7  ;;  %v6142_v18 = vsel %vm381_vm2, %v2463_v39, %v2432_v37  ;;  %v2232_v7 = vrot.slane %v6112_v38, 7  ;;  %v3332_v39 = vld [vmem:[#allocation3 + $0x360] sm:$0xff] }
 0x2bf   : > { %2718 = vmatprep.mubr.f32.mxu1 %v6062_v30  ;;  %4612 = vmatprep.subr.mxu0 %v2387_v50 }
 0x2c0   : > { %4613 = vmatpush3.msra.mxu0 %v2387_v50  ;;  %4585 = vmatprep.mubr.f32.mxu0 %v6108_v35  ;;  %v3335_v50 = vld [vmem:[#allocation3 + $0x378] sm:$0xff] }
 0x2c1   : > { %4614 = vmatprep.subr.mxu0 %v2386_v27  ;;  %4586 = vmatmul.mubr.f32.gmra.mxu0 %v6119_v60 }
 0x2c2   : > { %2719 = vmatmul.mubr.f32.gmra.mxu1 %v6116_v25  ;;  %4615 = vmatpush3.msra.mxu0 %v2386_v27  ;;  %v3350_v27 = vld [vmem:[#allocation3 + $0x3f0] sm:$0xff] }
 0x2c3   : > { %2723 = vmatprep.mubr.f32.mxu1 %v6064_v56  ;;  %4234 = vmatprep.subr.mxu1 %v2369_v6  ;;  %v3334_v6 = vld [vmem:[#allocation3 + $0x370] sm:$0xff] }
 0x2c4   : > { %4616 = vmatprep.subr.mxu0 %v2385_v40  ;;  %4235 = vmatpush3.msra.mxu1 %v2353_v63  ;;  %v2256_v63 = vrot.slane %v6110_v31, 7 }
 0x2c5   : > { %4617 = vmatpush3.msra.mxu0 %v2385_v40  ;;  %4620 = vmatprep.mubr.f32.mxu0 %v2298_v45  ;;  %v3367_v40 = vld [vmem:[#allocation3 + $0x478] sm:$0xff]  ;;  %v3333_v45 = vld [vmem:[#allocation3 + $0x368] sm:$0xff] }
 0x2c6   : > { %2724 = vmatmul.mubr.f32.gmra.mxu1 %v6127_v44  ;;  %4618 = vmatprep.subr.mxu0 %v2384_v5  ;;  %v2288_v37 = vsel %vm381_vm2, %v2232_v7, %v2256_v63 }
 0x2c7   : > { %2728 = vmatprep.mubr.f32.mxu1 %v6088_v10  ;;  %4619 = vmatpush3.msra.mxu0 %v2384_v5  ;;  %v3349_v5 = vld [vmem:[#allocation3 + $0x3e8] sm:$0xff] }
 0x2c8   : > { %4236 = vmatprep.subr.mxu1 %v2368_v42  ;;  %4621 = vmatmul.mubr.f32.vlgmr.msra.gmra.mxu0 %v2344_v51  ;;  %v3348_v42 = vld [vmem:[#allocation3 + $0x3e0] sm:$0xff]  ;;  %v3366_v51 = vld [vmem:[#allocation3 + $0x470] sm:$0xff] }
 0x2c9   : > { %4318 = vmatprep.subr.mxu0 %v3351_v57  ;;  %4237 = vmatpush3.msra.mxu1 %v2352_v46  ;;  %v3331_v57 = vld [vmem:[#allocation3 + $0x358] sm:$0xff]  ;;  %v3345_v46 = vld [vmem:[#allocation3 + $0x3c8] sm:$0xff] }
 0x2ca   : > { %2729 = vmatmul.mubr.f32.gmra.mxu1 %v6137_v48  ;;  %4319 = vmatpush3.msra.mxu0 %v3335_v50  ;;  %v3346_v50 = vld [vmem:[#allocation3 + $0x3d0] sm:$0xff] }
 0x2cb   : > { %2733 = vmatprep.mubr.f32.mxu1 %v6090_v20  ;;  %4320 = vmatprep.subr.mxu0 %v3350_v27  ;;  %v3365_v27 = vld [vmem:[#allocation3 + $0x468] sm:$0xff] }
 0x2cc   : > { %4623 = vmatprep.mubr.f32.mxu0 %v5946_v28  ;;  %4321 = vmatpush3.msra.mxu0 %v3334_v6  ;;  %v3347_v28 = vld [vmem:[#allocation3 + $0x3d8] sm:$0xff]  ;;  %v3344_v6 = vld [vmem:[#allocation3 + $0x3c0] sm:$0xff] }
 0x2cd   : > { %4644 = vmatprep.subr.mxu1 %v3367_v40  ;;  %4624 = vmatmul.mubr.f32.gmra.mxu0 %v5952_v36  ;;  %v2257_v36 = vsel %vm381_vm2, %v2256_v63, %v2232_v7  ;;  %v3343_v7 = vld [vmem:[#allocation3 + $0x3b8] sm:$0xff] }
 0x2ce   : > { %2734 = vmatmul.mubr.f32.gmra.mxu1 %v6142_v18  ;;  %4322 = vmatprep.subr.mxu0 %v3349_v5  ;;  %v3327_v63 = vld [vmem:[#allocation3 + $0x338] sm:$0xff]  ;;  %v3342_v5 = vld [vmem:[#allocation3 + $0x3b0] sm:$0xff] }
 0x2cf   : > { %2948 = vmatprep.mubr.f32.mxu1 %v6110_v31  ;;  %4323 = vmatpush3.msra.mxu0 %v3333_v45  ;;  %v3330_v31 = vld [vmem:[#allocation3 + $0x350] sm:$0xff]  ;;  %v3363_v45 = vld [vmem:[#allocation3 + $0x458] sm:$0xff] }
 0x2d0   : > { %4626 = vmatprep.mubr.f32.mxu0 %v5967_v52  ;;  %4324 = vmatprep.subr.mxu0 %v3348_v42  ;;  %v3325_v42 = vld [vmem:[#allocation3 + $0x328] sm:$0xff] }
 0x2d1   : > { %4325 = vmatpush3.msra.mxu0 %v3332_v39  ;;  %v3339_v39 = vld [vmem:[#allocation3 + $0x398] sm:$0xff] }
 0x2d2   : > { %2949 = vmatmul.mubr.f32.vlgmr.msra.gmra.mxu1 %v2288_v37  ;;  %4627 = vmatmul.mubr.f32.gmra.mxu0 %v5973_v21  ;;  %v3324_v37 = vld [vmem:[#allocation3 + $0x320] sm:$0xff] }
 0x2d3   : > { %4645 = vmatpush3.msra.mxu1 %v3367_v40  ;;  %2953 = vmatprep.mubr.f32.mxu1 %v6112_v38  ;;  %v3329_v38 = vld [vmem:[#allocation3 + $0x348] sm:$0xff]  ;;  %v3328_v40 = vld [vmem:[#allocation3 + $0x340] sm:$0xff] }
 0x2d4   : > { %4326 = vmatprep.subr.mxu0 %v3347_v28  ;;  %4646 = vmatprep.subr.mxu1 %v3366_v51  ;;  %v3362_v28 = vld [vmem:[#allocation3 + $0x450] sm:$0xff] }
 0x2d5   : > { %4327 = vmatpush3.msra.mxu0 %v3331_v57  ;;  %4647 = vmatpush3.msra.mxu1 %v3366_v51  ;;  %v3323_v51 = vld [vmem:[#allocation3 + $0x318] sm:$0xff]  ;;  %v3338_v57 = vld [vmem:[#allocation3 + $0x390] sm:$0xff] }
 0x2d6   : > { %2954 = vmatmul.mubr.f32.gmra.mxu1 %v2257_v36  ;;  %4328 = vmatprep.subr.mxu0 %v3346_v50  ;;  %v3322_v36 = vld [vmem:[#allocation3 + $0x310] sm:$0xff]  ;;  %v3337_v50 = vld [vmem:[#allocation3 + $0x388] sm:$0xff] }
 0x2d7   : > { %2958 = vmatprep.mubr.f32.mxu1 %v5929_v3  ;;  %4629 = vmatprep.mubr.f32.mxu0 %v5986_v29  ;;  %v3364_v3 = vld [vmem:[#allocation3 + $0x460] sm:$0xff] }
 0x2d8   : > { %4329 = vmatpush3.msra.mxu0 %v3330_v31  ;;  %4648 = vmatprep.subr.mxu1 %v3365_v27  ;;  %v3361_v31 = vld [vmem:[#allocation3 + $0x448] sm:$0xff] }
 0x2d9   : > { %4630 = vmatmul.mubr.f32.gmra.mxu0 %v5992_v58  ;;  %4330 = vmatprep.subr.mxu0 %v3345_v46  ;;  %v3321_v46 = vld [vmem:[#allocation3 + $0x308] sm:$0xff] }
 0x2da   : > { %2959 = vmatmul.mubr.f32.gmra.mxu1 %v5942_v32  ;;  %4331 = vmatpush3.msra.mxu0 %v3329_v38  ;;  %v3326_v32 = vld [vmem:[#allocation3 + $0x330] sm:$0xff]  ;;  %v3320_v38 = vld [vmem:[#allocation3 + $0x300] sm:$0xff] }
 0x2db   : > { %4649 = vmatpush3.msra.mxu1 %v3365_v27  ;;  %4332 = vmatprep.subr.mxu0 %v3344_v6  ;;  %v3336_v27 = vld [vmem:[#allocation3 + $0x380] sm:$0xff] }
 0x2dc   : > { %2963 = vmatprep.mubr.f32.mxu1 %v5931_v0  ;;  %4632 = vmatprep.mubr.f32.mxu0 %v6003_v16  ;;  %v3341_v0 = vld [vmem:[#allocation3 + $0x3a8] sm:$0xff]  ;;  %v3360_v6 = vld [vmem:[#allocation3 + $0x440] sm:$0xff] }
 0x2dd   : > { %4333 = vmatpush3.msra.mxu0 %v3328_v40  ;;  %4650 = vmatprep.subr.mxu1 %v3364_v3  ;;  %v3359_v40 = vld [vmem:[#allocation3 + $0x438] sm:$0xff] }
 0x2de   : > { %2964 = vmatmul.mubr.f32.gmra.mxu1 %v5959_v43  ;;  %4633 = vmatmul.mubr.f32.gmra.mxu0 %v6007_v14  ;;  %v3340_v43 = vld [vmem:[#allocation3 + $0x3a0] sm:$0xff] }
 0x2df   : > { %4334 = vmatprep.subr.mxu0 %v3343_v7  ;;  %4651 = vmatpush3.msra.mxu1 %v3364_v3  ;;  %v3358_v7 = vld [vmem:[#allocation3 + $0x430] sm:$0xff] }
 0x2e0   : > { %4335 = vmatpush3.msra.mxu0 %v3327_v63  ;;  %2968 = vmatprep.mubr.f32.mxu1 %v5937_v53 }
 0x2e1   : > { %4336 = vmatprep.subr.mxu0 %v3342_v5  ;;  %4635 = vmatprep.mubr.f32.mxu0 %v6029_v8 }
 0x2e2   : > { %4337 = vmatpush3.msra.mxu0 %v3326_v32  ;;  %2969 = vmatmul.mubr.f32.gmra.mxu1 %v5981_v55 }
 0x2e3   : > { %4636 = vmatmul.mubr.f32.gmra.mxu0 %v6041_v11  ;;  %4338 = vmatprep.subr.mxu0 %v3341_v0 }
 0x2e4   : > { %4652 = vmatprep.subr.mxu1 %v3363_v45  ;;  %4339 = vmatpush3.msra.mxu0 %v3325_v42 }
 0x2e5   : > { %4653 = vmatpush3.msra.mxu1 %v3363_v45  ;;  %4340 = vmatprep.subr.mxu0 %v3340_v43 }
 0x2e6   : > { %2973 = vmatprep.mubr.f32.mxu1 %v5939_v4  ;;  %4638 = vmatprep.mubr.f32.mxu0 %v6055_v34 }
 0x2e7   : > { %4341 = vmatpush3.msra.mxu0 %v3324_v37  ;;  %2974 = vmatmul.mubr.f32.gmra.mxu1 %v5996_v13 }
 0x2e8   : > { %4639 = vmatmul.mubr.f32.gmra.mxu0 %v6068_v12  ;;  %4342 = vmatprep.subr.mxu0 %v3339_v39 }
 0x2e9   : > { %4654 = vmatprep.subr.mxu1 %v3362_v28  ;;  %4343 = vmatpush3.msra.mxu0 %v3323_v51 }
 0x2ea   : > { %4655 = vmatpush3.msra.mxu1 %v3362_v28  ;;  %4344 = vmatprep.subr.mxu0 %v3338_v57 }
 0x2eb   : > { %2978 = vmatprep.mubr.f32.mxu1 %v5954_v47  ;;  %4641 = vmatprep.mubr.f32.mxu0 %v6082_v17 }
 0x2ec   : > { %4345 = vmatpush3.msra.mxu0 %v3322_v36  ;;  %2979 = vmatmul.mubr.f32.gmra.mxu1 %v6015_v61 }
 0x2ed   : > { %4642 = vmatmul.mubr.f32.gmra.mxu0 %v6095_v2  ;;  %4346 = vmatprep.subr.mxu0 %v3337_v50 }
 0x2ee   : > { %4656 = vmatprep.subr.mxu1 %v3361_v31  ;;  %4347 = vmatpush3.msra.mxu0 %v3321_v46 }
 0x2ef   : > { %4657 = vmatpush3.msra.mxu1 %v3361_v31  ;;  %4348 = vmatprep.subr.mxu0 %v3336_v27 }
 0x2f0   : > { %2983 = vmatprep.mubr.f32.mxu1 %v5956_v22  ;;  %4349 = vmatpush3.msra.mxu0 %v3320_v38 }
 0x2f1   : > { %3432 = vmatprep.mubr.f32.mxu0 %v5937_v53  ;;  %2984 = vmatmul.mubr.f32.gmra.mxu1 %v6024_v59  ;;  %v3357_v53 = vld [vmem:[#allocation3 + $0x428] sm:$0xff] }
 0x2f2   : > { %3433 = vmatmul.mubr.f32.vlgmr.msra.gmra.mxu0 %v5981_v55  ;;  %4658 = vmatprep.subr.mxu1 %v3360_v6 }
 0x2f3   : > { %2988 = vmatprep.mubr.f32.mxu1 %v5975_v49  ;;  %4659 = vmatpush3.msra.mxu1 %v3360_v6 }
 0x2f4   : > { %3437 = vmatprep.mubr.f32.mxu0 %v5939_v4  ;;  %4660 = vmatprep.subr.mxu1 %v3359_v40  ;;  %v3356_v4 = vld [vmem:[#allocation3 + $0x420] sm:$0xff] }
 0x2f5   : > { %2989 = vmatmul.mubr.f32.gmra.mxu1 %v6038_v23 }
 0x2f6   : > { %3438 = vmatmul.mubr.f32.gmra.mxu0 %v5996_v13  ;;  %4661 = vmatpush3.msra.mxu1 %v3359_v40 }
 0x2f7   : > { %2993 = vmatprep.mubr.f32.mxu1 %v5977_v26  ;;  %3442 = vmatprep.mubr.f32.mxu0 %v5954_v47  ;;  %v3355_v47 = vld [vmem:[#allocation3 + $0x418] sm:$0xff] }
 0x2f8   : > { %4662 = vmatprep.subr.mxu1 %v3358_v7 }
 0x2f9   : > { %4663 = vmatpush3.msra.mxu1 %v3358_v7 }
 0x2fa   : > { %2994 = vmatmul.mubr.f32.gmra.mxu1 %v6050_v33  ;;  %3443 = vmatmul.mubr.f32.gmra.mxu0 %v6015_v61 }
 0x2fb   : > { %2998 = vmatprep.mubr.f32.mxu1 %v6009_v15  ;;  %3447 = vmatprep.mubr.f32.mxu0 %v5956_v22  ;;  %v3354_v22 = vld [vmem:[#allocation3 + $0x410] sm:$0xff] }
 0x2fc   : > { %4664 = vmatprep.subr.mxu1 %v3357_v53 }
 0x2fd   : > { %4665 = vmatpush3.msra.mxu1 %v3357_v53 }
 0x2fe   : > { %2999 = vmatmul.mubr.f32.gmra.mxu1 %v6060_v54  ;;  %3448 = vmatmul.mubr.f32.gmra.mxu0 %v6024_v59 }
 0x2ff   : > { %3003 = vmatprep.mubr.f32.mxu1 %v6011_v1  ;;  %3452 = vmatprep.mubr.f32.mxu0 %v5975_v49  ;;  %v3353_v49 = vld [vmem:[#allocation3 + $0x408] sm:$0xff] }
 0x300   : > { %4666 = vmatprep.subr.mxu1 %v3356_v4 }
 0x301   : > { %4667 = vmatpush3.msra.mxu1 %v3356_v4 }
 0x302   : > { %3004 = vmatmul.mubr.f32.gmra.mxu1 %v6075_v62  ;;  %3453 = vmatmul.mubr.f32.gmra.mxu0 %v6038_v23 }
 0x303   : > { %3008 = vmatprep.mubr.f32.mxu1 %v6032_v9  ;;  %3457 = vmatprep.mubr.f32.mxu0 %v5977_v26  ;;  %v3352_v26 = vld [vmem:[#allocation3 + $0x400] sm:$0xff] }
 0x304   : > { %4668 = vmatprep.subr.mxu1 %v3355_v47 }
 0x305   : > { %4669 = vmatpush3.msra.mxu1 %v3355_v47 }
 0x306   : > { %3009 = vmatmul.mubr.f32.gmra.mxu1 %v6086_v41  ;;  %3458 = vmatmul.mubr.f32.gmra.mxu0 %v6050_v33 }
 0x307   : > { %3013 = vmatprep.mubr.f32.mxu1 %v6034_v24  ;;  %3462 = vmatprep.mubr.f32.mxu0 %v6009_v15 }
 0x308   : > { %4670 = vmatprep.subr.mxu1 %v3354_v22 }
 0x309   : > { %4671 = vmatpush3.msra.mxu1 %v3354_v22 }
 0x30a   : > { %3014 = vmatmul.mubr.f32.gmra.mxu1 %v6101_v19  ;;  %3463 = vmatmul.mubr.f32.gmra.mxu0 %v6060_v54 }
 0x30b   : > { %3018 = vmatprep.mubr.f32.mxu1 %v6062_v30  ;;  %3467 = vmatprep.mubr.f32.mxu0 %v6011_v1 }
 0x30c   : > { %4672 = vmatprep.subr.mxu1 %v3353_v49 }
 0x30d   : > { %4673 = vmatpush3.msra.mxu1 %v3353_v49 }
 0x30e   : > { %3019 = vmatmul.mubr.f32.gmra.mxu1 %v6116_v25  ;;  %3468 = vmatmul.mubr.f32.gmra.mxu0 %v6075_v62 }
 0x30f   : > { %3023 = vmatprep.mubr.f32.mxu1 %v6064_v56  ;;  %3472 = vmatprep.mubr.f32.mxu0 %v6032_v9 }
 0x310   : > { %4674 = vmatprep.subr.mxu1 %v3352_v26 }
 0x311   : > { %4675 = vmatpush3.msra.mxu1 %v3352_v26 }
 0x312   : > { %3024 = vmatmul.mubr.f32.gmra.mxu1 %v6127_v44  ;;  %3473 = vmatmul.mubr.f32.gmra.mxu0 %v6086_v41 }
 0x313   : > { %3477 = vmatprep.mubr.f32.mxu0 %v6034_v24  ;;  %4676 = vmatprep.mubr.f32.mxu1 %v5967_v52  ;;  %v3189_v52 = vld [vmem:[#allocation2 + $0x70] sm:$0xff] }
 0x314   : > { %v3284_v13 = vrot.slane %v3189_v52, 1 }
 0x316   : > { %3478 = vmatmul.mubr.f32.gmra.mxu0 %v6101_v19  ;;  %4677 = vmatmul.mubr.f32.vlgmr.msra.gmra.mxu1 %v5973_v21  ;;  %v3190_v21 = vld [vmem:[#allocation2 + $0x90] sm:$0xff] }
 0x317   : > { %3482 = vmatprep.mubr.f32.mxu0 %v6062_v30  ;;  %4679 = vmatprep.mubr.f32.mxu1 %v5986_v29  ;;  %v3206_v55 = vrot.slane %v3190_v21, 7  ;;  %v3237_v29 = vrot.slane %v3189_v52, 7 }
 0x31a   : > { %3483 = vmatmul.mubr.f32.gmra.mxu0 %v6116_v25  ;;  %4680 = vmatmul.mubr.f32.gmra.mxu1 %v5992_v58  ;;  %v3262_v58 = vsel %vm381_vm2, %v3206_v55, %v3237_v29 }
 0x31b   : > { %3487 = vmatprep.mubr.f32.mxu0 %v6064_v56  ;;  %4682 = vmatprep.mubr.f32.mxu1 %v6003_v16  ;;  %v3285_v16 = vrot.slane %v3190_v21, 1 }
 0x31d   : > { %v3286_v15 = vsel %vm432_vm1, %v3284_v13, %v3285_v16  ;;  %v3318_v1 = vsel %vm432_vm1, %v3285_v16, %v3284_v13 }
 0x31e   : > { %3488 = vmatmul.mubr.f32.gmra.mxu0 %v6127_v44  ;;  %4683 = vmatmul.mubr.f32.gmra.mxu1 %v6007_v14  ;;  %v3238_v14 = vsel %vm381_vm2, %v3237_v29, %v3206_v55 }
 0x31f   : > { %3492 = vmatprep.mubr.f32.mxu0 %v6088_v10  ;;  %4685 = vmatprep.mubr.f32.mxu1 %v6029_v8 }
 0x322   : > { %3493 = vmatmul.mubr.f32.gmra.mxu0 %v6137_v48  ;;  %4686 = vmatmul.mubr.f32.gmra.mxu1 %v6041_v11 }
 0x323   : > { %3497 = vmatprep.mubr.f32.mxu0 %v6090_v20  ;;  %4688 = vmatprep.mubr.f32.mxu1 %v6055_v34 }
 0x326   : > { %3498 = vmatmul.mubr.f32.gmra.mxu0 %v6142_v18  ;;  %4689 = vmatmul.mubr.f32.gmra.mxu1 %v6068_v12 }
 0x327   : > { %3502 = vmatprep.mubr.f32.mxu0 %v3189_v52  ;;  %4691 = vmatprep.mubr.f32.mxu1 %v6082_v17 }
 0x32a   : > { %3503 = vmatmul.mubr.f32.gmra.mxu0 %v3262_v58  ;;  %4692 = vmatmul.mubr.f32.gmra.mxu1 %v6095_v2 }
 0x32b   : > { %3507 = vmatprep.mubr.f32.mxu0 %v3190_v21  ;;  %4694 = vmatprep.mubr.f32.mxu1 %v6108_v35 }
 0x32e   : > { %3508 = vmatmul.mubr.f32.gmra.mxu0 %v3238_v14  ;;  %4695 = vmatmul.mubr.f32.gmra.mxu1 %v6119_v60 }
 0x32f   : > { %4697 = vmatprep.mubr.f32.mxu1 %v3286_v15 }
 0x332   : > { %4698 = vmatmul.mubr.f32.gmra.mxu1 %v3318_v1 }
 0x351   : > { %v4126_v61 = vpop.f32.mrf.mxu1 }
 0x353   : > { %v4127_v59 = vpop.f32.mrf.mxu1 }
 0x354   : > { %v4128_v8 = vadd.f32 %v4127_v59, %v4126_v61  ;;  %v4566_v9 = vpop.f32.mrf.mxu0 }
 0x356   : > { %v4129_v24 = vpop.f32.mrf.mxu1  ;;  %v2805_v23 = vpop.f32.mrf.mxu0 }
 0x357   : > { %v6239_v11 = vadd.f32 %v4128_v8, %v2805_v23 }
 0x358   : > { %v4130_v33 = vpop.f32.mrf.mxu1  ;;  %v4569_v54 = vpop.f32.mrf.mxu0 }
 0x359   : > { %v4131_v34 = vadd.f32 %v4130_v33, %v4129_v24 }
 0x35a   : > { %v4132_v30 = vpop.f32.mrf.mxu1  ;;  %v2815_v62 = vpop.f32.mrf.mxu0 }
 0x35b   : > { %v6241_v56 = vadd.f32 %v4566_v9, %v4131_v34 }
 0x35c   : > { %v4133_v12 = vpop.f32.mrf.mxu1  ;;  %v4572_v2 = vpop.f32.mrf.mxu0 }
 0x35d   : > { %v4134_v17 = vadd.f32 %v4133_v12, %v4132_v30 }
 0x35e   : > { %v4135_v41 = vpop.f32.mrf.mxu1  ;;  %v2825_v44 = vpop.f32.mrf.mxu0 }
 0x35f   : > { %v6243_v10 = vadd.f32 %v4134_v17, %v2815_v62 }
 0x360   : > { %v4136_v20 = vpop.f32.mrf.mxu1  ;;  %v4575_v5 = vpop.f32.mrf.mxu0 }
 0x361   : > { %v4137_v19 = vadd.f32 %v4136_v20, %v4135_v41 }
 0x362   : > { %v4138_v35 = vpop.f32.mrf.mxu1  ;;  %v2835_v43 = vpop.f32.mrf.mxu0 }
 0x363   : > { %v6245_v25 = vadd.f32 %v4569_v54, %v4137_v19 }
 0x364   : > { %v4139_v60 = vpop.f32.mrf.mxu1 }
 0x365   : > { %v4140_v48 = vadd.f32 %v4139_v60, %v4138_v35 }
 0x366   : > { %v4141_v18 = vpop.f32.mrf.mxu1 }
 0x367   : > { %v6247_v3 = vadd.f32 %v4140_v48, %v2825_v44 }
 0x368   : > { %v4142_v63 = vpop.f32.mrf.mxu1 }
 0x369   : > { %v4143_v32 = vadd.f32 %v4142_v63, %v4141_v18  ;;  %v4578_v57 = vpop.f32.mrf.mxu0 }
 0x36a   : > { %v4144_v0 = vpop.f32.mrf.mxu1 }
 0x36b   : > { %v6249_v45 = vadd.f32 %v4572_v2, %v4143_v32  ;;  %v2845_v27 = vpop.f32.mrf.mxu0 }
 0x36c   : > { %v4145_v42 = vpop.f32.mrf.mxu1 }
 0x36d   : > { %v4146_v37 = vadd.f32 %v4145_v42, %v4144_v0 }
 0x36e   : > { %v4147_v39 = vpop.f32.mrf.mxu1 }
 0x36f   : > { %v6251_v28 = vadd.f32 %v4146_v37, %v2835_v43 }
 0x370   : > { %v4148_v51 = vpop.f32.mrf.mxu1 }
 0x371   : > { %v4149_v36 = vadd.f32 %v4148_v51, %v4147_v39 }
 0x372   : > { %v4150_v50 = vpop.f32.mrf.mxu1  ;;  %v4581_v7 = vpop.f32.mrf.mxu0 }
 0x373   : > { %v6253_v31 = vadd.f32 %v4575_v5, %v4149_v36 }
 0x374   : > { %v4151_v46 = vpop.f32.mrf.mxu1  ;;  %v2855_v49 = vpop.f32.mrf.mxu0 }
 0x375   : > { %v4152_v38 = vadd.f32 %v4151_v46, %v4150_v50 }
 0x376   : > { %v4153_v6 = vpop.f32.mrf.mxu1 }
 0x377   : > { %v6255_v40 = vadd.f32 %v4152_v38, %v2845_v27 }
 0x378   : > { %v4154_v53 = vpop.f32.mrf.mxu1 }
 0x379   : > { %v4155_v4 = vadd.f32 %v4154_v53, %v4153_v6 }
 0x37a   : > { %v4156_v47 = vpop.f32.mrf.mxu1 }
 0x37b   : > { %v6257_v22 = vadd.f32 %v4578_v57, %v4155_v4 }
 0x37c   : > { %v4157_v26 = vpop.f32.mrf.mxu1  ;;  %v4584_v21 = vpop.f32.mrf.mxu0 }
 0x37d   : > { %v4158_v52 = vadd.f32 %v4157_v26, %v4156_v47 }
 0x37e   : > { %v4159_v55 = vpop.f32.mrf.mxu1  ;;  %v2865_v16 = vpop.f32.mrf.mxu0 }
 0x37f   : > { %v6259_v29 = vadd.f32 %v4158_v52, %v2855_v49 }
 0x380   : > { %v4160_v58 = vpop.f32.mrf.mxu1 }
 0x381   : > { %v4161_v13 = vadd.f32 %v4160_v58, %v4159_v55  ;;  %v4587_v1 = vpop.f32.mrf.mxu0 }
 0x382   : > { %v4162_v14 = vpop.f32.mrf.mxu1 }
 0x383   : > { %v6261_v15 = vadd.f32 %v4581_v7, %v4161_v13  ;;  %v2875_v8 = vpop.f32.mrf.mxu0 }
 0x384   : > { %v4163_v61 = vpop.f32.mrf.mxu1 }
 0x385   : > { %v4164_v59 = vadd.f32 %v4163_v61, %v4162_v14 }
 0x386   : > { %v4165_v9 = vpop.f32.mrf.mxu1 }
 0x387   : > { %v6263_v24 = vadd.f32 %v4164_v59, %v2865_v16 }
 0x388   : > { %v4166_v23 = vpop.f32.mrf.mxu1  ;;  %v4622_v34 = vpop.f32.mrf.mxu0 }
 0x389   : > { %v4167_v33 = vadd.f32 %v4166_v23, %v4165_v9 }
 0x38a   : > { %v4168_v54 = vpop.f32.mrf.mxu1  ;;  %v3095_v12 = vpop.f32.mrf.mxu0 }
 0x38b   : > { %v6265_v30 = vadd.f32 %v4584_v21, %v4167_v33 }
 0x38c   : > { %v4169_v62 = vpop.f32.mrf.mxu1 }
 0x38d   : > { %v4170_v17 = vadd.f32 %v4169_v62, %v4168_v54  ;;  %v4625_v20 = vpop.f32.mrf.mxu0 }
 0x38e   : > { %v4171_v41 = vpop.f32.mrf.mxu1 }
 0x38f   : > { %v6267_v2 = vadd.f32 %v4170_v17, %v2875_v8  ;;  %v3105_v35 = vpop.f32.mrf.mxu0 }
 0x390   : > { %v4172_v19 = vpop.f32.mrf.mxu1 }
 0x391   : > { %v4173_v60 = vadd.f32 %v4172_v19, %v4171_v41 }
 0x392   : > { %v4238_v44 = vpop.f32.mrf.mxu1  ;;  %v4628_v63 = vpop.f32.mrf.mxu0 }
 0x393   : > { %v6269_v48 = vadd.f32 %v4587_v1, %v4173_v60 }
 0x394   : > { %v4239_v18 = vpop.f32.mrf.mxu1  ;;  %v3115_v0 = vpop.f32.mrf.mxu0 }
 0x395   : > { %v4240_v5 = vadd.f32 %v4239_v18, %v4238_v44 }
 0x396   : > { %v4241_v32 = vpop.f32.mrf.mxu1 }
 0x397   : > { %v2951_v42 = vadd.f32 %v4240_v5, %v6239_v11 }
 0x398   : > { %v4242_v43 = vpop.f32.mrf.mxu1 }
 0x399   : > { %v4243_v37 = vadd.f32 %v4242_v43, %v4241_v32  ;;  %v4631_v39 = vpop.f32.mrf.mxu0  ;;  %v6272_v51 = vadd.f32 %v3095_v12, %v2951_v42 }
 0x39a   : > { %v4244_v57 = vpop.f32.mrf.mxu1 }
 0x39b   : > { %v2956_v36 = vadd.f32 %v4243_v37, %v6241_v56  ;;  %v3125_v50 = vpop.f32.mrf.mxu0 }
 0x39c   : > { %v4245_v46 = vpop.f32.mrf.mxu1 }
 0x39d   : > { %v4246_v27 = vadd.f32 %v4245_v46, %v4244_v57  ;;  %v6275_v38 = vadd.f32 %v4622_v34, %v2956_v36 }
 0x39e   : > { %v4247_v6 = vpop.f32.mrf.mxu1  ;;  %v4634_v7 = vpop.f32.mrf.mxu0 }
 0x39f   : > { %v2961_v53 = vadd.f32 %v4246_v27, %v6243_v10 }
 0x3a0   : > { %v4248_v4 = vpop.f32.mrf.mxu1  ;;  %v3135_v47 = vpop.f32.mrf.mxu0 }
 0x3a1   : > { %v4249_v11 = vadd.f32 %v4248_v4, %v4247_v6  ;;  %v6278_v49 = vadd.f32 %v3105_v35, %v2961_v53 }
 0x3a2   : > { %v4250_v52 = vpop.f32.mrf.mxu1 }
 0x3a3   : > { %v2966_v26 = vadd.f32 %v4249_v11, %v6245_v25  ;;  %v4637_v21 = vpop.f32.mrf.mxu0 }
 0x3a4   : > { %v4251_v55 = vpop.f32.mrf.mxu1 }
 0x3a5   : > { %v3145_v56 = vpop.f32.mrf.mxu0  ;;  %v6281_v58 = vadd.f32 %v4625_v20, %v2966_v26  ;;  %v4252_v13 = vadd.f32 %v4251_v55, %v4250_v52 }
 0x3a7   : > { %v2971_v16 = vadd.f32 %v4252_v13, %v6247_v3  ;;  %v4253_v14 = vpop.f32.mrf.mxu1 }
 0x3a8   : > { %v6284_v1 = vpop.f32.mrf.mxu0 }
 0x3a9   : > { %v4254_v10 = vpop.f32.mrf.mxu1  ;;  %v6286_v59 = vadd.f32 %v3115_v0, %v2971_v16 }
 0x3aa   : > { %v3155_v61 = vpop.f32.mrf.mxu0  ;;  %v4255_v8 = vadd.f32 %v4254_v10, %v4253_v14 }
 0x3ac   : > { %v2976_v9 = vadd.f32 %v4255_v8, %v6249_v45  ;;  %v4256_v25 = vpop.f32.mrf.mxu1 }
 0x3ad   : > { %v6289_v23 = vpop.f32.mrf.mxu0 }
 0x3ae   : > { %v4257_v33 = vpop.f32.mrf.mxu1  ;;  %v6293_v54 = vadd.f32 %v4628_v63, %v2976_v9 }
 0x3af   : > { %v6291_v34 = vpop.f32.mrf.mxu0  ;;  %v4258_v12 = vadd.f32 %v4257_v33, %v4256_v25 }
 0x3b1   : > { %v2981_v3 = vadd.f32 %v4258_v12, %v6251_v28  ;;  %v4259_v62 = vpop.f32.mrf.mxu1 }
 0x3b2   : > { %v6296_v17 = vpop.f32.mrf.mxu0 }
 0x3b3   : > { %v4260_v41 = vpop.f32.mrf.mxu1  ;;  %v6298_v19 = vadd.f32 %v3125_v50, %v2981_v3 }
 0x3b4   : > { %v4351_v20 = vpop.f32.mrf.mxu0  ;;  %v4261_v35 = vadd.f32 %v4260_v41, %v4259_v62 }
 0x3b5   : > { %v4262_v45 = vpop.f32.mrf.mxu1 }
 0x3b6   : > { %v4353_v60 = vpop.f32.mrf.mxu0  ;;  %v2986_v44 = vadd.f32 %v4261_v35, %v6253_v31 }
 0x3b7   : > { %v4263_v18 = vpop.f32.mrf.mxu1 }
 0x3b8   : > { %v4354_v5 = vpop.f32.mrf.mxu0  ;;  %v4264_v32 = vadd.f32 %v4263_v18, %v4262_v45  ;;  %v6301_v63 = vadd.f32 %v4631_v39, %v2986_v44 }
 0x3ba   : > { %v4265_v0 = vpop.f32.mrf.mxu1  ;;  %v6303_v42 = vpop.f32.mrf.mxu0  ;;  %v2991_v28 = vadd.f32 %v4264_v32, %v6255_v40 }
 0x3bc   : > { %v4266_v43 = vpop.f32.mrf.mxu1  ;;  %v6306_v37 = vpop.f32.mrf.mxu0  ;;  %v6308_v36 = vadd.f32 %v3135_v47, %v2991_v28 }
 0x3bd   : > { %v4267_v57 = vadd.f32 %v4266_v43, %v4265_v0  ;;  %v4355_v43 = vadd.f32 %v4354_v5, %v4353_v60 }
 0x3be   : > { %v4268_v50 = vpop.f32.mrf.mxu1  ;;  %v4359_v46 = vpop.f32.mrf.mxu0 }
 0x3bf   : > { %v2996_v31 = vadd.f32 %v4267_v57, %v6257_v22 }
 0x3c0   : > { %v4269_v27 = vpop.f32.mrf.mxu1  ;;  %v4360_v6 = vpop.f32.mrf.mxu0 }
 0x3c1   : > { %v4270_v53 = vadd.f32 %v4269_v27, %v4268_v50  ;;  %v6311_v39 = vadd.f32 %v4634_v7, %v2996_v31 }
 0x3c2   : > { %v4271_v4 = vpop.f32.mrf.mxu1  ;;  %v6313_v11 = vpop.f32.mrf.mxu0 }
 0x3c3   : > { %v3001_v40 = vadd.f32 %v4270_v53, %v6259_v29 }
 0x3c4   : > { %v4272_v26 = vpop.f32.mrf.mxu1  ;;  %v6316_v52 = vpop.f32.mrf.mxu0 }
 0x3c5   : > { %v4273_v55 = vadd.f32 %v4272_v26, %v4271_v4  ;;  %v6318_v47 = vadd.f32 %v3145_v56, %v3001_v40  ;;  %v4361_v40 = vadd.f32 %v4360_v6, %v4359_v46  ;;  %v4358_v46 = vadd.f32 %v6306_v37, %v6303_v42 }
 0x3c6   : > { %v4274_v13 = vpop.f32.mrf.mxu1  ;;  %v4365_v16 = vpop.f32.mrf.mxu0  ;;  %v4364_v42 = vadd.f32 %v6316_v52, %v6313_v11 }
 0x3c7   : > { %v3006_v22 = vadd.f32 %v4273_v55, %v6261_v15 }
 0x3c8   : > { %v4275_v14 = vpop.f32.mrf.mxu1  ;;  %v4366_v10 = vpop.f32.mrf.mxu0 }
 0x3c9   : > { %v4276_v8 = vadd.f32 %v4275_v14, %v4274_v13  ;;  %v6321_v7 = vadd.f32 %v4637_v21, %v3006_v22 }
 0x3ca   : > { %v4277_v9 = vpop.f32.mrf.mxu1  ;;  %v6323_v25 = vpop.f32.mrf.mxu0 }
 0x3cb   : > { %v3011_v29 = vadd.f32 %v4276_v8, %v6263_v24  ;;  %v4367_v8 = vadd.f32 %v4366_v10, %v4365_v16 }
 0x3cc   : > { %v4278_v33 = vpop.f32.mrf.mxu1  ;;  %v4369_v12 = vpop.f32.mrf.mxu0 }
 0x3cd   : > { %v4279_v3 = vadd.f32 %v4278_v33, %v4277_v9  ;;  %v6326_v62 = vadd.f32 %v3155_v61, %v3011_v29 }
 0x3ce   : > { %v4280_v56 = vpop.f32.mrf.mxu1  ;;  %v4371_v41 = vpop.f32.mrf.mxu0 }
 0x3cf   : > { %v3016_v35 = vadd.f32 %v4279_v3, %v6265_v30  ;;  %v4352_v30 = vadd.f32 %v4351_v20, %v6296_v17  ;;  %v6350_v17 = vld [vmem:[%s6490_s6] ss:$0 sm:$0xff] }
 0x3d0   : > { %v4281_v15 = vpop.f32.mrf.mxu1  ;;  %v4372_v45 = vpop.f32.mrf.mxu0 }
 0x3d1   : > { %v4282_v44 = vadd.f32 %v4281_v15, %v4280_v56  ;;  %v6330_v21 = vadd.f32 %v6284_v1, %v3016_v35  ;;  %v6341_v1 = vld [vmem:[%s6489_s5] ss:$0 sm:$0xff]  ;;  %v4373_v37 = vadd.f32 %v4372_v45, %v4371_v41 }
 0x3d2   : > { %v4283_v18 = vpop.f32.mrf.mxu1  ;;  %v4374_v32 = vpop.f32.mrf.mxu0 }
 0x3d3   : > { %v3021_v0 = vadd.f32 %v4282_v44, %v6267_v2 }
 0x3d4   : > { %v4284_v24 = vpop.f32.mrf.mxu1  ;;  %v4375_v28 = vpop.f32.mrf.mxu0 }
 0x3d5   : > { %v4285_v57 = vadd.f32 %v4284_v24, %v4283_v18  ;;  %v6334_v61 = vadd.f32 %v6291_v34, %v3021_v0  ;;  %v4370_v0 = vadd.f32 %v4369_v12, %v6323_v25 }
 0x3d6   : > { %v4377_v50 = vpop.f32.mrf.mxu0  ;;  %v4678_v31 = vpop.f32.mrf.mxu1 }
 0x3d7   : > { %v3026_v27 = vadd.f32 %v4285_v57, %v6269_v48  ;;  %v3585_v53 = vadd.f32 %v4678_v31, %v4355_v43  ;;  %v4376_v31 = vadd.f32 %v4375_v28, %v4374_v32 }
 0x3d8   : > { %v4378_v2 = vpop.f32.mrf.mxu0  ;;  %v3579_v4 = vpop.f32.mrf.mxu1 }
 0x3d9   : > { %v3659_v60 = vadd.f32 %v3585_v53, %v6275_v38  ;;  %v3580_v5 = vadd.f32 %v4352_v30, %v3579_v4  ;;  %v6345_v34 = vadd.f32 %v6289_v23, %v3026_v27  ;;  %v4379_v4 = vadd.f32 %v4378_v2, %v4377_v50 }
 0x3da   : > { %v4380_v48 = vpop.f32.mrf.mxu0  ;;  %v4681_v20 = vpop.f32.mrf.mxu1 }
 0x3db   : > { %v3682_v26 = vmul.f32 %v6341_v1, %v3659_v60  ;;  %v3658_v55 = vadd.f32 %v3580_v5, %v6272_v51  ;;  %v3595_v13 = vadd.f32 %v4681_v20, %v4361_v40 }
 0x3dc   : > { %v4381_v38 = vpop.f32.mrf.mxu0  ;;  %v3589_v6 = vpop.f32.mrf.mxu1 }
 0x3dd   : > { %v3705_v23 = vadd.f32 %v6350_v17, %v3682_v26  ;;  %v3681_v22 = vmul.f32 %v6341_v1, %v3658_v55  ;;  %v3661_v14 = vadd.f32 %v3595_v13, %v6281_v58  ;;  %v3590_v9 = vadd.f32 %v4358_v46, %v3589_v6 }
 0x3de   : > { %v4383_v29 = vpop.f32.mrf.mxu0  ;;  %v4684_v33 = vpop.f32.mrf.mxu1  ;;  %v4382_v55 = vadd.f32 %v4381_v38, %v4380_v48 }
 0x3df   : > { %vm3721_vm1 = vcmp.ge.f32.partialorder %v3705_v23, 0.0  ;;  %v3737_v3 = vmul.f32 0.01, %v3705_v23  ;;  %v3704_v51 = vadd.f32 %v6350_v17, %v3681_v22  ;;  %v3684_v56 = vmul.f32 %v6341_v1, %v3661_v14 }
 0x3e0   : > { %v3660_v35 = vadd.f32 %v3590_v9, %v6278_v49  ;;  %v3605_v15 = vadd.f32 %v4684_v33, %v4367_v8  ;;  %v4384_v44 = vpop.f32.mrf.mxu0  ;;  %v3599_v58 = vpop.f32.mrf.mxu1 }
 0x3e1   : > { %v3753_v16 = vsel %vm3721_vm1, %v3705_v23, %v3737_v3  ;;  %vm3720_vm2 = vcmp.ge.f32.partialorder %v3704_v51, 0.0  ;;  %v3736_v10 = vmul.f32 0.01, %v3704_v51  ;;  %v3707_v18 = vadd.f32 %v6350_v17, %v3684_v56 }
 0x3e2   : > { %3769 = vst [vmem:[%s5925_s14 + $0x8] sm:$0xff] %v3753_v16  ;;  %v3683_v24 = vmul.f32 %v6341_v1, %v3660_v35  ;;  %v3663_v43 = vadd.f32 %v3605_v15, %v6293_v54  ;;  %v3600_v11 = vadd.f32 %v4364_v42, %v3599_v58  ;;  %v4386_v52 = vpop.f32.mrf.mxu0  ;;  %v4687_v41 = vpop.f32.mrf.mxu1  ;;  %v4385_v22 = vadd.f32 %v4384_v44, %v4383_v29 }
 0x3e3   : > { %v3752_v49 = vsel %vm3720_vm2, %v3704_v51, %v3736_v10  ;;  %vm3723_vm12 = vcmp.ge.f32.partialorder %v3707_v18, 0.0  ;;  %v3739_v45 = vmul.f32 0.01, %v3707_v18  ;;  %v3615_v57 = vadd.f32 %v4687_v41, %v4373_v37 }
 0x3e4   : > { %3768 = vst [vmem:[%s5925_s14] sm:$0xff] %v3752_v49  ;;  %v3706_v30 = vadd.f32 %v6350_v17, %v3683_v24  ;;  %v3686_v27 = vmul.f32 %v6341_v1, %v3663_v43  ;;  %v3662_v25 = vadd.f32 %v3600_v11, %v6286_v59  ;;  %v4387_v12 = vpop.f32.mrf.mxu0  ;;  %v3609_v53 = vpop.f32.mrf.mxu1 }
 0x3e5   : > { %v3755_v54 = vsel %vm3723_vm12, %v3707_v18, %v3739_v45  ;;  %v3665_v40 = vadd.f32 %v3615_v57, %v6301_v63  ;;  %v3610_v60 = vadd.f32 %v4370_v0, %v3609_v53  ;;  %v4388_v18 = vadd.f32 %v4387_v12, %v4386_v52 }
 0x3e6   : > { %3771 = vst [vmem:[%s5925_s14 + $0x18] sm:$0xff] %v3755_v54  ;;  %vm3722_vm13 = vcmp.ge.f32.partialorder %v3706_v30, 0.0  ;;  %v3738_v5 = vmul.f32 0.01, %v3706_v30  ;;  %v3709_v32 = vadd.f32 %v6350_v17, %v3686_v27  ;;  %v3685_v28 = vmul.f32 %v6341_v1, %v3662_v25  ;;  %v4389_v20 = vpop.f32.mrf.mxu0  ;;  %v4690_v26 = vpop.f32.mrf.mxu1 }
 0x3e7   : > { %v3688_v59 = vmul.f32 %v6341_v1, %v3665_v40  ;;  %v3664_v13 = vadd.f32 %v3610_v60, %v6298_v19  ;;  %v3625_v50 = vadd.f32 %v4690_v26, %v4379_v4 }
 0x3e8   : > { %v3754_v2 = vsel %vm3722_vm13, %v3706_v30, %v3738_v5  ;;  %vm3725_vm14 = vcmp.ge.f32.partialorder %v3709_v32, 0.0  ;;  %v3741_v63 = vmul.f32 0.01, %v3709_v32  ;;  %v3708_v46 = vadd.f32 %v6350_v17, %v3685_v28  ;;  %v4390_v6 = vpop.f32.mrf.mxu0  ;;  %v3619_v23 = vpop.f32.mrf.mxu1 }
 0x3e9   : > { %3770 = vst [vmem:[%s5925_s14 + $0x10] sm:$0xff] %v3754_v2  ;;  %v3711_v14 = vadd.f32 %v6350_v17, %v3688_v59  ;;  %v3687_v8 = vmul.f32 %v6341_v1, %v3664_v13  ;;  %v3667_v48 = vadd.f32 %v3625_v50, %v6311_v39  ;;  %v3620_v9 = vadd.f32 %v4376_v31, %v3619_v23 }
 0x3ea   : > { %v3757_v38 = vsel %vm3725_vm14, %v3709_v32, %v3741_v63  ;;  %vm3724_vm15 = vcmp.ge.f32.partialorder %v3708_v46, 0.0  ;;  %v3740_v19 = vmul.f32 0.01, %v3708_v46  ;;  %v4392_v33 = vpop.f32.mrf.mxu0  ;;  %v4693_v3 = vpop.f32.mrf.mxu1  ;;  %v4391_v37 = vadd.f32 %v4390_v6, %v4389_v20 }
 0x3eb   : > { %3773 = vst [vmem:[%s5925_s14 + $0x28] sm:$0xff] %v3757_v38  ;;  %vm3727_vm0 = vcmp.ge.f32.partialorder %v3711_v14, 0.0  ;;  %v3743_v51 = vmul.f32 0.01, %v3711_v14  ;;  %v3710_v56 = vadd.f32 %v6350_v17, %v3687_v8  ;;  %v3690_v29 = vmul.f32 %v6341_v1, %v3667_v48 }
 0x3ec   : > { %v3756_v42 = vsel %vm3724_vm15, %v3708_v46, %v3740_v19  ;;  %v3666_v35 = vadd.f32 %v3620_v9, %v6308_v36  ;;  %v3635_v39 = vadd.f32 %v4693_v3, %v4385_v22  ;;  %v4393_v15 = vpop.f32.mrf.mxu0  ;;  %v3629_v44 = vpop.f32.mrf.mxu1 }
 0x3ed   : > { %3772 = vst [vmem:[%s5925_s14 + $0x20] sm:$0xff] %v3756_v42  ;;  %v3759_v58 = vsel %vm3727_vm0, %v3711_v14, %v3743_v51  ;;  %vm3726_vm3 = vcmp.ge.f32.partialorder %v3710_v56, 0.0  ;;  %v3742_v16 = vmul.f32 0.01, %v3710_v56  ;;  %v3713_v10 = vadd.f32 %v6350_v17, %v3690_v29 }
 0x3ee   : > { %3775 = vst [vmem:[%s5925_s14 + $0x38] sm:$0xff] %v3759_v58  ;;  %v3689_v0 = vmul.f32 %v6341_v1, %v3666_v35  ;;  %v3669_v24 = vadd.f32 %v3635_v39, %v6321_v7  ;;  %v3630_v43 = vadd.f32 %v4382_v55, %v3629_v44  ;;  %v4395_v11 = vpop.f32.mrf.mxu0  ;;  %v4696_v36 = vpop.f32.mrf.mxu1  ;;  %v4394_v5 = vadd.f32 %v4393_v15, %v4392_v33 }
 0x3ef   : > { %v3758_v41 = vsel %vm3726_vm3, %v3710_v56, %v3742_v16  ;;  %vm3729_vm4 = vcmp.ge.f32.partialorder %v3713_v10, 0.0  ;;  %v3745_v49 = vmul.f32 0.01, %v3713_v10  ;;  %v3645_v45 = vadd.f32 %v4696_v36, %v4391_v37 }
 0x3f0   : > { %3774 = vst [vmem:[%s5925_s14 + $0x30] sm:$0xff] %v3758_v41  ;;  %v3712_v57 = vadd.f32 %v6350_v17, %v3689_v0  ;;  %v3692_v31 = vmul.f32 %v6341_v1, %v3669_v24  ;;  %v3668_v30 = vadd.f32 %v3630_v43, %v6318_v47  ;;  %v4396_v52 = vpop.f32.mrf.mxu0  ;;  %v3639_v27 = vpop.f32.mrf.mxu1 }
 0x3f1   : > { %v3761_v25 = vsel %vm3729_vm4, %v3713_v10, %v3745_v49  ;;  %v3671_v7 = vadd.f32 %v3645_v45, %v6330_v21  ;;  %v4397_v12 = vadd.f32 %v4396_v52, %v4395_v11  ;;  %v3640_v53 = vadd.f32 %v4388_v18, %v3639_v27 }
 0x3f2   : > { %3777 = vst [vmem:[%s5925_s14 + $0x48] sm:$0xff] %v3761_v25  ;;  %vm3728_vm5 = vcmp.ge.f32.partialorder %v3712_v57, 0.0  ;;  %v3744_v4 = vmul.f32 0.01, %v3712_v57  ;;  %v3715_v54 = vadd.f32 %v6350_v17, %v3692_v31  ;;  %v3691_v40 = vmul.f32 %v6341_v1, %v3668_v30  ;;  %v4699_v60 = vpop.f32.mrf.mxu1 }
 0x3f3   : > { %v3694_v47 = vmul.f32 %v6341_v1, %v3671_v7  ;;  %v3670_v32 = vadd.f32 %v3640_v53, %v6326_v62  ;;  %v3655_v28 = vadd.f32 %v4699_v60, %v4397_v12 }
 0x3f4   : > { %v3760_v21 = vsel %vm3728_vm5, %v3712_v57, %v3744_v4  ;;  %vm3731_vm6 = vcmp.ge.f32.partialorder %v3715_v54, 0.0  ;;  %v3747_v20 = vmul.f32 0.01, %v3715_v54  ;;  %v3714_v26 = vadd.f32 %v6350_v17, %v3691_v40  ;;  %v3649_v55 = vpop.f32.mrf.mxu1 }
 0x3f5   : > { %3776 = vst [vmem:[%s5925_s14 + $0x40] sm:$0xff] %v3760_v21  ;;  %v3717_v59 = vadd.f32 %v6350_v17, %v3694_v47  ;;  %v3693_v13 = vmul.f32 %v6341_v1, %v3670_v32  ;;  %v3673_v50 = vadd.f32 %v3655_v28, %v6345_v34  ;;  %v3650_v2 = vadd.f32 %v4394_v5, %v3649_v55 }
 0x3f6   : > { %v3763_v62 = vsel %vm3731_vm6, %v3715_v54, %v3747_v20  ;;  %vm3730_vm7 = vcmp.ge.f32.partialorder %v3714_v26, 0.0  ;;  %v3746_v63 = vmul.f32 0.01, %v3714_v26 }
 0x3f7   : > { %3779 = vst [vmem:[%s5925_s14 + $0x58] sm:$0xff] %v3763_v62  ;;  %vm3733_vm8 = vcmp.ge.f32.partialorder %v3717_v59, 0.0  ;;  %v3749_v46 = vmul.f32 0.01, %v3717_v59  ;;  %v3716_v6 = vadd.f32 %v6350_v17, %v3693_v13  ;;  %v3696_v23 = vmul.f32 %v6341_v1, %v3673_v50 }
 0x3f8   : > { %v3762_v22 = vsel %vm3730_vm7, %v3714_v26, %v3746_v63  ;;  %v3672_v14 = vadd.f32 %v3650_v2, %v6334_v61 }
 0x3f9   : > { %3778 = vst [vmem:[%s5925_s14 + $0x50] sm:$0xff] %v3762_v22  ;;  %v3765_v34 = vsel %vm3733_vm8, %v3717_v59, %v3749_v46  ;;  %vm3732_vm9 = vcmp.ge.f32.partialorder %v3716_v6, 0.0  ;;  %v3748_v8 = vmul.f32 0.01, %v3716_v6  ;;  %v3719_v48 = vadd.f32 %v6350_v17, %v3696_v23 }
 0x3fa   : > { %3781 = vst [vmem:[%s5925_s14 + $0x68] sm:$0xff] %v3765_v34  ;;  %v3695_v38 = vmul.f32 %v6341_v1, %v3672_v14 }
 0x3fb   : > { %v3764_v19 = vsel %vm3732_vm9, %v3716_v6, %v3748_v8  ;;  %vm3735_vm10 = vcmp.ge.f32.partialorder %v3719_v48, 0.0  ;;  %v3751_v9 = vmul.f32 0.01, %v3719_v48 }
 0x3fc   : > { %3780 = vst [vmem:[%s5925_s14 + $0x60] sm:$0xff] %v3764_v19  ;;  %v3718_v61 = vadd.f32 %v6350_v17, %v3695_v38 }
 0x3fd   : > { %v3767_v33 = vsel %vm3735_vm10, %v3719_v48, %v3751_v9 }
 0x3fe   : > { %3783 = vst [vmem:[%s5925_s14 + $0x78] sm:$0xff] %v3767_v33  ;;  %vm3734_vm11 = vcmp.ge.f32.partialorder %v3718_v61, 0.0  ;;  %v3750_v3 = vmul.f32 0.01, %v3718_v61 }
 0x400   : > { %v3766_v1 = vsel %vm3734_vm11, %v3718_v61, %v3750_v3 }
 0x401   : > { %3782 = vst [vmem:[%s5925_s14 + $0x70] sm:$0xff] %v3766_v1 }
 0x402   : > { %4834 = shalt.err (!%p4831_p9)
}
 0x403   : > { %s4835_s14 = scalar_lea.hbm %s6425_s19, 2048  ;;  %s4839_s4 = scalar_lea.hbm %s6491_s7, 8192 }
 0x404   : > { %p4836_p11 = scmp.ne.s32.totalorder %s6425_s19, %s4835_s14  ;;  %p4840_p10 = scmp.lt.s32.totalorder %s6425_s19, %s6491_s7 }
 0x405   : > { %p4841_p12 = scmp.lt.s32.totalorder %s4839_s4, %s4835_s14 }
 0x406   : > { %p4837_p13 = pnand %p4836_p11, %p5020_p3 }
 0x407   : > { %p4842_p0 = por %p4841_p12, %p4840_p10 }
 0x408   : > { %p4838_p1 = pneg %p4837_p13 }
 0x40a   : > { %p4843_p2 = pnand %p4842_p0, %p4838_p1 }
 0x40c   : > { %4846 = shalt.err (!%p4843_p2)
}
 0x40d   : > { %s4927_s17 = smov 128  }
 0x40e   : > { %4710 = dma.vmem_to_hbm [thread:$0]  (%p5020_p3), %s6427_s28, 2048, %s6425_s19, %s6432_s20, %s4927_s17, %s4927_s17, %s4923_s12  }
 0x40f PF: > { %p4722_p4 = scmp.ge.s32.totalorder %s4917_s8, 2  ;;  %s3816_s18 = sand.u32 1, %s4889_s24  }
 0x410   : > { %s3817_s22 = scalar_lea.sflag [#allocation5], %s3816_s18 }
 0x411   : > { %p4717_p5 = pnand %p4722_p4, %p5029_p8 }
 0x413   : > { %p4718_p6 = pneg %p4717_p5 }
 0x415   : > { %4884 = dma.done.wait (%p4718_p6), %s3817_s22, 2048  }
 0x416   : > { %4886 = vsyncadd (%p4718_p6), %s3817_s22, 4294965248  ;;  %s21_s8 = sadd.s32 1, %s4917_s8   ;;  %s6503_s15 = sld [smem:[#allocation9_spill]] }
 0x417   : > { %p18_p7 = scmp.ge.s32.totalorder %s21_s8, 6   ;;  %s6504_s24 = smov %s4893_s25 }
 0x418   : > { %s6505_s25 = smov %s4897_s26  ;;  %s6506_s26 = smov %s5047_s21 }
 0x419   : > { %s6507_s27 = smov %s4909_s29  ;;  %s6508_s28 = smov %s4913_s30 }
 0x41a   : > { %s6509_s29 = smov %s6512_s11  ;;  %20 = sbr.rel (!%p18_p7) target bundleno = 8 (0x8), region = 105 }
 0x41c   : > { %s6510_s30 = smov %s6503_s15 }
 0x41f   :  { %3822 = vsyncpa [#allocation4], 1 }
 0x420   :  { %3824 = vsyncpa [#allocation4 + $0x1], 1 }
 0x421   :  { %3825 = vsyncpa [#allocation5], 1 }
 0x422   :  { %3827 = vsyncpa [#allocation5 + $0x1], 1 }

</bundles_post_ra>
